<compile_context>
chip_gen: v7x
topology: tpu7x:2x2x1
jax: 0.10.0
libtpu: 0.0.40
codegen_flags: <defaults>
</compile_context>

<pallas_src>
import functools

import jax
import jax.numpy as jnp
from jax.experimental import pallas as pl
from jax.experimental.pallas import tpu as pltpu

NEG_SLOPE = 0.01   # LeakyReLU negative_slope
BN_EPS = 1e-5      # nn.BatchNorm2d default eps
POOL_KS = (5, 9, 13)
_BASE_K = 5        # cascaded (SPPF-identity) base pool
_PAD = _BASE_K // 2


def _leaky_relu(x, slope=NEG_SLOPE):
    return jnp.where(x > 0, x, slope * x)


def spp_kernel(x_ref, w1_ref, b1_ref, w2_ref, b2_ref, o_ref, pbuf, rbuf,
               *, H, W, num_pools):
    """One batch sample per grid step.

    x_ref : (1, H*W, C1)            bf16
    w1_ref: (C1, c_)                bf16 (BN scale folded in)
    b1_ref: (1, c_)                 f32
    w2_ref: (num_pools+1, c_, C2)   bf16 (BN scale folded in, pre-split per branch)
    b2_ref: (1, C2)                 f32
    o_ref : (1, H*W, C2)
    pbuf  : VMEM (H+2p, W+2p, c_)   f32  -inf-bordered pooling scratch
    rbuf  : VMEM (H,    W+2p, c_)   f32  row-direction max scratch
    """
    p = _PAD
    c_hid = w1_ref.shape[1]

    # ---- cv1: 1x1 conv = channel matmul (bf16 MXU, f32 accum) + folded-BN bias + LeakyReLU
    x2d = x_ref[0]                                                  # (H*W, C1) bf16
    y = jnp.dot(x2d, w1_ref[...], preferred_element_type=jnp.float32)
    y = _leaky_relu(y + b1_ref[...])                                # (H*W, c_) f32

    # ---- cv2 contribution of the un-pooled branch
    # concat([b0..b3], ch) @ W2  ==  sum_i  b_i @ W2[i]   (weight pre-split per branch)
    z = jnp.dot(y.astype(jnp.bfloat16), w2_ref[0],
                preferred_element_type=jnp.float32)                 # (H*W, C2) f32

    # ---- cascaded SPP pooling: pool5, pool5∘pool5 (==pool9), pool5^3 (==pool13)
    # Single -inf scratch; the center is overwritten per stage, the border stays -inf.
    pbuf[...] = jnp.full(pbuf.shape, -jnp.inf, jnp.float32)
    cur = y.reshape(H, W, c_hid)                                    # tile-aligned split (W%8==0)
    for b in range(num_pools):
        pbuf[p:p + H, p:p + W, :] = cur
        # H-direction max: taps along the leading (untiled) axis of the scratch
        r = pbuf[0:H, :, :]
        for i in range(1, 2 * p + 1):
            r = jnp.maximum(r, pbuf[i:i + H, :, :])
        rbuf[...] = r
        # W-direction max: taps along the sublane axis of rbuf (static Ref slices)
        m = rbuf[:, 0:W, :]
        for i in range(1, 2 * p + 1):
            m = jnp.maximum(m, rbuf[:, i:i + W, :])
        cur = m                                                     # (H, W, c_) f32
        z = z + jnp.dot(cur.reshape(H * W, c_hid).astype(jnp.bfloat16),
                        w2_ref[b + 1], preferred_element_type=jnp.float32)

    o_ref[0] = _leaky_relu(z + b2_ref[...]).astype(o_ref.dtype)     # (H*W, C2)


def spp_forward(x_nchw, prep_params, pool_ks=POOL_KS):
    """x_nchw: (N, C1, H, W) f32 (PyTorch layout). Returns (N, C2, H, W)."""
    N, C1, H, W = x_nchw.shape
    w1, b1, w2, b2 = prep_params
    c_hid = w1.shape[1]
    c2 = w2.shape[2]
    num_pools = len(pool_ks)
    assert w2.shape[0] == num_pools + 1
    # cascade identity (pool9 = pool5∘pool5, pool13 = pool5^3) requires k_i = 5, 9, 13, ...
    assert tuple(pool_ks) == tuple(_BASE_K + i * (_BASE_K - 1) for i in range(num_pools))
    p = _PAD

    # NCHW -> channels-last flat spatial; bf16 MXU operand prepared outside the kernel.
    x_flat = jnp.transpose(x_nchw, (0, 2, 3, 1)).astype(jnp.bfloat16).reshape(N, H * W, C1)

    kernel = functools.partial(spp_kernel, H=H, W=W, num_pools=num_pools)
    out_flat = pl.pallas_call(
        kernel,
        out_shape=jax.ShapeDtypeStruct((N, H * W, c2), x_nchw.dtype),
        grid_spec=pltpu.PrefetchScalarGridSpec(
            num_scalar_prefetch=0,
            grid=(N,),
            in_specs=[
                pl.BlockSpec((1, H * W, C1), lambda n: (n, 0, 0)),
                # weights / biases: constant block index -> fetched once, not re-DMA'd
                pl.BlockSpec((C1, c_hid), lambda n: (0, 0)),
                pl.BlockSpec((1, c_hid), lambda n: (0, 0)),
                pl.BlockSpec((num_pools + 1, c_hid, c2), lambda n: (0, 0, 0)),
                pl.BlockSpec((1, c2), lambda n: (0, 0)),
            ],
            out_specs=pl.BlockSpec((1, H * W, c2), lambda n: (n, 0, 0)),
            scratch_shapes=[
                pltpu.VMEM((H + 2 * p, W + 2 * p, c_hid), jnp.float32),
                pltpu.VMEM((H, W + 2 * p, c_hid), jnp.float32),
            ],
        ),
        compiler_params=pltpu.CompilerParams(
            dimension_semantics=("parallel",)),     # batch samples are independent
    )(x_flat, w1, b1, w2, b2)

    # (N, H*W, C2) -> (N, C2, H, W)
    return jnp.transpose(out_flat.reshape(N, H, W, c2), (0, 3, 1, 2))


def _fold_bn(gamma, beta, mean, var, eps=BN_EPS):
    scale = gamma / jnp.sqrt(var + eps)
    bias = beta - mean * scale
    return scale, bias


def init_spp_params(key, c1, c2, pool_ks=POOL_KS):
    """Deterministic synthetic parameters mirroring SPP.__init__ shapes (raw BN form)."""
    c_ = c1 // 2
    c_cat = c_ * (len(pool_ks) + 1)
    ks = jax.random.split(key, 10)
    # cv1: Conv2d(c1, c_, 1, bias=False) weight (c_, c1, 1, 1) -> (c1, c_) matmul
    w1_oihw = jax.random.normal(ks[0], (c_, c1, 1, 1), jnp.float32) * 0.5
    w1 = w1_oihw[:, :, 0, 0].T
    g1 = jax.random.uniform(ks[1], (c_,), jnp.float32, 0.5, 1.5)
    be1 = jax.random.normal(ks[2], (c_,), jnp.float32) * 0.1
    mu1 = jax.random.normal(ks[3], (c_,), jnp.float32) * 0.1
    va1 = jax.random.uniform(ks[4], (c_,), jnp.float32, 0.5, 1.5)
    s1, b1 = _fold_bn(g1, be1, mu1, va1)
    # cv2: Conv2d(c_*(len(k)+1), c2, 1, bias=False)
    w2_oihw = jax.random.normal(ks[5], (c2, c_cat, 1, 1), jnp.float32) * 0.5
    w2 = w2_oihw[:, :, 0, 0].T
    g2 = jax.random.uniform(ks[6], (c2,), jnp.float32, 0.5, 1.5)
    be2 = jax.random.normal(ks[7], (c2,), jnp.float32) * 0.1
    mu2 = jax.random.normal(ks[8], (c2,), jnp.float32) * 0.1
    va2 = jax.random.uniform(ks[9], (c2,), jnp.float32, 0.5, 1.5)
    s2, b2 = _fold_bn(g2, be2, mu2, va2)
    return (w1, s1, b1, w2, s2, b2)


def prepare_spp_params(raw_params, pool_ks=POOL_KS):
    """One-time prep: fold BN scales into the 1x1 conv weights (exact), pre-split the cv2
    weight per concat branch, cast MXU operands to bf16 (accumulation stays f32)."""
    w1, s1, b1, w2, s2, b2 = raw_params
    num_branches = len(pool_ks) + 1
    c_hid = w1.shape[1]
    c2 = w2.shape[1]
    w1f = (w1 * s1[None, :]).astype(jnp.bfloat16)                    # (C1, c_)
    w2f = (w2 * s2[None, :]).astype(jnp.bfloat16)                    # (c_*(nb), C2)
    w2f = w2f.reshape(num_branches, c_hid, c2)                       # per-branch split
    return (w1f, b1.reshape(1, -1).astype(jnp.float32),
            w2f, b2.reshape(1, -1).astype(jnp.float32))


def spp_reference(x_nchw, prep_params, pool_ks=POOL_KS):
    """Pure-JAX reference (no Pallas): independent 5/9/13 pools + channel concat,
    matching the kernel's bf16 matmul precision. Input/output in NCHW."""
    w1f, b1, w2f, b2 = prep_params
    x = jnp.transpose(x_nchw, (0, 2, 3, 1)).astype(jnp.bfloat16)
    y = jnp.einsum('nhwc,cd->nhwd', x, w1f,
                   preferred_element_type=jnp.float32) + b1
    y = _leaky_relu(y)
    branches = [y]
    for k in pool_ks:
        p = k // 2
        pooled = jax.lax.reduce_window(
            y, -jnp.inf, jax.lax.max,
            window_dimensions=(1, k, k, 1),
            window_strides=(1, 1, 1, 1),
            padding=((0, 0), (p, p), (p, p), (0, 0)))
        branches.append(pooled)
    cat = jnp.concatenate(branches, axis=-1).astype(jnp.bfloat16)
    w2_full = w2f.reshape(-1, w2f.shape[-1])
    z = jnp.einsum('nhwc,cd->nhwd', cat, w2_full,
                   preferred_element_type=jnp.float32) + b2
    z = _leaky_relu(z).astype(x_nchw.dtype)
    return jnp.transpose(z, (0, 3, 1, 2))


if __name__ == "__main__":
    N, C1, H, W, C2 = 2, 4, 16, 16, 8
    key = jax.random.PRNGKey(0)
    kx, kp = jax.random.split(key)
    # PyTorch layout: (N, C1, H, W)
    x_nchw = jax.random.normal(kx, (N, C1, H, W), jnp.float32)
    raw_params = init_spp_params(kp, C1, C2)
    prep_params = prepare_spp_params(raw_params)

    out = jax.block_until_ready(spp_forward(x_nchw, prep_params))
    ref = jax.block_until_ready(spp_reference(x_nchw, prep_params))

    assert out.shape == (N, C2, H, W)
    assert jnp.allclose(out, ref, atol=5e-3, rtol=5e-3), "mismatch vs reference"
    print("KERNEL_OK")
</pallas_src>

<mosaic_0001>
module attributes {stable_mosaic.version = 11 : i64} {
  func.func @spp_kernel(%arg0: i32, %arg1: memref<1x256x4xbf16, #tpu.memory_space<vmem>>, %arg2: memref<4x2xbf16, #tpu.memory_space<vmem>>, %arg3: memref<1x2xf32, #tpu.memory_space<vmem>>, %arg4: memref<4x2x8xbf16, #tpu.memory_space<vmem>>, %arg5: memref<1x8xf32, #tpu.memory_space<vmem>>, %arg6: memref<1x256x8xf32, #tpu.memory_space<vmem>>, %arg7: memref<20x20x2xf32, #tpu.memory_space<vmem>>, %arg8: memref<16x20x2xf32, #tpu.memory_space<vmem>>) attributes {dimension_semantics = [#tpu.dimension_semantics<parallel>], iteration_bounds = array<i64: 2>, scalar_prefetch = 0 : i64, scratch_operands = 2 : i64, tpu.core_type = #tpu.core_type<tc>, window_params = [{transform_indices = @transform_0, window_bounds = array<i64: 1, 256, 4>}, {pipeline_mode = #tpu.pipeline_mode<synchronous>, transform_indices = @transform_1, window_bounds = array<i64: 4, 2>}, {pipeline_mode = #tpu.pipeline_mode<synchronous>, transform_indices = @transform_2, window_bounds = array<i64: 1, 2>}, {pipeline_mode = #tpu.pipeline_mode<synchronous>, transform_indices = @transform_3, window_bounds = array<i64: 4, 2, 8>}, {pipeline_mode = #tpu.pipeline_mode<synchronous>, transform_indices = @transform_4, window_bounds = array<i64: 1, 8>}, {transform_indices = @transform_5, window_bounds = array<i64: 1, 256, 8>}]} {
    %c0 = arith.constant 0 : index
    %c0_0 = arith.constant 0 : index
    %c0_1 = arith.constant 0 : index
    %0 = vector.load %arg1[%c0, %c0_0, %c0_1] : memref<1x256x4xbf16, #tpu.memory_space<vmem>>, vector<1x256x4xbf16>
    %1 = vector.shape_cast %0 : vector<1x256x4xbf16> to vector<256x4xbf16>
    %c0_2 = arith.constant 0 : index
    %c0_3 = arith.constant 0 : index
    %2 = vector.load %arg2[%c0_2, %c0_3] : memref<4x2xbf16, #tpu.memory_space<vmem>>, vector<4x2xbf16>
    %cst = arith.constant dense<0.000000e+00> : vector<256x2xf32>
    %3 = tpu.matmul %1, %2, %cst {dimension_numbers = #tpu.dot_dimension_numbers<[1], [0], [0], [1], [0, 0, 1, 1], [], []>} : vector<256x4xbf16>, vector<4x2xbf16>, vector<256x2xf32> -> vector<256x2xf32>
    %c0_4 = arith.constant 0 : index
    %c0_5 = arith.constant 0 : index
    %4 = vector.load %arg3[%c0_4, %c0_5] : memref<1x2xf32, #tpu.memory_space<vmem>>, vector<1x2xf32>
    %5 = vector.broadcast %4 : vector<1x2xf32> to vector<256x2xf32>
    %6 = arith.addf %3, %5 : vector<256x2xf32>
    %cst_6 = arith.constant 0.000000e+00 : f32
    %7 = vector.broadcast %cst_6 : f32 to vector<256x2xf32>
    %8 = arith.cmpf ogt, %6, %7 : vector<256x2xf32>
    %cst_7 = arith.constant 0.00999999977 : f32
    %9 = vector.broadcast %cst_7 : f32 to vector<256x2xf32>
    %10 = arith.mulf %9, %6 : vector<256x2xf32>
    %11 = arith.select %8, %6, %10 : vector<256x2xi1>, vector<256x2xf32>
    %12 = arith.truncf %11 : vector<256x2xf32> to vector<256x2xbf16>
    %c0_8 = arith.constant 0 : index
    %c0_9 = arith.constant 0 : index
    %c0_10 = arith.constant 0 : index
    %13 = vector.load %arg4[%c0_8, %c0_9, %c0_10] : memref<4x2x8xbf16, #tpu.memory_space<vmem>>, vector<1x2x8xbf16>
    %14 = vector.shape_cast %13 : vector<1x2x8xbf16> to vector<2x8xbf16>
    %cst_11 = arith.constant dense<0.000000e+00> : vector<256x8xf32>
    %15 = tpu.matmul %12, %14, %cst_11 {dimension_numbers = #tpu.dot_dimension_numbers<[1], [0], [0], [1], [0, 0, 1, 1], [], []>} : vector<256x2xbf16>, vector<2x8xbf16>, vector<256x8xf32> -> vector<256x8xf32>
    %cst_12 = arith.constant 0xFF800000 : f32
    %16 = vector.broadcast %cst_12 : f32 to vector<20x20x2xf32>
    %c0_13 = arith.constant 0 : index
    %c0_14 = arith.constant 0 : index
    %c0_15 = arith.constant 0 : index
    %17 = vector.load %arg7[%c0_13, %c0_14, %c0_15] : memref<20x20x2xf32, #tpu.memory_space<vmem>>, vector<20x20x2xf32>
    tpu.vector_store %arg7[%c0_13, %c0_14, %c0_15], %16 {strides = array<i32>} : memref<20x20x2xf32, #tpu.memory_space<vmem>>, vector<20x20x2xf32>,
    %18 = vector.shape_cast %11 : vector<256x2xf32> to vector<16x16x2xf32>
    %c2 = arith.constant 2 : index
    %c2_16 = arith.constant 2 : index
    %c0_17 = arith.constant 0 : index
    %19 = vector.load %arg7[%c2, %c2_16, %c0_17] : memref<20x20x2xf32, #tpu.memory_space<vmem>>, vector<16x16x2xf32>
    tpu.vector_store %arg7[%c2, %c2_16, %c0_17], %18 {strides = array<i32>} : memref<20x20x2xf32, #tpu.memory_space<vmem>>, vector<16x16x2xf32>,
    %c0_18 = arith.constant 0 : index
    %c0_19 = arith.constant 0 : index
    %c0_20 = arith.constant 0 : index
    %20 = vector.load %arg7[%c0_18, %c0_19, %c0_20] : memref<20x20x2xf32, #tpu.memory_space<vmem>>, vector<16x20x2xf32>
    %c1 = arith.constant 1 : index
    %c0_21 = arith.constant 0 : index
    %c0_22 = arith.constant 0 : index
    %21 = vector.load %arg7[%c1, %c0_21, %c0_22] : memref<20x20x2xf32, #tpu.memory_space<vmem>>, vector<16x20x2xf32>
    %22 = arith.maximumf %20, %21 : vector<16x20x2xf32>
    %c2_23 = arith.constant 2 : index
    %c0_24 = arith.constant 0 : index
    %c0_25 = arith.constant 0 : index
    %23 = vector.load %arg7[%c2_23, %c0_24, %c0_25] : memref<20x20x2xf32, #tpu.memory_space<vmem>>, vector<16x20x2xf32>
    %24 = arith.maximumf %22, %23 : vector<16x20x2xf32>
    %c3 = arith.constant 3 : index
    %c0_26 = arith.constant 0 : index
    %c0_27 = arith.constant 0 : index
    %25 = vector.load %arg7[%c3, %c0_26, %c0_27] : memref<20x20x2xf32, #tpu.memory_space<vmem>>, vector<16x20x2xf32>
    %26 = arith.maximumf %24, %25 : vector<16x20x2xf32>
    %c4 = arith.constant 4 : index
    %c0_28 = arith.constant 0 : index
    %c0_29 = arith.constant 0 : index
    %27 = vector.load %arg7[%c4, %c0_28, %c0_29] : memref<20x20x2xf32, #tpu.memory_space<vmem>>, vector<16x20x2xf32>
    %28 = arith.maximumf %26, %27 : vector<16x20x2xf32>
    %c0_30 = arith.constant 0 : index
    %c0_31 = arith.constant 0 : index
    %c0_32 = arith.constant 0 : index
    %29 = vector.load %arg8[%c0_30, %c0_31, %c0_32] : memref<16x20x2xf32, #tpu.memory_space<vmem>>, vector<16x20x2xf32>
    tpu.vector_store %arg8[%c0_30, %c0_31, %c0_32], %28 {strides = array<i32>} : memref<16x20x2xf32, #tpu.memory_space<vmem>>, vector<16x20x2xf32>,
    %c0_33 = arith.constant 0 : index
    %c0_34 = arith.constant 0 : index
    %c0_35 = arith.constant 0 : index
    %30 = vector.load %arg8[%c0_33, %c0_34, %c0_35] : memref<16x20x2xf32, #tpu.memory_space<vmem>>, vector<16x16x2xf32>
    %c0_36 = arith.constant 0 : index
    %c1_37 = arith.constant 1 : index
    %c0_38 = arith.constant 0 : index
    %31 = vector.load %arg8[%c0_36, %c1_37, %c0_38] : memref<16x20x2xf32, #tpu.memory_space<vmem>>, vector<16x16x2xf32>
    %32 = arith.maximumf %30, %31 : vector<16x16x2xf32>
    %c0_39 = arith.constant 0 : index
    %c2_40 = arith.constant 2 : index
    %c0_41 = arith.constant 0 : index
    %33 = vector.load %arg8[%c0_39, %c2_40, %c0_41] : memref<16x20x2xf32, #tpu.memory_space<vmem>>, vector<16x16x2xf32>
    %34 = arith.maximumf %32, %33 : vector<16x16x2xf32>
    %c0_42 = arith.constant 0 : index
    %c3_43 = arith.constant 3 : index
    %c0_44 = arith.constant 0 : index
    %35 = vector.load %arg8[%c0_42, %c3_43, %c0_44] : memref<16x20x2xf32, #tpu.memory_space<vmem>>, vector<16x16x2xf32>
    %36 = arith.maximumf %34, %35 : vector<16x16x2xf32>
    %c0_45 = arith.constant 0 : index
    %c4_46 = arith.constant 4 : index
    %c0_47 = arith.constant 0 : index
    %37 = vector.load %arg8[%c0_45, %c4_46, %c0_47] : memref<16x20x2xf32, #tpu.memory_space<vmem>>, vector<16x16x2xf32>
    %38 = arith.maximumf %36, %37 : vector<16x16x2xf32>
    %39 = vector.shape_cast %38 : vector<16x16x2xf32> to vector<256x2xf32>
    %40 = arith.truncf %39 : vector<256x2xf32> to vector<256x2xbf16>
    %c1_48 = arith.constant 1 : index
    %c0_49 = arith.constant 0 : index
    %c0_50 = arith.constant 0 : index
    %41 = vector.load %arg4[%c1_48, %c0_49, %c0_50] : memref<4x2x8xbf16, #tpu.memory_space<vmem>>, vector<1x2x8xbf16>
    %42 = vector.shape_cast %41 : vector<1x2x8xbf16> to vector<2x8xbf16>
    %cst_51 = arith.constant dense<0.000000e+00> : vector<256x8xf32>
    %43 = tpu.matmul %40, %42, %cst_51 {dimension_numbers = #tpu.dot_dimension_numbers<[1], [0], [0], [1], [0, 0, 1, 1], [], []>} : vector<256x2xbf16>, vector<2x8xbf16>, vector<256x8xf32> -> vector<256x8xf32>
    %44 = arith.addf %15, %43 : vector<256x8xf32>
    %c2_52 = arith.constant 2 : index
    %c2_53 = arith.constant 2 : index
    %c0_54 = arith.constant 0 : index
    %45 = vector.load %arg7[%c2_52, %c2_53, %c0_54] : memref<20x20x2xf32, #tpu.memory_space<vmem>>, vector<16x16x2xf32>
    tpu.vector_store %arg7[%c2_52, %c2_53, %c0_54], %38 {strides = array<i32>} : memref<20x20x2xf32, #tpu.memory_space<vmem>>, vector<16x16x2xf32>,
    %c0_55 = arith.constant 0 : index
    %c0_56 = arith.constant 0 : index
    %c0_57 = arith.constant 0 : index
    %46 = vector.load %arg7[%c0_55, %c0_56, %c0_57] : memref<20x20x2xf32, #tpu.memory_space<vmem>>, vector<16x20x2xf32>
    %c1_58 = arith.constant 1 : index
    %c0_59 = arith.constant 0 : index
    %c0_60 = arith.constant 0 : index
    %47 = vector.load %arg7[%c1_58, %c0_59, %c0_60] : memref<20x20x2xf32, #tpu.memory_space<vmem>>, vector<16x20x2xf32>
    %48 = arith.maximumf %46, %47 : vector<16x20x2xf32>
    %c2_61 = arith.constant 2 : index
    %c0_62 = arith.constant 0 : index
    %c0_63 = arith.constant 0 : index
    %49 = vector.load %arg7[%c2_61, %c0_62, %c0_63] : memref<20x20x2xf32, #tpu.memory_space<vmem>>, vector<16x20x2xf32>
    %50 = arith.maximumf %48, %49 : vector<16x20x2xf32>
    %c3_64 = arith.constant 3 : index
    %c0_65 = arith.constant 0 : index
    %c0_66 = arith.constant 0 : index
    %51 = vector.load %arg7[%c3_64, %c0_65, %c0_66] : memref<20x20x2xf32, #tpu.memory_space<vmem>>, vector<16x20x2xf32>
    %52 = arith.maximumf %50, %51 : vector<16x20x2xf32>
    %c4_67 = arith.constant 4 : index
    %c0_68 = arith.constant 0 : index
    %c0_69 = arith.constant 0 : index
    %53 = vector.load %arg7[%c4_67, %c0_68, %c0_69] : memref<20x20x2xf32, #tpu.memory_space<vmem>>, vector<16x20x2xf32>
    %54 = arith.maximumf %52, %53 : vector<16x20x2xf32>
    %c0_70 = arith.constant 0 : index
    %c0_71 = arith.constant 0 : index
    %c0_72 = arith.constant 0 : index
    %55 = vector.load %arg8[%c0_70, %c0_71, %c0_72] : memref<16x20x2xf32, #tpu.memory_space<vmem>>, vector<16x20x2xf32>
    tpu.vector_store %arg8[%c0_70, %c0_71, %c0_72], %54 {strides = array<i32>} : memref<16x20x2xf32, #tpu.memory_space<vmem>>, vector<16x20x2xf32>,
    %c0_73 = arith.constant 0 : index
    %c0_74 = arith.constant 0 : index
    %c0_75 = arith.constant 0 : index
    %56 = vector.load %arg8[%c0_73, %c0_74, %c0_75] : memref<16x20x2xf32, #tpu.memory_space<vmem>>, vector<16x16x2xf32>
    %c0_76 = arith.constant 0 : index
    %c1_77 = arith.constant 1 : index
    %c0_78 = arith.constant 0 : index
    %57 = vector.load %arg8[%c0_76, %c1_77, %c0_78] : memref<16x20x2xf32, #tpu.memory_space<vmem>>, vector<16x16x2xf32>
    %58 = arith.maximumf %56, %57 : vector<16x16x2xf32>
    %c0_79 = arith.constant 0 : index
    %c2_80 = arith.constant 2 : index
    %c0_81 = arith.constant 0 : index
    %59 = vector.load %arg8[%c0_79, %c2_80, %c0_81] : memref<16x20x2xf32, #tpu.memory_space<vmem>>, vector<16x16x2xf32>
    %60 = arith.maximumf %58, %59 : vector<16x16x2xf32>
    %c0_82 = arith.constant 0 : index
    %c3_83 = arith.constant 3 : index
    %c0_84 = arith.constant 0 : index
    %61 = vector.load %arg8[%c0_82, %c3_83, %c0_84] : memref<16x20x2xf32, #tpu.memory_space<vmem>>, vector<16x16x2xf32>
    %62 = arith.maximumf %60, %61 : vector<16x16x2xf32>
    %c0_85 = arith.constant 0 : index
    %c4_86 = arith.constant 4 : index
    %c0_87 = arith.constant 0 : index
    %63 = vector.load %arg8[%c0_85, %c4_86, %c0_87] : memref<16x20x2xf32, #tpu.memory_space<vmem>>, vector<16x16x2xf32>
    %64 = arith.maximumf %62, %63 : vector<16x16x2xf32>
    %65 = vector.shape_cast %64 : vector<16x16x2xf32> to vector<256x2xf32>
    %66 = arith.truncf %65 : vector<256x2xf32> to vector<256x2xbf16>
    %c2_88 = arith.constant 2 : index
    %c0_89 = arith.constant 0 : index
    %c0_90 = arith.constant 0 : index
    %67 = vector.load %arg4[%c2_88, %c0_89, %c0_90] : memref<4x2x8xbf16, #tpu.memory_space<vmem>>, vector<1x2x8xbf16>
    %68 = vector.shape_cast %67 : vector<1x2x8xbf16> to vector<2x8xbf16>
    %cst_91 = arith.constant dense<0.000000e+00> : vector<256x8xf32>
    %69 = tpu.matmul %66, %68, %cst_91 {dimension_numbers = #tpu.dot_dimension_numbers<[1], [0], [0], [1], [0, 0, 1, 1], [], []>} : vector<256x2xbf16>, vector<2x8xbf16>, vector<256x8xf32> -> vector<256x8xf32>
    %70 = arith.addf %44, %69 : vector<256x8xf32>
    %c2_92 = arith.constant 2 : index
    %c2_93 = arith.constant 2 : index
    %c0_94 = arith.constant 0 : index
    %71 = vector.load %arg7[%c2_92, %c2_93, %c0_94] : memref<20x20x2xf32, #tpu.memory_space<vmem>>, vector<16x16x2xf32>
    tpu.vector_store %arg7[%c2_92, %c2_93, %c0_94], %64 {strides = array<i32>} : memref<20x20x2xf32, #tpu.memory_space<vmem>>, vector<16x16x2xf32>,
    %c0_95 = arith.constant 0 : index
    %c0_96 = arith.constant 0 : index
    %c0_97 = arith.constant 0 : index
    %72 = vector.load %arg7[%c0_95, %c0_96, %c0_97] : memref<20x20x2xf32, #tpu.memory_space<vmem>>, vector<16x20x2xf32>
    %c1_98 = arith.constant 1 : index
    %c0_99 = arith.constant 0 : index
    %c0_100 = arith.constant 0 : index
    %73 = vector.load %arg7[%c1_98, %c0_99, %c0_100] : memref<20x20x2xf32, #tpu.memory_space<vmem>>, vector<16x20x2xf32>
    %74 = arith.maximumf %72, %73 : vector<16x20x2xf32>
    %c2_101 = arith.constant 2 : index
    %c0_102 = arith.constant 0 : index
    %c0_103 = arith.constant 0 : index
    %75 = vector.load %arg7[%c2_101, %c0_102, %c0_103] : memref<20x20x2xf32, #tpu.memory_space<vmem>>, vector<16x20x2xf32>
    %76 = arith.maximumf %74, %75 : vector<16x20x2xf32>
    %c3_104 = arith.constant 3 : index
    %c0_105 = arith.constant 0 : index
    %c0_106 = arith.constant 0 : index
    %77 = vector.load %arg7[%c3_104, %c0_105, %c0_106] : memref<20x20x2xf32, #tpu.memory_space<vmem>>, vector<16x20x2xf32>
    %78 = arith.maximumf %76, %77 : vector<16x20x2xf32>
    %c4_107 = arith.constant 4 : index
    %c0_108 = arith.constant 0 : index
    %c0_109 = arith.constant 0 : index
    %79 = vector.load %arg7[%c4_107, %c0_108, %c0_109] : memref<20x20x2xf32, #tpu.memory_space<vmem>>, vector<16x20x2xf32>
    %80 = arith.maximumf %78, %79 : vector<16x20x2xf32>
    %c0_110 = arith.constant 0 : index
    %c0_111 = arith.constant 0 : index
    %c0_112 = arith.constant 0 : index
    %81 = vector.load %arg8[%c0_110, %c0_111, %c0_112] : memref<16x20x2xf32, #tpu.memory_space<vmem>>, vector<16x20x2xf32>
    tpu.vector_store %arg8[%c0_110, %c0_111, %c0_112], %80 {strides = array<i32>} : memref<16x20x2xf32, #tpu.memory_space<vmem>>, vector<16x20x2xf32>,
    %c0_113 = arith.constant 0 : index
    %c0_114 = arith.constant 0 : index
    %c0_115 = arith.constant 0 : index
    %82 = vector.load %arg8[%c0_113, %c0_114, %c0_115] : memref<16x20x2xf32, #tpu.memory_space<vmem>>, vector<16x16x2xf32>
    %c0_116 = arith.constant 0 : index
    %c1_117 = arith.constant 1 : index
    %c0_118 = arith.constant 0 : index
    %83 = vector.load %arg8[%c0_116, %c1_117, %c0_118] : memref<16x20x2xf32, #tpu.memory_space<vmem>>, vector<16x16x2xf32>
    %84 = arith.maximumf %82, %83 : vector<16x16x2xf32>
    %c0_119 = arith.constant 0 : index
    %c2_120 = arith.constant 2 : index
    %c0_121 = arith.constant 0 : index
    %85 = vector.load %arg8[%c0_119, %c2_120, %c0_121] : memref<16x20x2xf32, #tpu.memory_space<vmem>>, vector<16x16x2xf32>
    %86 = arith.maximumf %84, %85 : vector<16x16x2xf32>
    %c0_122 = arith.constant 0 : index
    %c3_123 = arith.constant 3 : index
    %c0_124 = arith.constant 0 : index
    %87 = vector.load %arg8[%c0_122, %c3_123, %c0_124] : memref<16x20x2xf32, #tpu.memory_space<vmem>>, vector<16x16x2xf32>
    %88 = arith.maximumf %86, %87 : vector<16x16x2xf32>
    %c0_125 = arith.constant 0 : index
    %c4_126 = arith.constant 4 : index
    %c0_127 = arith.constant 0 : index
    %89 = vector.load %arg8[%c0_125, %c4_126, %c0_127] : memref<16x20x2xf32, #tpu.memory_space<vmem>>, vector<16x16x2xf32>
    %90 = arith.maximumf %88, %89 : vector<16x16x2xf32>
    %91 = vector.shape_cast %90 : vector<16x16x2xf32> to vector<256x2xf32>
    %92 = arith.truncf %91 : vector<256x2xf32> to vector<256x2xbf16>
    %c3_128 = arith.constant 3 : index
    %c0_129 = arith.constant 0 : index
    %c0_130 = arith.constant 0 : index
    %93 = vector.load %arg4[%c3_128, %c0_129, %c0_130] : memref<4x2x8xbf16, #tpu.memory_space<vmem>>, vector<1x2x8xbf16>
    %94 = vector.shape_cast %93 : vector<1x2x8xbf16> to vector<2x8xbf16>
    %cst_131 = arith.constant dense<0.000000e+00> : vector<256x8xf32>
    %95 = tpu.matmul %92, %94, %cst_131 {dimension_numbers = #tpu.dot_dimension_numbers<[1], [0], [0], [1], [0, 0, 1, 1], [], []>} : vector<256x2xbf16>, vector<2x8xbf16>, vector<256x8xf32> -> vector<256x8xf32>
    %96 = arith.addf %70, %95 : vector<256x8xf32>
    %c0_132 = arith.constant 0 : index
    %c0_133 = arith.constant 0 : index
    %97 = vector.load %arg5[%c0_132, %c0_133] : memref<1x8xf32, #tpu.memory_space<vmem>>, vector<1x8xf32>
    %98 = vector.broadcast %97 : vector<1x8xf32> to vector<256x8xf32>
    %99 = arith.addf %96, %98 : vector<256x8xf32>
    %cst_134 = arith.constant 0.000000e+00 : f32
    %100 = vector.broadcast %cst_134 : f32 to vector<256x8xf32>
    %101 = arith.cmpf ogt, %99, %100 : vector<256x8xf32>
    %cst_135 = arith.constant 0.00999999977 : f32
    %102 = vector.broadcast %cst_135 : f32 to vector<256x8xf32>
    %103 = arith.mulf %102, %99 : vector<256x8xf32>
    %104 = arith.select %101, %99, %103 : vector<256x8xi1>, vector<256x8xf32>
    %c0_136 = arith.constant 0 : index
    %c0_137 = arith.constant 0 : index
    %c0_138 = arith.constant 0 : index
    %105 = vector.load %arg6[%c0_136, %c0_137, %c0_138] : memref<1x256x8xf32, #tpu.memory_space<vmem>>, vector<1x256x8xf32>
    %106 = vector.shape_cast %105 : vector<1x256x8xf32> to vector<256x8xf32>
    %107 = vector.shape_cast %104 : vector<256x8xf32> to vector<1x256x8xf32>
    tpu.vector_store %arg6[%c0_136, %c0_137, %c0_138], %107 {strides = array<i32>} : memref<1x256x8xf32, #tpu.memory_space<vmem>>, vector<1x256x8xf32>,
    return
  }
  func.func @transform_0(%arg0: i32) -> (i32, i32, i32) {
    %c0_i32 = arith.constant 0 : i32
    %c0_i32_0 = arith.constant 0 : i32
    %c0_i32_1 = arith.constant 0 : i32
    return %arg0, %c0_i32, %c0_i32_0 : i32, i32, i32
  }
  func.func @transform_1(%arg0: i32) -> (i32, i32) {
    %c0_i32 = arith.constant 0 : i32
    %c0_i32_0 = arith.constant 0 : i32
    %c0_i32_1 = arith.constant 0 : i32
    return %c0_i32, %c0_i32_0 : i32, i32
  }
  func.func @transform_2(%arg0: i32) -> (i32, i32) {
    %c0_i32 = arith.constant 0 : i32
    %c0_i32_0 = arith.constant 0 : i32
    %c0_i32_1 = arith.constant 0 : i32
    return %c0_i32, %c0_i32_0 : i32, i32
  }
  func.func @transform_3(%arg0: i32) -> (i32, i32, i32) {
    %c0_i32 = arith.constant 0 : i32
    %c0_i32_0 = arith.constant 0 : i32
    %c0_i32_1 = arith.constant 0 : i32
    %c0_i32_2 = arith.constant 0 : i32
    return %c0_i32, %c0_i32_0, %c0_i32_1 : i32, i32, i32
  }
  func.func @transform_4(%arg0: i32) -> (i32, i32) {
    %c0_i32 = arith.constant 0 : i32
    %c0_i32_0 = arith.constant 0 : i32
    %c0_i32_1 = arith.constant 0 : i32
    return %c0_i32, %c0_i32_0 : i32, i32
  }
  func.func @transform_5(%arg0: i32) -> (i32, i32, i32) {
    %c0_i32 = arith.constant 0 : i32
    %c0_i32_0 = arith.constant 0 : i32
    %c0_i32_1 = arith.constant 0 : i32
    return %arg0, %c0_i32, %c0_i32_0 : i32, i32, i32
  }
}

</mosaic_0001>

<bundles_post_ra>
// kernel: tpu_custom_call.1
= control target key start
LH: loop header
LB: loop body
LE: loop exit
PB: predicated region body
PF: predicated region fallthrough
CT: control target
= control target key end

     0   :  { %s4874_s18 = smov 0   ;;  %s7035_s0 = inlined_call_operand.vmem [shape: bf16[2,256,4], index: 0, kind: input, shape index: {}]   ;;  %s7036_s1 = inlined_call_operand.vmem [shape: bf16[4,2], index: 1, kind: input, shape index: {}]   ;;  %s7037_s2 = inlined_call_operand.vmem [shape: f32[1,2], index: 2, kind: input, shape index: {}]   ;;  %s7038_s3 = inlined_call_operand.vmem [shape: bf16[4,2,8], index: 3, kind: input, shape index: {}]   ;;  %s7039_s4 = inlined_call_operand.vmem [shape: f32[1,8], index: 4, kind: input, shape index: {}]   ;;  %s7040_s5 = inlined_call_operand.vmem [shape: f32[2,256,8], index: 5, kind: output, shape index: {}]  }
   0x1 LB: > { %s4329_s19 = sadd.s32 4294967295, %s4841_s18   ;;  %p4333_p0 = scmp.ge.s32.totalorder %s4841_s18, 1  ;;  %s4841_s18 = sphi %s4874_s18, %s15_s18  }
   0x2   : > { %p187_p1 = scmp.lt.s32.totalorder %s4841_s18, 3 }
   0x4   : > { %p188_p2 = pnand %p4333_p0, %p187_p1 }
   0x6   : > { %191 = sbr.rel (%p188_p2) target bundleno = 818 (0x332), region = 40 }
   0xd   : > { %v258_v0 = vld [vmem:[%s7036_s1] sm:$0x3]  ;;  %vm395_vm0 = vcmask 1041408   ;;  %p215_p3 = scmp.lt.s32.totalorder %s4329_s19, 1  ;;  %vm346_vm1 = vcmask 31744   ;;  %vm673_vm2 = vcmask 15360  }
   0xe   : > { %4796 = vmatprep.subr.msk.bf16.mxu0 %vm395_vm0, %v258_v0  ;;  %v397_v1 = vsel %vm395_vm0, %v258_v0, 0  ;;  %v4843_v18 = vmov -inf   ;;  %vm676_vm3 = vcmask 11264   ;;  %v672_v19 = vld [vmem:[%s7038_s3] sm:$0x1]  ;;  %vm1605_vm4 = vcmask 1040384  }
   0xf   : > { %4529 = vmatpush3.bf16.msra.mxu0 %v397_v1  ;;  %s7141_s19 = smov (!%p215_p3, %s4329_s19), 1  ;;  %684 = vst.msk [vmem:[#allocation2 + $0x48] sm:$0xff] %vm673_vm2, %v4843_v18  ;;  %685 = vst.msk [vmem:[#allocation2 + $0x50] sm:$0xff] %vm673_vm2, %v4843_v18  ;;  %4799 = vmatprep.subr.msk.bf16.mxu1 %vm1605_vm4, %v672_v19  ;;  %v4990_v20 = vsel %vm1605_vm4, %v672_v19, 0  ;;  %v4371_v21 = vld [vmem:[%s7038_s3 + $0x1] sm:$0x1] }
  0x10   : > { %s4441_s22 = sshll.u32 %s7141_s19, 7  ;;  %674 = vst.msk [vmem:[#allocation2] sm:$0xff] %vm673_vm2, %v4843_v18  ;;  %675 = vst.msk [vmem:[#allocation2 + $0x8] sm:$0xff] %vm673_vm2, %v4843_v18  ;;  %4699 = vmatpush3.bf16.msra.mxu1 %v4990_v20  ;;  %4797 = vmatprep.subr.msk.bf16.mxu0 %vm1605_vm4, %v4371_v21  ;;  %v1607_v22 = vsel %vm1605_vm4, %v4371_v21, 0  ;;  %v5002_v23 = vld [vmem:[%s7038_s3 + $0x2] sm:$0x1] }
  0x11   : > { %s4891_s25 = scalar_lea.vmem %s7035_s0, %s4441_s22  ;;  %678 = vst.msk [vmem:[#allocation2 + $0x18] sm:$0xff] %vm673_vm2, %v4843_v18  ;;  %679 = vst.msk [vmem:[#allocation2 + $0x20] sm:$0xff] %vm673_vm2, %v4843_v18  ;;  %4800 = vmatprep.subr.msk.bf16.mxu1 %vm1605_vm4, %v5002_v23  ;;  %v5009_v24 = vld [vmem:[%s7037_s2] ss:$0 sm:$0xff]  ;;  %s4442_s17 = sshll.u32 %s7141_s19, 8 }
  0x12   : > { %v4811_v2 = vld [vmem:[%s4891_s25] sm:$0xff]   ;;  %v4812_v3 = vld [vmem:[%s4891_s25 + $0x8] sm:$0xff]   ;;  %v4813_v4 = vld [vmem:[%s4891_s25 + $0x10] sm:$0xff]   ;;  %681 = vst.msk [vmem:[#allocation2 + $0x30] sm:$0xff] %vm673_vm2, %v4843_v18  ;;  %s6912_s22 = scalar_lea.vmem %s7040_s5, %s4442_s17 }
  0x13   : > { %4530 = vmatprep.mubr.msk.bf16.mxu0 %vm346_vm1, %v4811_v2  ;;  %v4814_v5 = vld [vmem:[%s4891_s25 + $0x18] sm:$0xff]   ;;  %v4815_v6 = vld [vmem:[%s4891_s25 + $0x20] sm:$0xff]   ;;  %v4816_v7 = vld [vmem:[%s4891_s25 + $0x28] sm:$0xff]   ;;  %682 = vst.msk [vmem:[#allocation2 + $0x38] sm:$0xff] %vm673_vm2, %v4843_v18 }
  0x14   : > { %4531 = vmatmul.mubr.msk.bf16.vlgmr.msra.gmra.mrb[0].mxu0 %vm346_vm1, %v4812_v3  ;;  %v4817_v8 = vld [vmem:[%s4891_s25 + $0x30] sm:$0xff]   ;;  %v4818_v9 = vld [vmem:[%s4891_s25 + $0x38] sm:$0xff]   ;;  %v4819_v10 = vld [vmem:[%s4891_s25 + $0x40] sm:$0xff]   ;;  %687 = vst.msk [vmem:[#allocation2 + $0x60] sm:$0xff] %vm673_vm2, %v4843_v18 }
  0x15   : > { %4534 = vmatprep.mubr.msk.bf16.mxu0 %vm346_vm1, %v4813_v4  ;;  %v4820_v11 = vld [vmem:[%s4891_s25 + $0x48] sm:$0xff]   ;;  %v4821_v12 = vld [vmem:[%s4891_s25 + $0x50] sm:$0xff]   ;;  %v4822_v13 = vld [vmem:[%s4891_s25 + $0x58] sm:$0xff]   ;;  %688 = vst.msk [vmem:[#allocation2 + $0x68] sm:$0xff] %vm673_vm2, %v4843_v18  ;;  %4563 = vmatpush3.bf16.msra.mxu0 %v1607_v22  ;;  %v5087_v22 = vsel %vm1605_vm4, %v5002_v23, 0 }
  0x16   : > { %v4823_v14 = vld [vmem:[%s4891_s25 + $0x60] sm:$0xff]   ;;  %v4824_v15 = vld [vmem:[%s4891_s25 + $0x68] sm:$0xff]   ;;  %v4825_v16 = vld [vmem:[%s4891_s25 + $0x70] sm:$0xff]   ;;  %690 = vst.msk [vmem:[#allocation2 + $0x78] sm:$0xff] %vm673_vm2, %v4843_v18  ;;  %4798 = vmatprep.subr.msk.bf16.mxu0 %vm1605_vm4, %v672_v19 }
  0x17   : > { %v4826_v17 = vld [vmem:[%s4891_s25 + $0x78] sm:$0xff]   ;;  %691 = vst.msk [vmem:[#allocation2 + $0x80] sm:$0xff] %vm673_vm2, %v4843_v18  ;;  %693 = vst.msk [vmem:[#allocation2 + $0x90] sm:$0xff] %vm673_vm2, %v4843_v18  ;;  %v768_v48 = vld [vmem:[#allocation2] sm:$0xff] }
  0x18   : > { %694 = vst.msk [vmem:[#allocation2 + $0x98] sm:$0xff] %vm673_vm2, %v4843_v18  ;;  %696 = vst.msk [vmem:[#allocation2 + $0xa8] sm:$0xff] %vm673_vm2, %v4843_v18  ;;  %v771_v49 = vld [vmem:[#allocation2 + $0x18] sm:$0xff]  ;;  %v769_v53 = vld [vmem:[#allocation2 + $0x8] sm:$0xff] }
  0x19   : > { %697 = vst.msk [vmem:[#allocation2 + $0xb0] sm:$0xff] %vm673_vm2, %v4843_v18  ;;  %699 = vst.msk [vmem:[#allocation2 + $0xc0] sm:$0xff] %vm673_vm2, %v4843_v18  ;;  %v5039_v57 = vld [vmem:[#allocation2 + $0x20] sm:$0xff]  ;;  %v5045_v61 = vmax.f32 %v768_v48, %v771_v49  ;;  %v5055_v2 = vld [vmem:[#allocation2 + $0x8] sm:$0xff] }
  0x1a   : > { %700 = vst.msk [vmem:[#allocation2 + $0xc8] sm:$0xff] %vm673_vm2, %v4843_v18  ;;  %702 = vst.msk [vmem:[#allocation2 + $0xd8] sm:$0xff] %vm673_vm2, %v4843_v18  ;;  %v5057_v3 = vld [vmem:[#allocation2 + $0x18] sm:$0xff]  ;;  %v5059_v4 = vld [vmem:[#allocation2 + $0x20] sm:$0xff] }
  0x1b   : > { %703 = vst.msk [vmem:[#allocation2 + $0xe0] sm:$0xff] %vm673_vm2, %v4843_v18  ;;  %705 = vst.msk [vmem:[#allocation2 + $0xf0] sm:$0xff] %vm673_vm2, %v4843_v18 }
  0x1c   : > { %4535 = vmatmul.mubr.msk.bf16.gmra.mrb[4].mxu0 %vm346_vm1, %v4814_v5  ;;  %706 = vst.msk [vmem:[#allocation2 + $0xf8] sm:$0xff] %vm673_vm2, %v4843_v18  ;;  %708 = vst.msk [vmem:[#allocation2 + $0x108] sm:$0xff] %vm673_vm2, %v4843_v18 }
  0x1d   : > { %4538 = vmatprep.mubr.msk.bf16.mxu0 %vm346_vm1, %v4815_v6  ;;  %709 = vst.msk [vmem:[#allocation2 + $0x110] sm:$0xff] %vm673_vm2, %v4843_v18  ;;  %711 = vst.msk [vmem:[#allocation2 + $0x120] sm:$0xff] %vm673_vm2, %v4843_v18  ;;  %v5063_v6 = vmax.f32 %v769_v53, %v5039_v57 }
  0x1e   : > { %712 = vst.msk [vmem:[#allocation2 + $0x128] sm:$0xff] %vm673_vm2, %v4843_v18  ;;  %714 = vst.msk [vmem:[#allocation2 + $0x138] sm:$0xff] %vm673_vm2, %v4843_v18 }
  0x1f   : > { %715 = vst.msk [vmem:[#allocation2 + $0x140] sm:$0xff] %vm673_vm2, %v4843_v18  ;;  %717 = vst.msk [vmem:[#allocation2 + $0x150] sm:$0xff] %vm673_vm2, %v4843_v18 }
  0x20   : > { %718 = vst.msk [vmem:[#allocation2 + $0x158] sm:$0xff] %vm673_vm2, %v4843_v18  ;;  %720 = vst.msk [vmem:[#allocation2 + $0x168] sm:$0xff] %vm673_vm2, %v4843_v18 }
  0x21   : > { %721 = vst.msk [vmem:[#allocation2 + $0x170] sm:$0xff] %vm673_vm2, %v4843_v18  ;;  %723 = vst.msk [vmem:[#allocation2 + $0x180] sm:$0xff] %vm673_vm2, %v4843_v18 }
  0x22   : > { %724 = vst.msk [vmem:[#allocation2 + $0x188] sm:$0xff] %vm673_vm2, %v4843_v18  ;;  %726 = vst.msk [vmem:[#allocation2 + $0x198] sm:$0xff] %vm673_vm2, %v4843_v18 }
  0x23   : > { %727 = vst.msk [vmem:[#allocation2 + $0x1a0] sm:$0xff] %vm673_vm2, %v4843_v18  ;;  %729 = vst.msk [vmem:[#allocation2 + $0x1b0] sm:$0xff] %vm673_vm2, %v4843_v18 }
  0x24   : > { %4539 = vmatmul.mubr.msk.bf16.gmra.mrb[8].mxu0 %vm346_vm1, %v4816_v7  ;;  %730 = vst.msk [vmem:[#allocation2 + $0x1b8] sm:$0xff] %vm673_vm2, %v4843_v18  ;;  %732 = vst.msk [vmem:[#allocation2 + $0x1c8] sm:$0xff] %vm673_vm2, %v4843_v18 }
  0x25   : > { %4542 = vmatprep.mubr.msk.bf16.mxu0 %vm346_vm1, %v4817_v8  ;;  %733 = vst.msk [vmem:[#allocation2 + $0x1d0] sm:$0xff] %vm673_vm2, %v4843_v18  ;;  %7068 = vst [vmem:[#allocation9_spill] sm:$0xff] %v5045_v61 }
  0x26   : > { %686 = vst.msk [vmem:[#allocation2 + $0x58] sm:$0xf] %vm676_vm3, %v4843_v18  ;;  %677 = vst.msk [vmem:[#allocation2 + $0x10] sm:$0xf] %vm676_vm3, %v4843_v18 }
  0x27   : > { %680 = vst.msk [vmem:[#allocation2 + $0x28] sm:$0xf] %vm676_vm3, %v4843_v18  ;;  %683 = vst.msk [vmem:[#allocation2 + $0x40] sm:$0xf] %vm676_vm3, %v4843_v18 }
  0x28   : > { %689 = vst.msk [vmem:[#allocation2 + $0x70] sm:$0xf] %vm676_vm3, %v4843_v18  ;;  %692 = vst.msk [vmem:[#allocation2 + $0x88] sm:$0xf] %vm676_vm3, %v4843_v18 }
  0x29   : > { %695 = vst.msk [vmem:[#allocation2 + $0xa0] sm:$0xf] %vm676_vm3, %v4843_v18  ;;  %698 = vst.msk [vmem:[#allocation2 + $0xb8] sm:$0xf] %vm676_vm3, %v4843_v18 }
  0x2a   : > { %701 = vst.msk [vmem:[#allocation2 + $0xd0] sm:$0xf] %vm676_vm3, %v4843_v18  ;;  %704 = vst.msk [vmem:[#allocation2 + $0xe8] sm:$0xf] %vm676_vm3, %v4843_v18 }
  0x2b   : > { %707 = vst.msk [vmem:[#allocation2 + $0x100] sm:$0xf] %vm676_vm3, %v4843_v18  ;;  %710 = vst.msk [vmem:[#allocation2 + $0x118] sm:$0xf] %vm676_vm3, %v4843_v18 }
  0x2c   : > { %4543 = vmatmul.mubr.msk.bf16.gmra.mrb[12].mxu0 %vm346_vm1, %v4818_v9  ;;  %713 = vst.msk [vmem:[#allocation2 + $0x130] sm:$0xf] %vm676_vm3, %v4843_v18  ;;  %716 = vst.msk [vmem:[#allocation2 + $0x148] sm:$0xf] %vm676_vm3, %v4843_v18 }
  0x2d   : > { %4546 = vmatprep.mubr.msk.bf16.mxu0 %vm346_vm1, %v4819_v10  ;;  %719 = vst.msk [vmem:[#allocation2 + $0x160] sm:$0xf] %vm676_vm3, %v4843_v18  ;;  %722 = vst.msk [vmem:[#allocation2 + $0x178] sm:$0xf] %vm676_vm3, %v4843_v18  ;;  %v770_v56 = vld [vmem:[#allocation2 + $0x10] sm:$0xf] }
  0x2e   : > { %725 = vst.msk [vmem:[#allocation2 + $0x190] sm:$0xf] %vm676_vm3, %v4843_v18  ;;  %728 = vst.msk [vmem:[#allocation2 + $0x1a8] sm:$0xf] %vm676_vm3, %v4843_v18  ;;  %v819_v62 = vld [vmem:[#allocation2 + $0x28] sm:$0xf] }
  0x2f   : > { %731 = vst.msk [vmem:[#allocation2 + $0x1c0] sm:$0xf] %vm676_vm3, %v4843_v18  ;;  %734 = vst.msk [vmem:[#allocation2 + $0x1d8] sm:$0xf] %vm676_vm3, %v4843_v18  ;;  %v5071_v10 = vld [vmem:[#allocation2] sm:$0xff] }
  0x30   : > { %7071 = vst [vmem:[#allocation12_spill] sm:$0xff] %v5063_v6  ;;  %7073 = vst [vmem:[#allocation14_spill] sm:$0xff] %v5071_v10 }
  0x34   : > { %4547 = vmatmul.mubr.msk.bf16.gmra.mrb[16].mxu0 %vm346_vm1, %v4820_v11  ;;  %v5073_v11 = vld [vmem:[#allocation2 + $0x10] sm:$0xf] }
  0x35   : > { %4550 = vmatprep.mubr.msk.bf16.mxu0 %vm346_vm1, %v4821_v12  ;;  %7074 = vst [vmem:[#allocation15_spill] sm:$0xff] %v5073_v11  ;;  %v5075_v12 = vld [vmem:[#allocation2 + $0x28] sm:$0xf] }
  0x36   : > { %7075 = vst [vmem:[#allocation16_spill] sm:$0xff] %v5075_v12 }
  0x3c   : > { %4551 = vmatmul.mubr.msk.bf16.gmra.mrb[20].mxu0 %vm346_vm1, %v4822_v13  ;;  %v773_v13 = vld [vmem:[#allocation2 + $0x28] sm:$0xf] }
  0x3d   : > { %4554 = vmatprep.mubr.msk.bf16.mxu0 %vm346_vm1, %v4823_v14 }
  0x44   : > { %4555 = vmatmul.mubr.msk.bf16.gmra.mrb[24].mxu0 %vm346_vm1, %v4824_v15  ;;  %v867_v15 = vmax.f32 %v770_v56, %v819_v62 }
  0x45   : > { %4558 = vmatprep.mubr.msk.bf16.mxu0 %vm346_vm1, %v4825_v16 }
  0x4c   : > { %4559 = vmatmul.mubr.msk.bf16.gmra.mrb[28].mxu0 %vm346_vm1, %v4826_v17 }
  0xe7   : > { %v4532_v25 = vpop.f32.mrb[0].mxu0 }
  0xe8   : > { %v442_v26 = vadd.f32 %v4532_v25, %v5009_v24  ;;  %v433_v27 = vpop.f32.mrb[1].mxu0 }
  0xe9   : > { %v434_v28 = vadd.f32 %v5009_v24, %v433_v27  ;;  %v4533_v29 = vpop.f32.mrb[2].mxu0 }
  0xea   : > { %vm562_vm5 = vcmp.gt.f32.partialorder %v442_v26, 0.0  ;;  %v594_v30 = vmul.f32 0.01, %v442_v26  ;;  %v445_v31 = vadd.f32 %v4533_v29, %v5009_v24  ;;  %v436_v32 = vpop.f32.mrb[3].mxu0 }
  0xeb   : > { %vm560_vm6 = vcmp.gt.f32.partialorder %v434_v28, 0.0  ;;  %v592_v33 = vmul.f32 0.01, %v434_v28  ;;  %v437_v34 = vadd.f32 %v5009_v24, %v436_v32 }
  0xec   : > { %v5015_v35 = vsel %vm562_vm5, %v442_v26, %v594_v30  ;;  %vm563_vm7 = vcmp.gt.f32.partialorder %v445_v31, 0.0  ;;  %v595_v36 = vmul.f32 0.01, %v445_v31 }
  0xed   : > { %7063 = vst [vmem:[#allocation4_spill] sm:$0xff] %v5015_v35  ;;  %738 = vst.msk [vmem:[#allocation2 + $0x4a] sm:$0xff] %vm673_vm2, %v5015_v35  ;;  %v5019_v37 = vsel %vm560_vm6, %v434_v28, %v592_v33  ;;  %vm561_vm8 = vcmp.gt.f32.partialorder %v437_v34, 0.0  ;;  %v593_v38 = vmul.f32 0.01, %v437_v34 }
  0xee   : > { %7064 = vst [vmem:[#allocation5_spill] sm:$0xff] %v5019_v37  ;;  %736 = vst.msk [vmem:[#allocation2 + $0x32] sm:$0xff] %vm673_vm2, %v5019_v37  ;;  %v5023_v39 = vsel %vm563_vm7, %v445_v31, %v595_v36 }
  0xef   : > { %7065 = vst [vmem:[#allocation6_spill] sm:$0xff] %v5023_v39  ;;  %739 = vst.msk [vmem:[#allocation2 + $0x52] sm:$0xff] %vm673_vm2, %v5023_v39  ;;  %v5029_v41 = vsel %vm561_vm8, %v437_v34, %v593_v38  ;;  %v4536_v42 = vpop.f32.mrb[4].mxu0 }
  0xf0   : > { %7066 = vst [vmem:[#allocation7_spill] sm:$0xff] %v5029_v41  ;;  %737 = vst.msk [vmem:[#allocation2 + $0x3a] sm:$0xff] %vm673_vm2, %v5029_v41  ;;  %v458_v44 = vadd.f32 %v4536_v42, %v5009_v24  ;;  %v449_v45 = vpop.f32.mrb[5].mxu0 }
  0xf1   : > { %v450_v46 = vadd.f32 %v5009_v24, %v449_v45  ;;  %v4537_v47 = vpop.f32.mrb[6].mxu0 }
  0xf2   : > { %vm566_vm9 = vcmp.gt.f32.partialorder %v458_v44, 0.0  ;;  %v598_v50 = vmul.f32 0.01, %v458_v44  ;;  %v461_v51 = vadd.f32 %v4537_v47, %v5009_v24  ;;  %v452_v52 = vpop.f32.mrb[7].mxu0 }
  0xf3   : > { %vm564_vm10 = vcmp.gt.f32.partialorder %v450_v46, 0.0  ;;  %v596_v54 = vmul.f32 0.01, %v450_v46  ;;  %v453_v55 = vadd.f32 %v5009_v24, %v452_v52 }
  0xf4   : > { %v5041_v58 = vsel %vm566_vm9, %v458_v44, %v598_v50  ;;  %vm567_vm11 = vcmp.gt.f32.partialorder %v461_v51, 0.0  ;;  %v599_v59 = vmul.f32 0.01, %v461_v51  ;;  %v5089_v25 = vld [vmem:[#allocation2 + $0x48] sm:$0xff] }
  0xf5   : > { %7067 = vst [vmem:[#allocation8_spill] sm:$0xff] %v5041_v58  ;;  %v5043_v60 = vld [vmem:[#allocation2 + $0x30] sm:$0xff]  ;;  %742 = vst.msk [vmem:[#allocation2 + $0x7a] sm:$0xff] %vm673_vm2, %v5041_v58  ;;  %v5049_v63 = vsel %vm564_vm10, %v450_v46, %v596_v54  ;;  %vm565_vm12 = vcmp.gt.f32.partialorder %v453_v55, 0.0  ;;  %v597_v0 = vmul.f32 0.01, %v453_v55 }
  0xf6   : > { %7069 = vst [vmem:[#allocation10_spill] sm:$0xff] %v5049_v63  ;;  %740 = vst.msk [vmem:[#allocation2 + $0x62] sm:$0xff] %vm673_vm2, %v5049_v63  ;;  %v5053_v1 = vsel %vm567_vm11, %v461_v51, %v599_v59  ;;  %v868_v5 = vmax.f32 %v771_v49, %v5043_v60  ;;  %v961_v16 = vmax.f32 %v5045_v61, %v5043_v60  ;;  %v5098_v31 = vld [vmem:[#allocation2 + $0x50] sm:$0xff]  ;;  %v5112_v50 = vld [vmem:[#allocation2 + $0x58] sm:$0xf] }
  0xf7   : > { %7070 = vst [vmem:[#allocation11_spill] sm:$0xff] %v5053_v1  ;;  %743 = vst.msk [vmem:[#allocation2 + $0x82] sm:$0xff] %vm673_vm2, %v5053_v1  ;;  %v5069_v8 = vsel %vm565_vm12, %v453_v55, %v597_v0  ;;  %v4540_v9 = vpop.f32.mrb[8].mxu0  ;;  %v5077_v14 = vld [vmem:[#allocation2 + $0x38] sm:$0xff]  ;;  %v822_v17 = vld [vmem:[#allocation2 + $0x40] sm:$0xf]  ;;  %v871_v49 = vmax.f32 %v5043_v60, %v5089_v25 }
  0xf8   : > { %7072 = vst [vmem:[#allocation13_spill] sm:$0xff] %v5069_v8  ;;  %741 = vst.msk [vmem:[#allocation2 + $0x6a] sm:$0xff] %vm673_vm2, %v5069_v8  ;;  %v915_v18 = vld [vmem:[#allocation2 + $0x40] sm:$0xf]  ;;  %v465_v19 = vpop.f32.mrb[9].mxu0  ;;  %v474_v27 = vadd.f32 %v4540_v9, %v5009_v24  ;;  %v869_v23 = vmax.f32 %v5039_v57, %v5077_v14  ;;  %v962_v32 = vmax.f32 %v5063_v6, %v5077_v14 }
  0xf9   : > { %v4541_v28 = vpop.f32.mrb[10].mxu0  ;;  %v964_v33 = vmax.f32 %v868_v5, %v5089_v25  ;;  %v466_v34 = vadd.f32 %v5009_v24, %v465_v19  ;;  %v870_v38 = vmax.f32 %v773_v13, %v822_v17  ;;  %v963_v42 = vmax.f32 %v867_v15, %v915_v18  ;;  %v5114_v51 = vld [vmem:[#allocation2 + $0x40] sm:$0xf]  ;;  %v918_v55 = vld [vmem:[#allocation2 + $0x58] sm:$0xf] }
  0xfa   : > { %v468_v36 = vpop.f32.mrb[11].mxu0  ;;  %vm570_vm13 = vcmp.gt.f32.partialorder %v474_v27, 0.0  ;;  %v602_v44 = vmul.f32 0.01, %v474_v27  ;;  %v1058_v46 = vmax.f32 %v961_v16, %v5089_v25  ;;  %v477_v48 = vadd.f32 %v4541_v28, %v5009_v24  ;;  %v1012_v0 = vld [vmem:[#allocation2 + $0x58] sm:$0xf] }
  0xfb   : > { %vm568_vm14 = vcmp.gt.f32.partialorder %v466_v34, 0.0  ;;  %v600_v47 = vmul.f32 0.01, %v466_v34  ;;  %v872_v52 = vmax.f32 %v5077_v14, %v5098_v31  ;;  %v469_v54 = vadd.f32 %v5009_v24, %v468_v36  ;;  %v5145_v28 = vld [vmem:[#allocation2 + $0x58] sm:$0xf] }
  0xfc   : > { %v5120_v56 = vld [vmem:[#allocation2 + $0x78] sm:$0xff]  ;;  %v965_v59 = vmax.f32 %v869_v23, %v5098_v31  ;;  %v5125_v60 = vsel %vm570_vm13, %v474_v27, %v602_v44  ;;  %v966_v16 = vmax.f32 %v870_v38, %v918_v55  ;;  %v873_v17 = vmax.f32 %v5114_v51, %v5112_v50 }
  0xfd   : > { %v5106_v45 = vld [vmem:[#allocation2 + $0x60] sm:$0xff]  ;;  %7076 = vst [vmem:[#allocation17_spill] sm:$0xff] %v5125_v60  ;;  %v5127_v62 = vsel %vm568_vm14, %v466_v34, %v600_v47  ;;  %746 = vst.msk [vmem:[#allocation2 + $0xaa] sm:$0xff] %vm673_vm2, %v5125_v60  ;;  %v1059_v19 = vmax.f32 %v962_v32, %v5098_v31  ;;  %vm571_vm15 = vcmp.gt.f32.partialorder %v477_v48, 0.0  ;;  %vm569_vm0 = vcmp.gt.f32.partialorder %v469_v54, 0.0 }
  0xfe   : > { %v1061_v53 = vmax.f32 %v964_v33, %v5106_v45  ;;  %v1155_v57 = vmax.f32 %v1058_v46, %v5106_v45  ;;  %7077 = vst [vmem:[#allocation18_spill] sm:$0xff] %v5127_v62  ;;  %v874_v5 = vmax.f32 %v5089_v25, %v5106_v45  ;;  %v5132_v9 = vmax.f32 %v871_v49, %v5106_v45  ;;  %v1112_v33 = vld [vmem:[#allocation2 + $0x88] sm:$0xf]  ;;  %v5153_v46 = vld [vmem:[#allocation2 + $0x80] sm:$0xff] }
  0xff   : > { %v5135_v15 = vld [vmem:[#allocation2 + $0x68] sm:$0xff]  ;;  %744 = vst.msk [vmem:[#allocation2 + $0x92] sm:$0xff] %vm673_vm2, %v5127_v62  ;;  %v1015_v18 = vld [vmem:[#allocation2 + $0x70] sm:$0xf]  ;;  %v1060_v25 = vmax.f32 %v963_v42, %v1012_v0  ;;  %v877_v23 = vmax.f32 %v5106_v45, %v5120_v56  ;;  %v4544_v44 = vpop.f32.mrb[12].mxu0 }
 0x100   : > { %v1158_v13 = vmax.f32 %v1061_v53, %v5120_v56  ;;  %1203 = vst.msk [vmem:[#allocation3] sm:$0xff] %vm673_vm2, %v1155_v57  ;;  %v1109_v27 = vld [vmem:[#allocation2 + $0x70] sm:$0xf]  ;;  %v1062_v36 = vmax.f32 %v965_v59, %v5135_v15  ;;  %v1063_v38 = vmax.f32 %v966_v16, %v1015_v18  ;;  %v1156_v32 = vmax.f32 %v1059_v19, %v5135_v15  ;;  %v481_v50 = vpop.f32.mrb[13].mxu0  ;;  %v5156_v51 = vld [vmem:[#allocation2 + $0x88] sm:$0xf] }
 0x101   : > { %v5150_v34 = vld [vmem:[#allocation2 + $0x70] sm:$0xf]  ;;  %v1157_v42 = vmax.f32 %v1060_v25, %v1109_v27  ;;  %v603_v47 = vmul.f32 0.01, %v477_v48  ;;  %v601_v49 = vmul.f32 0.01, %v469_v54  ;;  %v970_v57 = vmax.f32 %v874_v5, %v5120_v56 }
 0x102   : > { %1206 = vst.msk [vmem:[#allocation3 + $0x18] sm:$0xff] %vm673_vm2, %v1158_v13  ;;  %v5158_v45 = vld [vmem:[#allocation2 + $0x70] sm:$0xf]  ;;  %v1159_v53 = vmax.f32 %v1062_v36, %v5153_v46  ;;  %v1160_v55 = vmax.f32 %v1063_v38, %v1112_v33  ;;  %v1064_v59 = vmax.f32 %v5132_v9, %v5120_v56  ;;  %v4545_v0 = vpop.f32.mrb[14].mxu0  ;;  %v875_v13 = vmax.f32 %v5098_v31, %v5135_v15  ;;  %v1018_v9 = vld [vmem:[#allocation2 + $0x88] sm:$0xf] }
 0x103   : > { %v876_v16 = vmax.f32 %v5145_v28, %v5150_v34  ;;  %v921_v18 = vld [vmem:[#allocation2 + $0x70] sm:$0xf]  ;;  %1205 = vst.msk [vmem:[#allocation3 + $0x10] sm:$0xf] %vm676_vm3, %v1157_v42  ;;  %v5171_v19 = vsel %vm571_vm15, %v477_v48, %v603_v47  ;;  %v5174_v5 = vsel %vm569_vm0, %v469_v54, %v601_v49  ;;  %v484_v25 = vpop.f32.mrb[15].mxu0  ;;  %v490_v48 = vadd.f32 %v4544_v44, %v5009_v24 }
 0x104   : > { %1204 = vst.msk [vmem:[#allocation3 + $0x8] sm:$0xff] %vm673_vm2, %v1156_v32  ;;  %7078 = vst [vmem:[#allocation19_spill] sm:$0xff] %v5171_v19  ;;  %v482_v54 = vadd.f32 %v5009_v24, %v481_v50  ;;  %v878_v28 = vmax.f32 %v5135_v15, %v5153_v46  ;;  %v879_v33 = vmax.f32 %v5158_v45, %v5156_v51 }
 0x105   : > { %7079 = vst [vmem:[#allocation20_spill] sm:$0xff] %v5174_v5  ;;  %1207 = vst.msk [vmem:[#allocation3 + $0x20] sm:$0xff] %vm673_vm2, %v1159_v53  ;;  %v493_v36 = vadd.f32 %v4545_v0, %v5009_v24  ;;  %v485_v38 = vadd.f32 %v5009_v24, %v484_v25  ;;  %v5200_v44 = vmax.f32 %v872_v52, %v5135_v15  ;;  %v5207_v53 = vld [vmem:[#allocation2 + $0xa8] sm:$0xff]  ;;  %vm574_vm1 = vcmp.gt.f32.partialorder %v490_v48, 0.0 }
 0x106   : > { %1208 = vst.msk [vmem:[#allocation3 + $0x28] sm:$0xf] %vm676_vm3, %v1160_v55  ;;  %v5192_v34 = vld [vmem:[#allocation2 + $0x90] sm:$0xff]  ;;  %v5202_v42 = vmax.f32 %v873_v17, %v921_v18  ;;  %v606_v0 = vmul.f32 0.01, %v490_v48  ;;  %vm572_vm5 = vcmp.gt.f32.partialorder %v482_v54, 0.0  ;;  %v971_v52 = vmax.f32 %v875_v13, %v5153_v46 }
 0x107   : > { %747 = vst.msk [vmem:[#allocation2 + $0xb2] sm:$0xff] %vm673_vm2, %v5171_v19  ;;  %745 = vst.msk [vmem:[#allocation2 + $0x9a] sm:$0xff] %vm673_vm2, %v5174_v5  ;;  %v4548_v32 = vpop.f32.mrb[16].mxu0  ;;  %v880_v47 = vmax.f32 %v5120_v56, %v5192_v34  ;;  %v1067_v49 = vmax.f32 %v970_v57, %v5192_v34  ;;  %v1161_v55 = vmax.f32 %v1064_v59, %v5192_v34  ;;  %v604_v17 = vmul.f32 0.01, %v482_v54 }
 0x108   : > { %v497_v50 = vpop.f32.mrb[17].mxu0  ;;  %v5211_v14 = vmax.f32 %v877_v23, %v5192_v34  ;;  %v924_v18 = vld [vmem:[#allocation2 + $0x88] sm:$0xf]  ;;  %v5216_v57 = vsel %vm574_vm1, %v490_v48, %v606_v0  ;;  %vm575_vm6 = vcmp.gt.f32.partialorder %v493_v36, 0.0  ;;  %v607_v59 = vmul.f32 0.01, %v493_v36 }
 0x109   : > { %v4549_v25 = vpop.f32.mrb[18].mxu0  ;;  %v1164_v31 = vmax.f32 %v1067_v49, %v5207_v53  ;;  %1209 = vst.msk [vmem:[#allocation3 + $0x30] sm:$0xff] %vm673_vm2, %v1161_v55  ;;  %7080 = vst [vmem:[#allocation21_spill] sm:$0xff] %v5216_v57  ;;  %vm573_vm7 = vcmp.gt.f32.partialorder %v485_v38, 0.0  ;;  %v972_v27 = vmax.f32 %v876_v16, %v924_v18  ;;  %v1065_v23 = vmax.f32 %v5200_v44, %v5153_v46  ;;  %v785_v55 = vld [vmem:[#allocation2 + $0x88] sm:$0xf] }
 0x10a   : > { %v500_v56 = vpop.f32.mrb[19].mxu0  ;;  %750 = vst.msk [vmem:[#allocation2 + $0xda] sm:$0xff] %vm673_vm2, %v5216_v57  ;;  %v5224_v13 = vsel %vm572_vm5, %v482_v54, %v604_v17  ;;  %v605_v49 = vmul.f32 0.01, %v485_v38  ;;  %v1066_v0 = vmax.f32 %v5202_v42, %v1018_v9  ;;  %v5232_v16 = vmax.f32 %v880_v47, %v5207_v53 }
 0x10b   : > { %1212 = vst.msk [vmem:[#allocation3 + $0x48] sm:$0xff] %vm673_vm2, %v1164_v31  ;;  %7081 = vst [vmem:[#allocation22_spill] sm:$0xff] %v5224_v13  ;;  %v5234_v44 = vsel %vm575_vm6, %v493_v36, %v607_v59  ;;  %v5236_v31 = vld [vmem:[#allocation3 + $0x8] sm:$0xff]  ;;  %v1070_v9 = vmax.f32 %v5211_v14, %v5207_v53  ;;  %v506_v47 = vadd.f32 %v4548_v32, %v5009_v24  ;;  %v5256_v59 = vld [vmem:[#allocation3] sm:$0xff] }
 0x10c   : > { %748 = vst.msk [vmem:[#allocation2 + $0xc2] sm:$0xff] %vm673_vm2, %v5224_v13  ;;  %7082 = vst [vmem:[#allocation23_spill] sm:$0xff] %v5234_v44  ;;  %v5238_v18 = vld [vmem:[#allocation3 + $0x1] sm:$0xff]  ;;  %v5240_v54 = vld [vmem:[#allocation3 + $0x9] sm:$0xff]  ;;  %v5253_v36 = vsel %vm573_vm7, %v485_v38, %v605_v49  ;;  %v5267_v42 = vadd.f32 %v5009_v24, %v497_v50  ;;  %v5270_v38 = vadd.f32 %v4549_v25, %v5009_v24 }
 0x10d   : > { %751 = vst.msk [vmem:[#allocation2 + $0xe2] sm:$0xff] %vm673_vm2, %v5234_v44  ;;  %7083 = vst [vmem:[#allocation24_spill] sm:$0xff] %v5253_v36  ;;  %v5273_v32 = vadd.f32 %v5009_v24, %v500_v56  ;;  %vm578_vm8 = vcmp.gt.f32.partialorder %v506_v47, 0.0  ;;  %v7090_v60 = vmax.f32 %v5256_v59, %v5238_v18  ;;  %v1411_v62 = vld [vmem:[#allocation3 + $0x3] sm:$0xff]  ;;  %v1412_v5 = vld [vmem:[#allocation3 + $0xb] sm:$0xff] }
 0x10e   : > { %v5242_v17 = vld [vmem:[#allocation2 + $0xb0] sm:$0xff]  ;;  %v5244_v7 = vld [vmem:[#allocation2 + $0xb8] sm:$0xf]  ;;  %v5260_v40 = vld [vmem:[#allocation2 + $0xa0] sm:$0xf]  ;;  %749 = vst.msk [vmem:[#allocation2 + $0xca] sm:$0xff] %vm673_vm2, %v5253_v36 }
 0x10f   : > { %v5258_v26 = vld [vmem:[#allocation2 + $0x98] sm:$0xff]  ;;  %v834_v43 = vld [vmem:[#allocation2 + $0xa0] sm:$0xf]  ;;  %v4552_v61 = vpop.f32.mrb[20].mxu0  ;;  %vm579_vm9 = vcmp.gt.f32.partialorder %v5270_v38, 0.0  ;;  %vm576_vm14 = vcmp.gt.f32.partialorder %v5267_v42, 0.0 }
 0x110   : > { %v881_v49 = vmax.f32 %v5153_v46, %v5258_v26  ;;  %v882_v30 = vmax.f32 %v785_v55, %v834_v43  ;;  %v927_v29 = vld [vmem:[#allocation2 + $0xa0] sm:$0xf]  ;;  %v974_v25 = vmax.f32 %v878_v28, %v5258_v26  ;;  %v1068_v43 = vmax.f32 %v971_v52, %v5258_v26  ;;  %v1118_v57 = vld [vmem:[#allocation2 + $0xb8] sm:$0xf]  ;;  %v513_v13 = vpop.f32.mrb[21].mxu0 }
 0x111   : > { %v1021_v21 = vld [vmem:[#allocation2 + $0xa0] sm:$0xf]  ;;  %v975_v56 = vmax.f32 %v879_v33, %v927_v29  ;;  %v1162_v44 = vmax.f32 %v1065_v23, %v5258_v26  ;;  %v930_v36 = vld [vmem:[#allocation2 + $0xb8] sm:$0xf]  ;;  %v610_v52 = vmul.f32 0.01, %v506_v47  ;;  %v522_v23 = vadd.f32 %v4552_v61, %v5009_v24 }
 0x112   : > { %v1115_v48 = vld [vmem:[#allocation2 + $0xa0] sm:$0xf]  ;;  %v1069_v55 = vmax.f32 %v972_v27, %v1021_v21  ;;  %v1165_v46 = vmax.f32 %v1068_v43, %v5242_v17  ;;  %v977_v51 = vmax.f32 %v881_v49, %v5242_v17  ;;  %v4553_v21 = vpop.f32.mrb[22].mxu0  ;;  %v1024_v45 = vld [vmem:[#allocation2 + $0xb8] sm:$0xf]  ;;  %v978_v28 = vmax.f32 %v882_v30, %v930_v36 }
 0x113   : > { %v1163_v50 = vmax.f32 %v1066_v0, %v1115_v48  ;;  %1210 = vst.msk [vmem:[#allocation3 + $0x38] sm:$0xff] %vm673_vm2, %v1162_v44  ;;  %v5298_v27 = vld [vmem:[#allocation2 + $0xc0] sm:$0xff]  ;;  %v1071_v33 = vmax.f32 %v974_v25, %v5242_v17  ;;  %v1072_v44 = vmax.f32 %v975_v56, %v1024_v45  ;;  %v608_v49 = vmul.f32 0.01, %v5267_v42  ;;  %v516_v30 = vpop.f32.mrb[23].mxu0 }
 0x114   : > { %v1166_v29 = vmax.f32 %v1069_v55, %v1118_v57  ;;  %1213 = vst.msk [vmem:[#allocation3 + $0x50] sm:$0xff] %vm673_vm2, %v1165_v46  ;;  %v5304_v57 = vld [vmem:[#allocation2 + $0xd8] sm:$0xff]  ;;  %v1073_v48 = vmax.f32 %v5232_v16, %v5298_v27  ;;  %v1167_v0 = vmax.f32 %v1070_v9, %v5298_v27  ;;  %v7084_v61 = vmax.f32 %v5192_v34, %v5207_v53 }
 0x115   : > { %1211 = vst.msk [vmem:[#allocation3 + $0x40] sm:$0xf] %vm676_vm3, %v1163_v50  ;;  %v5319_v25 = vsel %vm578_vm8, %v506_v47, %v610_v52  ;;  %v5322_v16 = vld [vmem:[#allocation2 + $0xb8] sm:$0xf]  ;;  %v5326_v56 = vld [vmem:[#allocation2 + $0xc8] sm:$0xff]  ;;  %v514_v34 = vadd.f32 %v5009_v24, %v513_v13  ;;  %v525_v47 = vadd.f32 %v4553_v21, %v5009_v24  ;;  %v517_v55 = vadd.f32 %v5009_v24, %v516_v30 }
 0x116   : > { %1214 = vst.msk [vmem:[#allocation3 + $0x58] sm:$0xf] %vm676_vm3, %v1166_v29  ;;  %v5316_v50 = vmax.f32 %v7084_v61, %v5298_v27  ;;  %v1170_v9 = vmax.f32 %v1073_v48, %v5304_v57  ;;  %v5328_v43 = vld [vmem:[#allocation2 + $0xd0] sm:$0xf]  ;;  %v1074_v45 = vmax.f32 %v977_v51, %v5326_v56  ;;  %vm582_vm10 = vcmp.gt.f32.partialorder %v522_v23, 0.0 }
 0x117   : > { %1215 = vst.msk [vmem:[#allocation3 + $0x60] sm:$0xff] %vm673_vm2, %v1167_v0  ;;  %754 = vst.msk [vmem:[#allocation2 + $0x10a] sm:$0xff] %vm673_vm2, %v5319_v25  ;;  %v1027_v29 = vld [vmem:[#allocation2 + $0xd0] sm:$0xf]  ;;  %v5341_v0 = vld [vmem:[#allocation2 + $0xe0] sm:$0xff]  ;;  %v1168_v61 = vmax.f32 %v1071_v33, %v5326_v56  ;;  %v5346_v36 = vpop.f32.mrb[24].mxu0 }
 0x118   : > { %v1121_v52 = vld [vmem:[#allocation2 + $0xd0] sm:$0xf]  ;;  %1218 = vst.msk [vmem:[#allocation3 + $0x78] sm:$0xff] %vm673_vm2, %v1170_v9  ;;  %v1124_v13 = vld [vmem:[#allocation2 + $0xe8] sm:$0xf]  ;;  %v1075_v30 = vmax.f32 %v978_v28, %v1027_v29  ;;  %v1171_v51 = vmax.f32 %v1074_v45, %v5341_v0  ;;  %vm580_vm11 = vcmp.gt.f32.partialorder %v514_v34, 0.0 }
 0x119   : > { %v1169_v46 = vmax.f32 %v1072_v44, %v1121_v52  ;;  %v611_v15 = vmul.f32 0.01, %v5270_v38  ;;  %v609_v48 = vmul.f32 0.01, %v5273_v32  ;;  %v614_v14 = vmul.f32 0.01, %v522_v23 }
 0x11a   : > { %v1172_v9 = vmax.f32 %v1075_v30, %v1124_v13  ;;  %1216 = vst.msk [vmem:[#allocation3 + $0x68] sm:$0xff] %vm673_vm2, %v1168_v61  ;;  %v612_v21 = vmul.f32 0.01, %v514_v34  ;;  %vm583_vm12 = vcmp.gt.f32.partialorder %v525_v47, 0.0  ;;  %v933_v28 = vld [vmem:[#allocation2 + $0xd0] sm:$0xf]  ;;  %v7086_v61 = vmax.f32 %v5260_v40, %v5244_v7 }
 0x11b   : > { %1217 = vst.msk [vmem:[#allocation3 + $0x70] sm:$0xf] %vm676_vm3, %v1169_v46  ;;  %v5357_v33 = vsel %vm579_vm9, %v5270_v38, %v611_v15  ;;  %v5360_v44 = vsel %vm582_vm10, %v522_v23, %v614_v14  ;;  %v615_v29 = vmul.f32 0.01, %v525_v47  ;;  %vm581_vm13 = vcmp.gt.f32.partialorder %v517_v55, 0.0  ;;  %v5362_v45 = vpop.f32.mrb[25].mxu0 }
 0x11c   : > { %1219 = vst.msk [vmem:[#allocation3 + $0x80] sm:$0xff] %vm673_vm2, %v1171_v51  ;;  %v665_v46 = vpack.c.bf16 %v5357_v33, %v5319_v25  ;;  %755 = vst.msk [vmem:[#allocation2 + $0x112] sm:$0xff] %vm673_vm2, %v5357_v33  ;;  %v5371_v38 = vsel %vm580_vm11, %v514_v34, %v612_v21  ;;  %v613_v15 = vmul.f32 0.01, %v517_v55  ;;  %v5374_v14 = vpop.f32.mrb[26].mxu0  ;;  %v7085_v25 = vmax.f32 %v5258_v26, %v5242_v17  ;;  %v1285_v33 = vld [vmem:[#allocation3 + $0x19] sm:$0xff] }
 0x11d   : > { %1220 = vst.msk [vmem:[#allocation3 + $0x88] sm:$0xf] %vm676_vm3, %v1172_v9  ;;  %v5376_v23 = vld [vmem:[#allocation2 + $0xe8] sm:$0xf]  ;;  %v5378_v52 = vld [vmem:[#allocation2 + $0xd0] sm:$0xf]  ;;  %v5389_v34 = vsel %vm583_vm12, %v525_v47, %v615_v29  ;;  %v640_v21 = vsel %vm576_vm14, %v5267_v42, %v608_v49  ;;  %v5398_v51 = vmax.f32 %v7086_v61, %v933_v28 }
 0x11e   : > { %758 = vst.msk [vmem:[#allocation2 + $0x13a] sm:$0xff] %vm673_vm2, %v5360_v44  ;;  %v5384_v13 = vmax.f32 %v7085_v25, %v5326_v56  ;;  %756 = vst.msk [vmem:[#allocation2 + $0x122] sm:$0xff] %vm673_vm2, %v5371_v38  ;;  %vm577_vm15 = vcmp.gt.f32.partialorder %v5273_v32, 0.0  ;;  %v5393_v30 = vpop.f32.mrb[27].mxu0  ;;  %v645_v47 = vsel %vm581_vm13, %v517_v55, %v613_v15  ;;  %v1253_v42 = vld [vmem:[#allocation3 + $0x18] sm:$0xff]  ;;  %v1254_v49 = vld [vmem:[#allocation3 + $0x20] sm:$0xff] }
 0x11f   : > { %759 = vst.msk [vmem:[#allocation2 + $0x142] sm:$0xff] %vm673_vm2, %v5389_v34  ;;  %v641_v9 = vsel %vm577_vm15, %v5273_v32, %v609_v48  ;;  %752 = vst.msk [vmem:[#allocation2 + $0xf2] sm:$0xff] %vm673_vm2, %v640_v21  ;;  %v1286_v29 = vld [vmem:[#allocation3 + $0x21] sm:$0xff]  ;;  %v5407_v25 = vpop.f32.mrb[28].mxu0  ;;  %v666_v7 = vpack.c.bf16 %v645_v47, %v5371_v38  ;;  %v7087_v32 = vmax.f32 %v5207_v53, %v5298_v27  ;;  %v1348_v61 = vld [vmem:[#allocation3 + $0xa] sm:$0xff] }
 0x120   : > { %v936_v40 = vld [vmem:[#allocation2 + $0xe8] sm:$0xf]  ;;  %757 = vst.msk [vmem:[#allocation2 + $0x12a] sm:$0xff] %vm673_vm2, %v645_v47  ;;  %v664_v28 = vpack.c.bf16 %v641_v9, %v640_v21  ;;  %753 = vst.msk [vmem:[#allocation2 + $0xfa] sm:$0xff] %vm673_vm2, %v641_v9  ;;  %v5420_v26 = vpop.f32.mrb[29].mxu0  ;;  %v7088_v9 = vmax.f32 %v5242_v17, %v5326_v56  ;;  %v7091_v17 = vmax.f32 %v5236_v31, %v5240_v54  ;;  %v1288_v18 = vld [vmem:[#allocation3 + $0x39] sm:$0xff] }
 0x121   : > { %v5418_v48 = vmax.f32 %v7087_v32, %v5304_v57  ;;  %v1347_v15 = vld [vmem:[#allocation3 + $0x2] sm:$0xff]  ;;  %v7089_v32 = vmax.f32 %v5322_v16, %v5328_v43  ;;  %v5443_v58 = vpop.f32.mrb[30].mxu0  ;;  %v1317_v1 = vmax.f32 %v1253_v42, %v1285_v33  ;;  %v1318_v63 = vmax.f32 %v1254_v49, %v1286_v29  ;;  %v1256_v43 = vld [vmem:[#allocation3 + $0x38] sm:$0xff]  ;;  %v1476_v42 = vld [vmem:[#allocation3 + $0xc] sm:$0xff] }
 0x122   : > { %v4421_v38 = vld [vmem:[%s7038_s3 + $0x3] sm:$0x1]  ;;  %v5425_v21 = vld [vmem:[#allocation2 + $0xe8] sm:$0xf]  ;;  %v5433_v53 = vmax.f32 %v7088_v9, %v5341_v0  ;;  %v1379_v19 = vmax.f32 %v7090_v60, %v1347_v15  ;;  %4614 = vmatprep.mubr.msk.bf16.mxu1 %vm673_vm2, %v664_v28  ;;  %v1380_v9 = vmax.f32 %v7091_v17, %v1348_v61  ;;  %v538_v16 = vadd.f32 %v5346_v36, %v5009_v24  ;;  %v5451_v60 = vpop.f32.mrb[31].mxu0  ;;  %v1349_v49 = vld [vmem:[#allocation3 + $0x1a] sm:$0xff] }
 0x123   : > { %v5438_v55 = vmax.f32 %v7089_v32, %v936_v40  ;;  %v1475_v47 = vld [vmem:[#allocation3 + $0x4] sm:$0xff]  ;;  %v1287_v40 = vld [vmem:[#allocation3 + $0x31] sm:$0xff]  ;;  %4615 = vmatmul.mubr.msk.bf16.vlgmr.msra.gmra.mrb[0].mxu1 %vm673_vm2, %v665_v46  ;;  %v1381_v29 = vmax.f32 %v1317_v1, %v1349_v49  ;;  %v1413_v61 = vld [vmem:[#allocation3 + $0x1b] sm:$0xff] }
 0x124   : > { %v1443_v54 = vmax.f32 %v1379_v19, %v1411_v62  ;;  %v1350_v36 = vld [vmem:[#allocation3 + $0x22] sm:$0xff]  ;;  %v1444_v33 = vmax.f32 %v1380_v9, %v1412_v5  ;;  %4631 = vmatpush3.bf16.msra.mxu1 %v5087_v22  ;;  %4618 = vmatprep.mubr.msk.bf16.mxu1 %vm673_vm2, %v666_v7  ;;  %v1255_v17 = vld [vmem:[#allocation3 + $0x30] sm:$0xff]  ;;  %vm586_vm0 = vcmp.gt.f32.partialorder %v538_v16, 0.0  ;;  %v1320_v62 = vmax.f32 %v1256_v43, %v1288_v18  ;;  %v1352_v18 = vld [vmem:[#allocation3 + $0x3a] sm:$0xff] }
 0x125   : > { %v1382_v15 = vmax.f32 %v1318_v63, %v1350_v36  ;;  %v1414_v32 = vld [vmem:[#allocation3 + $0x23] sm:$0xff]  ;;  %v1319_v46 = vmax.f32 %v1255_v17, %v1287_v40  ;;  %v1351_v19 = vld [vmem:[#allocation3 + $0x32] sm:$0xff]  ;;  %4801 = vmatprep.subr.msk.bf16.mxu1 %vm1605_vm4, %v4421_v38  ;;  %v1445_v9 = vmax.f32 %v1381_v29, %v1413_v61  ;;  %v618_v49 = vmul.f32 0.01, %v538_v16 }
 0x126   : > { %v5462_v28 = vld [vmem:[#allocation2 + $0x108] sm:$0xff]  ;;  %v1507_v59 = vmax.f32 %v1443_v54, %v1475_v47  ;;  %v1477_v31 = vld [vmem:[#allocation3 + $0x1c] sm:$0xff]  ;;  %v1508_v1 = vmax.f32 %v1444_v33, %v1476_v42  ;;  %v5478_v38 = vadd.f32 %v5009_v24, %v5362_v45  ;;  %v5482_v40 = vadd.f32 %v5374_v14, %v5009_v24  ;;  %v5494_v45 = vld [vmem:[#allocation3 + $0x33] sm:$0xff] }
 0x127   : > { %v5465_v5 = vld [vmem:[#allocation2 + $0x138] sm:$0xff]  ;;  %v5467_v63 = vld [vmem:[#allocation2 + $0x120] sm:$0xff]  ;;  %v1446_v22 = vmax.f32 %v1382_v15, %v1414_v32  ;;  %v5469_v7 = vld [vmem:[#allocation3 + $0x49] sm:$0xff]  ;;  %v5484_v42 = vmax.f32 %v1319_v46, %v1351_v19  ;;  %v1509_v15 = vmax.f32 %v1445_v9, %v1477_v31  ;;  %v5492_v32 = vsel %vm586_vm0, %v538_v16, %v618_v49 }
 0x128   : > { %v898_v47 = vmax.f32 %v5462_v28, %v5467_v63  ;;  %v5473_v54 = vld [vmem:[#allocation2 + $0x140] sm:$0xff]  ;;  %1982 = vst.msk [vmem:[#allocation2 + $0x32] sm:$0xff] %vm673_vm2, %v1507_v59  ;;  %v5486_v36 = vld [vmem:[#allocation2 + $0x148] sm:$0xf]  ;;  %v1539_v29 = vpack.c.bf16 %v1508_v1, %v1507_v59  ;;  %1983 = vst.msk [vmem:[#allocation2 + $0x3a] sm:$0xff] %vm673_vm2, %v1508_v1  ;;  %v5510_v16 = vadd.f32 %v5009_v24, %v5393_v30  ;;  %vm584_vm1 = vcmp.gt.f32.partialorder %v5478_v38, 0.0 }
 0x129   : > { %v1478_v43 = vld [vmem:[#allocation3 + $0x24] sm:$0xff]  ;;  %7092 = vst [vmem:[#allocation25_spill] sm:$0xff] %v5486_v36  ;;  %v5498_v8 = vld [vmem:[#allocation2 + $0x110] sm:$0xff]  ;;  %762 = vst.msk [vmem:[#allocation2 + $0x16a] sm:$0xff] %vm673_vm2, %v5492_v32  ;;  %v5512_v31 = vmax.f32 %v1320_v62, %v1352_v18  ;;  %vm587_vm5 = vcmp.gt.f32.partialorder %v5482_v40, 0.0 }
 0x12a   : > { %v5488_v33 = vld [vmem:[#allocation2 + $0x128] sm:$0xff]  ;;  %v1510_v61 = vmax.f32 %v1446_v22, %v1478_v43  ;;  %v5502_v19 = vld [vmem:[#allocation2 + $0x130] sm:$0xf]  ;;  %v5516_v9 = vld [vmem:[#allocation2 + $0x118] sm:$0xf]  ;;  %4564 = vmatprep.mubr.msk.bf16.mxu0 %vm673_vm2, %v1539_v29  ;;  %1984 = vst.msk [vmem:[#allocation2 + $0x4a] sm:$0xff] %vm673_vm2, %v1509_v15  ;;  %v5526_v24 = vmax.f32 %v898_v47, %v5465_v5  ;;  %v7093_v29 = vpack.c.bf16 %v5389_v34, %v5360_v44 }
 0x12b   : > { %v5496_v17 = vld [vmem:[#allocation3 + $0x48] sm:$0xff]  ;;  %v5504_v59 = vld [vmem:[#allocation2 + $0x130] sm:$0xf]  ;;  %v849_v22 = vld [vmem:[#allocation2 + $0x118] sm:$0xf]  ;;  %v7094_v44 = vmax.f32 %v5298_v27, %v5304_v57  ;;  %vm585_vm6 = vcmp.gt.f32.partialorder %v5510_v16, 0.0 }
 0x12c   : > { %v797_v14 = vld [vmem:[#allocation2 + $0xe8] sm:$0xf]  ;;  %v798_v46 = vld [vmem:[#allocation2 + $0xf0] sm:$0xff]  ;;  %v1540_v35 = vpack.c.bf16 %v1510_v61, %v1509_v15  ;;  %1985 = vst.msk [vmem:[#allocation2 + $0x52] sm:$0xff] %vm673_vm2, %v1510_v61  ;;  %v799_v18 = vld [vmem:[#allocation2 + $0xf8] sm:$0xff]  ;;  %4619 = vmatmul.mubr.msk.bf16.gmra.mrb[4].mxu1 %vm673_vm2, %v7093_v29  ;;  %v7095_v29 = vmax.f32 %v5326_v56, %v5341_v0 }
 0x12d   : > { %v800_v49 = vld [vmem:[#allocation2 + $0x100] sm:$0xf]  ;;  %v892_v1 = vmax.f32 %v5304_v57, %v798_v46  ;;  %v893_v15 = vmax.f32 %v5341_v0, %v799_v18  ;;  %v895_v30 = vmax.f32 %v798_v46, %v5462_v28  ;;  %v942_v37 = vld [vmem:[#allocation2 + $0x118] sm:$0xf]  ;;  %v945_v41 = vld [vmem:[#allocation2 + $0x130] sm:$0xf]  ;;  %v985_v34 = vmax.f32 %v7094_v44, %v798_v46 }
 0x12e   : > { %v846_v43 = vld [vmem:[#allocation2 + $0x100] sm:$0xf]  ;;  %4565 = vmatmul.mubr.msk.bf16.vlgmr.msra.gmra.mrb[32].mxu0 %vm673_vm2, %v1540_v35  ;;  %v1039_v6 = vld [vmem:[#allocation2 + $0x130] sm:$0xf]  ;;  %v986_v47 = vmax.f32 %v7095_v29, %v799_v18  ;;  %v1079_v12 = vmax.f32 %v5418_v48, %v798_v46  ;;  %v896_v35 = vmax.f32 %v799_v18, %v5498_v8  ;;  %v897_v11 = vmax.f32 %v800_v49, %v849_v22 }
 0x12f   : > { %v894_v61 = vmax.f32 %v797_v14, %v846_v43  ;;  %v939_v39 = vld [vmem:[#allocation2 + $0x100] sm:$0xf]  ;;  %v7096_v14 = vmax.f32 %v5378_v52, %v5376_v23  ;;  %4597 = vmatpush3.bf16.msra.mxu0 %v4990_v20  ;;  %v988_v10 = vmax.f32 %v892_v1, %v5462_v28  ;;  %v5557_v27 = vmax.f32 %v893_v15, %v5498_v8  ;;  %v1036_v52 = vld [vmem:[#allocation2 + $0x118] sm:$0xf]  ;;  %v1133_v48 = vld [vmem:[#allocation2 + $0x130] sm:$0xf] }
 0x130   : > { %v1033_v62 = vld [vmem:[#allocation2 + $0x100] sm:$0xf]  ;;  %v5560_v56 = vmax.f32 %v895_v30, %v5467_v63  ;;  %v1080_v44 = vmax.f32 %v5433_v53, %v799_v18  ;;  %v5565_v20 = vmax.f32 %v896_v35, %v5488_v33  ;;  %v5567_v22 = vmax.f32 %v897_v11, %v945_v41 }
 0x131   : > { %v987_v43 = vmax.f32 %v7096_v14, %v939_v39  ;;  %v990_v36 = vmax.f32 %v894_v61, %v942_v37  ;;  %v1081_v39 = vmax.f32 %v5438_v55, %v1033_v62  ;;  %v1127_v23 = vld [vmem:[#allocation2 + $0x100] sm:$0xf]  ;;  %v1085_v37 = vmax.f32 %v988_v10, %v5467_v63  ;;  %v1130_v62 = vld [vmem:[#allocation2 + $0x118] sm:$0xf] }
 0x132   : > { %v1082_v49 = vmax.f32 %v985_v34, %v5462_v28  ;;  %v1083_v30 = vmax.f32 %v986_v47, %v5498_v8  ;;  %v7097_v53 = vmax.f32 %v5316_v50, %v5304_v57  ;;  %v7098_v61 = vmax.f32 %v5384_v13, %v5341_v0  ;;  %v1136_v47 = vld [vmem:[#allocation2 + $0x148] sm:$0xf]  ;;  %v5588_v0 = vld [vmem:[#allocation2 + $0x38] sm:$0xff]  ;;  %v5603_v14 = vld [vmem:[#allocation2 + $0x40] sm:$0xf] }
 0x133   : > { %v1087_v1 = vmax.f32 %v990_v36, %v1039_v6  ;;  %v1084_v15 = vmax.f32 %v987_v43, %v1036_v52  ;;  %v7099_v41 = vmax.f32 %v5398_v51, %v5425_v21  ;;  %v1176_v6 = vmax.f32 %v1079_v12, %v5462_v28  ;;  %v5583_v36 = vld [vmem:[#allocation2 + $0x30] sm:$0xff]  ;;  %v5590_v13 = vld [vmem:[#allocation2 + $0x148] sm:$0xf] }
 0x134   : > { %v1173_v55 = vmax.f32 %v7097_v53, %v798_v46  ;;  %v1174_v29 = vmax.f32 %v7098_v61, %v799_v18  ;;  %v1177_v10 = vmax.f32 %v1080_v44, %v5498_v8  ;;  %v1178_v34 = vmax.f32 %v1081_v39, %v1130_v62  ;;  %v5601_v18 = vld [vmem:[#allocation2 + $0x28] sm:$0xf]  ;;  %v5615_v39 = vld [vmem:[#allocation2 + $0x50] sm:$0xff]  ;;  %v1416_v62 = vld [vmem:[#allocation3 + $0x3b] sm:$0xff] }
 0x135   : > { %v1175_v11 = vmax.f32 %v7099_v41, %v1127_v23  ;;  %v1179_v57 = vmax.f32 %v1082_v49, %v5467_v63  ;;  %v1180_v50 = vmax.f32 %v1083_v30, %v5488_v33  ;;  %v1181_v46 = vmax.f32 %v1084_v15, %v1133_v48  ;;  %1224 = vst.msk [vmem:[#allocation3 + $0xa8] sm:$0xff] %vm673_vm2, %v1176_v6  ;;  %v1479_v61 = vld [vmem:[#allocation3 + $0x34] sm:$0xff]  ;;  %v1353_v6 = vld [vmem:[#allocation3 + $0x4a] sm:$0xff] }
 0x136   : > { %1221 = vst.msk [vmem:[#allocation3 + $0x90] sm:$0xff] %vm673_vm2, %v1173_v55  ;;  %v1086_v12 = vmax.f32 %v5557_v27, %v5488_v33  ;;  %v1088_v51 = vmax.f32 %v5560_v56, %v5465_v5  ;;  %v1182_v21 = vmax.f32 %v1085_v37, %v5465_v5  ;;  %v1184_v28 = vmax.f32 %v1087_v1, %v1136_v47  ;;  %v1258_v37 = vld [vmem:[#allocation3 + $0x50] sm:$0xff]  ;;  %v1480_v47 = vld [vmem:[#allocation3 + $0x3c] sm:$0xff] }
 0x137   : > { %1222 = vst.msk [vmem:[#allocation3 + $0x98] sm:$0xff] %vm673_vm2, %v1174_v29  ;;  %1225 = vst.msk [vmem:[#allocation3 + $0xb0] sm:$0xff] %vm673_vm2, %v1177_v10  ;;  %v1089_v43 = vmax.f32 %v5565_v20, %v5473_v54  ;;  %v1090_v35 = vmax.f32 %v5567_v22, %v5590_v13  ;;  %v2113_v44 = vmax.f32 %v5057_v3, %v5583_v36  ;;  %v616_v23 = vmul.f32 0.01, %v5478_v38  ;;  %v1290_v1 = vld [vmem:[#allocation3 + $0x51] sm:$0xff] }
 0x138   : > { %1223 = vst.msk [vmem:[#allocation3 + $0xa0] sm:$0xf] %vm676_vm3, %v1175_v11  ;;  %1226 = vst.msk [vmem:[#allocation3 + $0xb8] sm:$0xf] %vm676_vm3, %v1178_v34  ;;  %v2114_v52 = vmax.f32 %v5059_v4, %v5588_v0  ;;  %v619_v48 = vmul.f32 0.01, %v5482_v40  ;;  %v2115_v49 = vmax.f32 %v5601_v18, %v5603_v14  ;;  %v7100_v30 = vmax.f32 %v5055_v2, %v5059_v4 }
 0x139   : > { %1227 = vst.msk [vmem:[#allocation3 + $0xc0] sm:$0xff] %vm673_vm2, %v1179_v57  ;;  %1228 = vst.msk [vmem:[#allocation3 + $0xc8] sm:$0xff] %vm673_vm2, %v1180_v50  ;;  %v648_v53 = vsel %vm584_vm1, %v5478_v38, %v616_v23  ;;  %v617_v55 = vmul.f32 0.01, %v5510_v16  ;;  %v2117_v29 = vmax.f32 %v5588_v0, %v5615_v39  ;;  %v1448_v11 = vmax.f32 %v5512_v31, %v1416_v62  ;;  %v4827_v50 = vld [vmem:[%s7037_s2] ss:$0 sm:$0xff] }
 0x13a   : > { %1229 = vst.msk [vmem:[#allocation3 + $0xd0] sm:$0xf] %vm676_vm3, %v1181_v46  ;;  %1232 = vst.msk [vmem:[#allocation3 + $0xe8] sm:$0xf] %vm676_vm3, %v1184_v28  ;;  %v5631_v15 = vmax.f32 %v7100_v30, %v5588_v0  ;;  %v651_v41 = vsel %vm587_vm5, %v5482_v40, %v619_v48  ;;  %v7101_v2 = vmax.f32 %v5484_v42, %v5494_v45  ;;  %v1354_v45 = vld [vmem:[#allocation3 + $0x52] sm:$0xff] }
 0x13b   : > { %1230 = vst.msk [vmem:[#allocation3 + $0xd8] sm:$0xff] %vm673_vm2, %v1182_v21  ;;  %760 = vst.msk [vmem:[#allocation2 + $0x152] sm:$0xff] %vm673_vm2, %v648_v53  ;;  %v669_v38 = vpack.c.bf16 %v651_v41, %v5492_v32  ;;  %v649_v10 = vsel %vm585_vm6, %v5510_v16, %v617_v55  ;;  %v1322_v34 = vmax.f32 %v1258_v37, %v1290_v1  ;;  %v1417_v32 = vld [vmem:[#allocation3 + $0x4b] sm:$0xff] }
 0x13c   : > { %v1511_v4 = vmax.f32 %v7101_v2, %v1479_v61  ;;  %763 = vst.msk [vmem:[#allocation2 + $0x172] sm:$0xff] %vm673_vm2, %v651_v41  ;;  %v7102_v40 = vmax.f32 %v5496_v17, %v5469_v7  ;;  %v668_v31 = vpack.c.bf16 %v649_v10, %v648_v53  ;;  %761 = vst.msk [vmem:[#allocation2 + $0x15a] sm:$0xff] %vm673_vm2, %v649_v10  ;;  %v1418_v17 = vld [vmem:[#allocation3 + $0x53] sm:$0xff] }
 0x13d   : > { %v1512_v42 = vmax.f32 %v1448_v11, %v1480_v47  ;;  %v554_v16 = vadd.f32 %v4827_v50, %v5407_v25  ;;  %v546_v46 = vadd.f32 %v4827_v50, %v5420_v26  ;;  %v5661_v21 = vmax.f32 %v2114_v52, %v5615_v39  ;;  %v1481_v23 = vld [vmem:[#allocation3 + $0x4c] sm:$0xff] }
 0x13e   : > { %v1385_v57 = vmax.f32 %v7102_v40, %v1353_v6  ;;  %1986 = vst.msk [vmem:[#allocation2 + $0x62] sm:$0xff] %vm673_vm2, %v1511_v4  ;;  %v1386_v7 = vmax.f32 %v1322_v34, %v1354_v45  ;;  %v5664_v48 = vadd.f32 %v4827_v50, %v5443_v58  ;;  %v2303_v53 = vmax.f32 %v5631_v15, %v5615_v39  ;;  %v948_v34 = vld [vmem:[#allocation2 + $0x148] sm:$0xf]  ;;  %v5779_v13 = vld [vmem:[#allocation3 + $0x98] sm:$0xff] }
 0x13f   : > { %v1541_v55 = vpack.c.bf16 %v1512_v42, %v1511_v4  ;;  %1987 = vst.msk [vmem:[#allocation2 + $0x6a] sm:$0xff] %vm673_vm2, %v1512_v42  ;;  %vm590_vm7 = vcmp.gt.f32.partialorder %v554_v16, 0.0  ;;  %v622_v26 = vmul.f32 0.01, %v554_v16  ;;  %4622 = vmatprep.mubr.msk.bf16.mxu1 %vm673_vm2, %v668_v31  ;;  %v7103_v58 = vmax.f32 %v5498_v8, %v5488_v33  ;;  %v1482_v4 = vld [vmem:[#allocation3 + $0x54] sm:$0xff]  ;;  %v5689_v45 = vld [vmem:[#allocation2 + $0x168] sm:$0xff] }
 0x140   : > { %v1449_v28 = vmax.f32 %v1385_v57, %v1417_v32  ;;  %v1267_v37 = vld [vmem:[#allocation3 + $0xc0] sm:$0xff]  ;;  %v1268_v1 = vld [vmem:[#allocation3 + $0xc8] sm:$0xff]  ;;  %v1450_v61 = vmax.f32 %v1386_v7, %v1418_v17  ;;  %4623 = vmatmul.mubr.msk.bf16.gmra.mrb[8].mxu1 %vm673_vm2, %v669_v38  ;;  %v620_v10 = vmul.f32 0.01, %v546_v46  ;;  %v5681_v47 = vadd.f32 %v4827_v50, %v5451_v60  ;;  %v1490_v27 = vld [vmem:[#allocation3 + $0xb4] sm:$0xff] }
 0x141   : > { %v1299_v30 = vld [vmem:[#allocation3 + $0xc1] sm:$0xff]  ;;  %v1300_v25 = vld [vmem:[#allocation3 + $0xc9] sm:$0xff]  ;;  %v5674_v62 = vmax.f32 %v7103_v58, %v5473_v54  ;;  %4568 = vmatprep.mubr.msk.bf16.mxu0 %vm673_vm2, %v1541_v55  ;;  %v5678_v6 = vsel %vm590_vm7, %v554_v16, %v622_v26  ;;  %vm588_vm8 = vcmp.gt.f32.partialorder %v546_v46, 0.0  ;;  %vm591_vm9 = vcmp.gt.f32.partialorder %v5664_v48, 0.0 }
 0x142   : > { %v1331_v52 = vmax.f32 %v1267_v37, %v1299_v30  ;;  %v1513_v41 = vmax.f32 %v1449_v28, %v1481_v23  ;;  %v1332_v11 = vmax.f32 %v1268_v1, %v1300_v25  ;;  %v1363_v2 = vld [vmem:[#allocation3 + $0xc2] sm:$0xff]  ;;  %v1364_v40 = vld [vmem:[#allocation3 + $0xca] sm:$0xff]  ;;  %v1514_v31 = vmax.f32 %v1450_v61, %v1482_v4  ;;  %766 = vst.msk [vmem:[#allocation2 + $0x19a] sm:$0xff] %vm673_vm2, %v5678_v6 }
 0x143   : > { %v5683_v57 = vld [vmem:[#allocation2 + $0x150] sm:$0xff]  ;;  %v1427_v42 = vld [vmem:[#allocation3 + $0xc3] sm:$0xff]  ;;  %v7104_v32 = vmax.f32 %v5467_v63, %v5465_v5  ;;  %v623_v16 = vmul.f32 0.01, %v5664_v48  ;;  %v5711_v25 = vld [vmem:[#allocation2 + $0x178] sm:$0xf]  ;;  %v7105_v61 = vmax.f32 %v5516_v9, %v5504_v59 }
 0x144   : > { %v1395_v8 = vmax.f32 %v1331_v52, %v1363_v2  ;;  %1988 = vst.msk [vmem:[#allocation2 + $0x7a] sm:$0xff] %vm673_vm2, %v1513_v41  ;;  %v1396_v38 = vmax.f32 %v1332_v11, %v1364_v40  ;;  %v904_v60 = vmax.f32 %v5465_v5, %v5683_v57  ;;  %v5700_v7 = vld [vmem:[#allocation3 + $0x60] sm:$0xff]  ;;  %v1428_v28 = vld [vmem:[#allocation3 + $0xcb] sm:$0xff]  ;;  %v1091_v30 = vmax.f32 %v5526_v24, %v5683_v57  ;;  %v5713_v52 = vld [vmem:[#allocation2 + $0x158] sm:$0xff] }
 0x145   : > { %v5697_v50 = vmax.f32 %v7104_v32, %v5683_v57  ;;  %v5702_v17 = vld [vmem:[#allocation3 + $0x61] sm:$0xff]  ;;  %v1492_v1 = vld [vmem:[#allocation3 + $0xcc] sm:$0xff]  ;;  %v1185_v63 = vmax.f32 %v1088_v51, %v5683_v57  ;;  %v1542_v55 = vpack.c.bf16 %v1514_v31, %v1513_v41  ;;  %1989 = vst.msk [vmem:[#allocation2 + $0x82] sm:$0xff] %vm673_vm2, %v1514_v31  ;;  %v996_v11 = vmax.f32 %v7105_v61, %v948_v34 }
 0x146   : > { %v1459_v23 = vmax.f32 %v1395_v8, %v1427_v42  ;;  %v1491_v37 = vld [vmem:[#allocation3 + $0xc4] sm:$0xff]  ;;  %v1460_v26 = vmax.f32 %v1396_v38, %v1428_v28  ;;  %v5715_v58 = vld [vmem:[#allocation2 + $0x160] sm:$0xf]  ;;  %v5721_v24 = vsel %vm588_vm8, %v546_v46, %v620_v10  ;;  %vm589_vm10 = vcmp.gt.f32.partialorder %v5681_v47, 0.0  ;;  %v5758_v28 = vld [vmem:[#allocation2 + $0x170] sm:$0xff] }
 0x147   : > { %v907_v56 = vmax.f32 %v5683_v57, %v5689_v45  ;;  %v1188_v51 = vmax.f32 %v1091_v30, %v5689_v45  ;;  %1233 = vst.msk [vmem:[#allocation3 + $0xf0] sm:$0xff] %vm673_vm2, %v1185_v63  ;;  %v5730_v41 = vld [vmem:[#allocation2 + $0x160] sm:$0xf]  ;;  %4569 = vmatmul.mubr.msk.bf16.gmra.mrb[36].mxu0 %vm673_vm2, %v1542_v55  ;;  %764 = vst.msk [vmem:[#allocation2 + $0x182] sm:$0xff] %vm673_vm2, %v5721_v24  ;;  %v1323_v59 = vmax.f32 %v5700_v7, %v5702_v17  ;;  %v809_v9 = vld [vmem:[#allocation2 + $0x148] sm:$0xf] }
 0x148   : > { %v5724_v5 = vmax.f32 %v1459_v23, %v1491_v37  ;;  %v1045_v2 = vld [vmem:[#allocation2 + $0x160] sm:$0xf]  ;;  %v5737_v46 = vmax.f32 %v1460_v26, %v1492_v1  ;;  %v905_v10 = vmax.f32 %v5473_v54, %v5713_v52  ;;  %v5742_v34 = vmax.f32 %v904_v60, %v5689_v45  ;;  %v1260_v8 = vld [vmem:[#allocation3 + $0x68] sm:$0xff]  ;;  %v1142_v23 = vld [vmem:[#allocation2 + $0x178] sm:$0xf] }
 0x149   : > { %v1139_v4 = vld [vmem:[#allocation2 + $0x160] sm:$0xf]  ;;  %v1094_v40 = vmax.f32 %v5697_v50, %v5689_v45  ;;  %v1292_v31 = vld [vmem:[#allocation3 + $0x69] sm:$0xff]  ;;  %1236 = vst.msk [vmem:[#allocation3 + $0x108] sm:$0xff] %vm673_vm2, %v1188_v51  ;;  %v906_v38 = vmax.f32 %v809_v9, %v5715_v58  ;;  %v1092_v32 = vmax.f32 %v5674_v62, %v5713_v52  ;;  %v1093_v7 = vmax.f32 %v996_v11, %v1045_v2  ;;  %v954_v9 = vld [vmem:[#allocation2 + $0x178] sm:$0xf] }
 0x14a   : > { %1998 = vst.msk [vmem:[#allocation2 + $0xf2] sm:$0xff] %vm673_vm2, %v5724_v5  ;;  %v951_v42 = vld [vmem:[#allocation2 + $0x160] sm:$0xf]  ;;  %v1186_v60 = vmax.f32 %v1089_v43, %v5713_v52  ;;  %1999 = vst.msk [vmem:[#allocation2 + $0xfa] sm:$0xff] %vm673_vm2, %v5737_v46  ;;  %v909_v37 = vmax.f32 %v5730_v41, %v5711_v25  ;;  %v1187_v62 = vmax.f32 %v1090_v35, %v1139_v4  ;;  %v621_v43 = vmul.f32 0.01, %v5681_v47 }
 0x14b   : > { %v1262_v50 = vld [vmem:[#allocation3 + $0x80] sm:$0xff]  ;;  %v655_v20 = vsel %vm591_vm9, %v5664_v48, %v623_v16  ;;  %v7106_v30 = vmax.f32 %v5488_v33, %v5473_v54  ;;  %v1189_v55 = vmax.f32 %v1092_v32, %v5758_v28  ;;  %v1190_v26 = vmax.f32 %v1093_v7, %v1142_v23  ;;  %v1295_v35 = vld [vmem:[#allocation3 + $0x91] sm:$0xff]  ;;  %v7107_v16 = vld [vmem:[#allocation25_spill] sm:$0xff] }
 0x14c   : > { %v1293_v17 = vld [vmem:[#allocation3 + $0x79] sm:$0xff]  ;;  %v1294_v1 = vld [vmem:[#allocation3 + $0x81] sm:$0xff]  ;;  %1234 = vst.msk [vmem:[#allocation3 + $0xf8] sm:$0xff] %vm673_vm2, %v1186_v60  ;;  %v671_v22 = vpack.c.bf16 %v655_v20, %v5678_v6  ;;  %767 = vst.msk [vmem:[#allocation2 + $0x1a2] sm:$0xff] %vm673_vm2, %v655_v20  ;;  %v7108_v58 = vmax.f32 %v5502_v19, %v7107_v16  ;;  %v653_v11 = vsel %vm589_vm10, %v5681_v47, %v621_v43 }
 0x14d   : > { %v5773_v63 = vmax.f32 %v7106_v30, %v5713_v52  ;;  %v5781_v48 = vld [vmem:[#allocation3 + $0x99] sm:$0xff]  ;;  %1235 = vst.msk [vmem:[#allocation3 + $0x100] sm:$0xf] %vm676_vm3, %v1187_v62  ;;  %v5793_v6 = vmax.f32 %v905_v10, %v5758_v28  ;;  %v1324_v51 = vmax.f32 %v1260_v8, %v1292_v31  ;;  %v1355_v2 = vld [vmem:[#allocation3 + $0x62] sm:$0xff]  ;;  %1238 = vst.msk [vmem:[#allocation3 + $0x118] sm:$0xf] %vm676_vm3, %v1190_v26 }
 0x14e   : > { %v5786_v61 = vmax.f32 %v7108_v58, %v951_v42  ;;  %v1261_v4 = vld [vmem:[#allocation3 + $0x78] sm:$0xff]  ;;  %1237 = vst.msk [vmem:[#allocation3 + $0x110] sm:$0xff] %vm673_vm2, %v1189_v55  ;;  %v670_v19 = vpack.c.bf16 %v653_v11, %v5721_v24  ;;  %765 = vst.msk [vmem:[#allocation2 + $0x18a] sm:$0xff] %vm673_vm2, %v653_v11  ;;  %v1356_v42 = vld [vmem:[#allocation3 + $0x6a] sm:$0xff]  ;;  %v1387_v32 = vmax.f32 %v1323_v59, %v1355_v2 }
 0x14f   : > { %v1325_v7 = vmax.f32 %v1261_v4, %v1293_v17  ;;  %v1326_v60 = vmax.f32 %v1262_v50, %v1294_v1  ;;  %v1263_v47 = vld [vmem:[#allocation3 + $0x90] sm:$0xff]  ;;  %v862_v23 = vld [vmem:[#allocation2 + $0x180] sm:$0xff]  ;;  %v5799_v62 = vmax.f32 %v906_v38, %v954_v9  ;;  %v1388_v8 = vmax.f32 %v1324_v51, %v1356_v42  ;;  %v1152_v58 = vld [vmem:[#allocation2 + $0x1c8] sm:$0xff] }
 0x150   : > { %v1055_v10 = vld [vmem:[#allocation2 + $0x1b0] sm:$0xff]  ;;  %v1419_v31 = vld [vmem:[#allocation3 + $0x63] sm:$0xff]  ;;  %v1327_v43 = vmax.f32 %v1263_v47, %v1295_v35  ;;  %v1328_v30 = vmax.f32 %v5779_v13, %v5781_v48  ;;  %v910_v24 = vmax.f32 %v5689_v45, %v862_v23  ;;  %v1003_v59 = vmax.f32 %v907_v56, %v862_v23  ;;  %v1357_v38 = vld [vmem:[#allocation3 + $0x7a] sm:$0xff]  ;;  %4626 = vmatprep.mubr.msk.bf16.mxu1 %vm673_vm2, %v670_v19 }
 0x151   : > { %v1420_v20 = vld [vmem:[#allocation3 + $0x6b] sm:$0xff]  ;;  %v1097_v50 = vmax.f32 %v5742_v34, %v862_v23  ;;  %v1191_v17 = vmax.f32 %v1094_v40, %v862_v23  ;;  %v1358_v26 = vld [vmem:[#allocation3 + $0x82] sm:$0xff]  ;;  %v958_v35 = vld [vmem:[#allocation2 + $0x198] sm:$0xff]  ;;  %v1451_v11 = vmax.f32 %v1387_v32, %v1419_v31  ;;  %v1389_v48 = vmax.f32 %v1325_v7, %v1357_v38  ;;  %4627 = vmatmul.mubr.msk.bf16.gmra.mrb[12].mxu1 %vm673_vm2, %v671_v22 }
 0x152   : > { %v1483_v1 = vld [vmem:[#allocation3 + $0x64] sm:$0xff]  ;;  %v1484_v55 = vld [vmem:[#allocation3 + $0x6c] sm:$0xff]  ;;  %v1421_v16 = vld [vmem:[#allocation3 + $0x7b] sm:$0xff]  ;;  %v1452_v13 = vmax.f32 %v1388_v8, %v1420_v20  ;;  %v1390_v51 = vmax.f32 %v1326_v60, %v1358_v26  ;;  %v1006_v45 = vmax.f32 %v910_v24, %v958_v35  ;;  %v1100_v56 = vmax.f32 %v1003_v59, %v958_v35 }
 0x153   : > { %v1422_v2 = vld [vmem:[#allocation3 + $0x83] sm:$0xff]  ;;  %v1359_v57 = vld [vmem:[#allocation3 + $0x92] sm:$0xff]  ;;  %v1194_v34 = vmax.f32 %v1097_v50, %v958_v35  ;;  %1239 = vst.msk [vmem:[#allocation3 + $0x120] sm:$0xff] %vm673_vm2, %v1191_v17  ;;  %v1515_v32 = vmax.f32 %v1451_v11, %v1483_v1  ;;  %v1453_v7 = vmax.f32 %v1389_v48, %v1421_v16  ;;  %v1095_v20 = vmax.f32 %v5773_v63, %v5758_v28  ;;  %v1360_v24 = vld [vmem:[#allocation3 + $0x9a] sm:$0xff] }
 0x154   : > { %v1485_v40 = vld [vmem:[#allocation3 + $0x7c] sm:$0xff]  ;;  %v1486_v4 = vld [vmem:[#allocation3 + $0x84] sm:$0xff]  ;;  %v5811_v9 = vmax.f32 %v1327_v43, %v1359_v57  ;;  %v1048_v42 = vld [vmem:[#allocation2 + $0x178] sm:$0xf]  ;;  %v1516_v47 = vmax.f32 %v1452_v13, %v1484_v55  ;;  %v1454_v60 = vmax.f32 %v1390_v51, %v1422_v2  ;;  %v1103_v8 = vmax.f32 %v1006_v45, %v1055_v10 }
 0x155   : > { %v5813_v19 = vld [vmem:[#allocation3 + $0xa9] sm:$0xff]  ;;  %v5817_v22 = vld [vmem:[#allocation3 + $0xb1] sm:$0xff]  ;;  %v1197_v31 = vmax.f32 %v1100_v56, %v1055_v10  ;;  %1242 = vst.msk [vmem:[#allocation3 + $0x138] sm:$0xff] %vm673_vm2, %v1194_v34  ;;  %v1096_v43 = vmax.f32 %v5786_v61, %v1048_v42  ;;  %1990 = vst.msk [vmem:[#allocation2 + $0x92] sm:$0xff] %vm673_vm2, %v1515_v32  ;;  %v1517_v10 = vmax.f32 %v1453_v7, %v1485_v40 }
 0x156   : > { %v5815_v23 = vld [vmem:[#allocation3 + $0xb0] sm:$0xff]  ;;  %v1265_v50 = vld [vmem:[#allocation3 + $0xa8] sm:$0xff]  ;;  %v1543_v38 = vpack.c.bf16 %v1516_v47, %v1515_v32  ;;  %1991 = vst.msk [vmem:[#allocation2 + $0x9a] sm:$0xff] %vm673_vm2, %v1516_v47  ;;  %v1518_v26 = vmax.f32 %v1454_v60, %v1486_v4  ;;  %v1200_v63 = vmax.f32 %v1103_v8, %v1152_v58  ;;  %v1392_v11 = vmax.f32 %v1328_v30, %v1360_v24  ;;  %v5834_v51 = vld [vmem:[#allocation2 + $0x178] sm:$0xf] }
 0x157   : > { %v1423_v59 = vld [vmem:[#allocation3 + $0x93] sm:$0xff]  ;;  %v5823_v17 = vld [vmem:[#allocation2 + $0x188] sm:$0xff]  ;;  %v1329_v16 = vmax.f32 %v1265_v50, %v5813_v19  ;;  %1245 = vst.msk [vmem:[#allocation3 + $0x150] sm:$0xff] %vm673_vm2, %v1197_v31  ;;  %v1330_v48 = vmax.f32 %v5815_v23, %v5817_v22  ;;  %v1151_v45 = vld [vmem:[#allocation2 + $0x1c0] sm:$0xf]  ;;  %v908_v34 = vmax.f32 %v5713_v52, %v5758_v28 }
 0x158   : > { %v5825_v1 = vld [vmem:[#allocation2 + $0x190] sm:$0xf]  ;;  %v1455_v13 = vmax.f32 %v5811_v9, %v1423_v59  ;;  %v1098_v57 = vmax.f32 %v5793_v6, %v5823_v17  ;;  %v1192_v56 = vmax.f32 %v1095_v20, %v5823_v17  ;;  %4572 = vmatprep.mubr.msk.bf16.mxu0 %vm673_vm2, %v1543_v38  ;;  %1992 = vst.msk [vmem:[#allocation2 + $0xaa] sm:$0xff] %vm673_vm2, %v1517_v10  ;;  %1993 = vst.msk [vmem:[#allocation2 + $0xb2] sm:$0xff] %vm673_vm2, %v1518_v26  ;;  %v2160_v30 = vld [vmem:[#allocation2 + $0x40] sm:$0xf] }
 0x159   : > { %v957_v55 = vld [vmem:[#allocation2 + $0x190] sm:$0xf]  ;;  %1248 = vst.msk [vmem:[#allocation3 + $0x168] sm:$0xff] %vm673_vm2, %v1200_v63  ;;  %v5849_v25 = vld [vmem:[#allocation2 + $0x1a0] sm:$0xff]  ;;  %v1054_v41 = vld [vmem:[#allocation2 + $0x1a8] sm:$0xf]  ;;  %v911_v6 = vmax.f32 %v5758_v28, %v5823_v17  ;;  %v1544_v32 = vpack.c.bf16 %v1518_v26, %v1517_v10  ;;  %v5866_v31 = vmax.f32 %v908_v34, %v5823_v17 }
 0x15a   : > { %v1051_v61 = vld [vmem:[#allocation2 + $0x190] sm:$0xf]  ;;  %v1005_v2 = vmax.f32 %v909_v37, %v957_v55  ;;  %v1148_v37 = vld [vmem:[#allocation2 + $0x1a8] sm:$0xf]  ;;  %v5857_v9 = vld [vmem:[#allocation2 + $0x58] sm:$0xf]  ;;  %v1195_v52 = vmax.f32 %v1098_v57, %v5849_v25 }
 0x15b   : > { %v1145_v35 = vld [vmem:[#allocation2 + $0x190] sm:$0xf]  ;;  %v1099_v58 = vmax.f32 %v5799_v62, %v1051_v61  ;;  %v912_v62 = vmax.f32 %v5834_v51, %v5825_v1  ;;  %v5855_v4 = vld [vmem:[#allocation2 + $0x48] sm:$0xff]  ;;  %1240 = vst.msk [vmem:[#allocation3 + $0x128] sm:$0xff] %vm673_vm2, %v1192_v56  ;;  %v1424_v47 = vld [vmem:[#allocation3 + $0x9b] sm:$0xff]  ;;  %4573 = vmatmul.mubr.msk.bf16.gmra.mrb[40].mxu0 %vm673_vm2, %v1544_v32  ;;  %v1547_v61 = vpack.c.bf16 %v5737_v46, %v5724_v5 }
 0x15c   : > { %v1193_v40 = vmax.f32 %v1096_v43, %v1145_v35  ;;  %v1102_v19 = vmax.f32 %v1005_v2, %v1054_v41  ;;  %v1487_v7 = vld [vmem:[#allocation3 + $0x94] sm:$0xff]  ;;  %v1361_v60 = vld [vmem:[#allocation3 + $0xaa] sm:$0xff]  ;;  %v5861_v22 = vld [vmem:[#allocation2 + $0x40] sm:$0xf]  ;;  %v1456_v20 = vmax.f32 %v1392_v11, %v1424_v47  ;;  %1243 = vst.msk [vmem:[#allocation3 + $0x140] sm:$0xff] %vm673_vm2, %v1195_v52 }
 0x15d   : > { %v1196_v42 = vmax.f32 %v1099_v58, %v1148_v37  ;;  %v2256_v23 = vld [vmem:[#allocation2 + $0x58] sm:$0xf]  ;;  %v5863_v8 = vld [vmem:[#allocation2 + $0x68] sm:$0xff]  ;;  %v1488_v43 = vld [vmem:[#allocation3 + $0x9c] sm:$0xff]  ;;  %v1519_v24 = vmax.f32 %v1455_v13, %v1487_v7  ;;  %v1393_v50 = vmax.f32 %v1329_v16, %v1361_v60  ;;  %v1183_v16 = vmax.f32 %v1086_v12, %v5473_v54 }
 0x15e   : > { %1241 = vst.msk [vmem:[#allocation3 + $0x130] sm:$0xf] %vm676_vm3, %v1193_v40  ;;  %v1362_v59 = vld [vmem:[#allocation3 + $0xb2] sm:$0xff]  ;;  %v5869_v55 = vld [vmem:[#allocation2 + $0x80] sm:$0xff]  ;;  %v1199_v38 = vmax.f32 %v1102_v19, %v1151_v45  ;;  %v1520_v35 = vmax.f32 %v1456_v20, %v1488_v43  ;;  %v2399_v40 = vmax.f32 %v2303_v53, %v5863_v8  ;;  %v2118_v52 = vmax.f32 %v5861_v22, %v5857_v9  ;;  %v2076_v15 = vld [vmem:[#allocation2 + $0x88] sm:$0xf] }
 0x15f   : > { %1244 = vst.msk [vmem:[#allocation3 + $0x148] sm:$0xf] %vm676_vm3, %v1196_v42  ;;  %v1394_v10 = vmax.f32 %v1330_v48, %v1362_v59  ;;  %v1425_v26 = vld [vmem:[#allocation3 + $0xab] sm:$0xff]  ;;  %v1426_v63 = vld [vmem:[#allocation3 + $0xb3] sm:$0xff]  ;;  %v7112_v45 = vld [vmem:[#allocation16_spill] sm:$0xff]  ;;  %v2120_v9 = vmax.f32 %v5615_v39, %v5863_v8 }
 0x160   : > { %1994 = vst.msk [vmem:[#allocation2 + $0xc2] sm:$0xff] %vm673_vm2, %v1519_v24  ;;  %v1457_v11 = vmax.f32 %v1393_v50, %v1425_v26  ;;  %v1489_v13 = vld [vmem:[#allocation3 + $0xac] sm:$0xff]  ;;  %v7111_v58 = vld [vmem:[#allocation15_spill] sm:$0xff]  ;;  %v5888_v41 = vld [vmem:[#allocation2 + $0x60] sm:$0xff]  ;;  %v1545_v42 = vpack.c.bf16 %v1520_v35, %v1519_v24  ;;  %v2123_v26 = vmax.f32 %v5863_v8, %v5869_v55 }
 0x161   : > { %v7109_v2 = vld [vmem:[#allocation14_spill] sm:$0xff]  ;;  %v7113_v56 = vmax.f32 %v7111_v58, %v7112_v45  ;;  %v5890_v37 = vld [vmem:[#allocation2 + $0x58] sm:$0xf]  ;;  %1247 = vst.msk [vmem:[#allocation3 + $0x160] sm:$0xf] %vm676_vm3, %v1199_v38  ;;  %v1458_v54 = vmax.f32 %v1394_v10, %v1426_v63  ;;  %v2119_v59 = vmax.f32 %v5855_v4, %v5888_v41  ;;  %v5930_v58 = vld [vmem:[#allocation2 + $0xa8] sm:$0xff]  ;;  %v5961_v18 = vmax.f32 %v2120_v9, %v5869_v55 }
 0x162   : > { %v7110_v57 = vmax.f32 %v7109_v2, %v5057_v3  ;;  %v2073_v33 = vld [vmem:[#allocation2 + $0x70] sm:$0xf]  ;;  %1231 = vst.msk [vmem:[#allocation3 + $0xe0] sm:$0xff] %vm673_vm2, %v1183_v16  ;;  %v5898_v19 = vld [vmem:[#allocation2 + $0x78] sm:$0xff]  ;;  %1995 = vst.msk [vmem:[#allocation2 + $0xca] sm:$0xff] %vm673_vm2, %v1520_v35  ;;  %v1521_v32 = vmax.f32 %v1457_v11, %v1489_v13  ;;  %4576 = vmatprep.mubr.msk.bf16.mxu0 %vm673_vm2, %v1545_v42 }
 0x163   : > { %v2208_v34 = vmax.f32 %v7113_v56, %v2160_v30  ;;  %v2352_v12 = vld [vmem:[#allocation2 + $0x70] sm:$0xf]  ;;  %v2116_v30 = vmax.f32 %v5583_v36, %v5855_v4  ;;  %v5908_v20 = vld [vmem:[#allocation2 + $0x98] sm:$0xff]  ;;  %v1522_v53 = vmax.f32 %v1458_v54, %v1490_v27  ;;  %2447 = vst.msk [vmem:[#allocation3 + $0x8] sm:$0xff] %vm673_vm2, %v2399_v40  ;;  %v2079_v43 = vld [vmem:[#allocation2 + $0xa0] sm:$0xf]  ;;  %v2121_v22 = vmax.f32 %v5890_v37, %v2073_v33 }
 0x164   : > { %v2206_v48 = vmax.f32 %v7110_v57, %v5583_v36  ;;  %v5906_v60 = vld [vmem:[#allocation2 + $0x90] sm:$0xff]  ;;  %v2163_v24 = vld [vmem:[#allocation2 + $0x58] sm:$0xf]  ;;  %1996 = vst.msk [vmem:[#allocation2 + $0xda] sm:$0xff] %vm673_vm2, %v1521_v32  ;;  %v2122_v10 = vmax.f32 %v5888_v41, %v5898_v19  ;;  %v2031_v35 = vld [vmem:[#allocation2 + $0x88] sm:$0xf]  ;;  %v2126_v2 = vmax.f32 %v5869_v55, %v5908_v20  ;;  %v5958_v36 = vmax.f32 %v2119_v59, %v5898_v19 }
 0x165   : > { %v2304_v7 = vmax.f32 %v2208_v34, %v2256_v23  ;;  %v2028_v38 = vld [vmem:[#allocation2 + $0x70] sm:$0xf]  ;;  %v1546_v16 = vpack.c.bf16 %v1522_v53, %v1521_v32  ;;  %1997 = vst.msk [vmem:[#allocation2 + $0xe2] sm:$0xff] %vm673_vm2, %v1522_v53  ;;  %v2125_v13 = vmax.f32 %v5898_v19, %v5906_v60  ;;  %v2169_v57 = vld [vmem:[#allocation2 + $0x88] sm:$0xf]  ;;  %v2127_v56 = vmax.f32 %v2031_v35, %v2079_v43  ;;  %v1269_v54 = vld [vmem:[#allocation3 + $0xd8] sm:$0xff] }
 0x166   : > { %v2302_v47 = vmax.f32 %v2206_v48, %v5855_v4  ;;  %v2166_v63 = vld [vmem:[#allocation2 + $0x70] sm:$0xf]  ;;  %v2124_v11 = vmax.f32 %v2028_v38, %v2076_v15  ;;  %v2172_v48 = vld [vmem:[#allocation2 + $0xa0] sm:$0xf]  ;;  %v5938_v34 = vmax.f32 %v2113_v44, %v5855_v4  ;;  %v5943_v37 = vmax.f32 %v2115_v49, %v2163_v24  ;;  %v2175_v27 = vld [vmem:[#allocation2 + $0xb8] sm:$0xf] }
 0x167   : > { %v2400_v50 = vmax.f32 %v2304_v7, %v2352_v12  ;;  %v5932_v45 = vld [vmem:[#allocation2 + $0xb0] sm:$0xff]  ;;  %v5946_v33 = vmax.f32 %v2116_v30, %v5888_v41  ;;  %4577 = vmatmul.mubr.msk.bf16.gmra.mrb[44].mxu0 %vm673_vm2, %v1546_v16  ;;  %v5953_v12 = vmax.f32 %v2117_v29, %v5863_v8  ;;  %v5955_v3 = vmax.f32 %v2118_v52, %v2166_v63  ;;  %v5985_v46 = vld [vmem:[#allocation2 + $0x88] sm:$0xf]  ;;  %v5991_v15 = vld [vmem:[#allocation2 + $0xb8] sm:$0xf] }
 0x168   : > { %v2398_v23 = vmax.f32 %v2302_v47, %v5888_v41  ;;  %v5963_v14 = vld [vmem:[#allocation2 + $0x70] sm:$0xf]  ;;  %4580 = vmatprep.mubr.msk.bf16.mxu0 %vm673_vm2, %v1547_v61  ;;  %v5969_v39 = vmax.f32 %v2121_v22, %v2169_v57  ;;  %v5972_v29 = vmax.f32 %v2122_v10, %v5906_v60  ;;  %v5975_v4 = vmax.f32 %v2123_v26, %v5908_v20  ;;  %v5987_v61 = vld [vmem:[#allocation2 + $0xa0] sm:$0xf] }
 0x169   : > { %2448 = vst.msk [vmem:[#allocation3 + $0x10] sm:$0xf] %vm676_vm3, %v2400_v50  ;;  %v1270_v44 = vld [vmem:[#allocation3 + $0xe0] sm:$0xff]  ;;  %v5977_v40 = vmax.f32 %v2124_v11, %v2172_v48  ;;  %v5980_v42 = vmax.f32 %v2125_v13, %v5930_v58  ;;  %v5983_v5 = vmax.f32 %v2126_v2, %v5932_v45  ;;  %v5989_v7 = vmax.f32 %v2127_v56, %v2175_v27  ;;  %v6007_v63 = vld [vmem:[#allocation2 + $0xd0] sm:$0xf] }
 0x16a   : > { %2446 = vst.msk [vmem:[#allocation3] sm:$0xff] %vm673_vm2, %v2398_v23  ;;  %v1301_v49 = vld [vmem:[#allocation3 + $0xd9] sm:$0xff]  ;;  %v1302_v0 = vld [vmem:[#allocation3 + $0xe1] sm:$0xff]  ;;  %v2305_v53 = vmax.f32 %v5938_v34, %v5888_v41  ;;  %v2306_v43 = vmax.f32 %v5661_v21, %v5863_v8  ;;  %v2307_v59 = vmax.f32 %v5943_v37, %v5963_v14  ;;  %v2308_v38 = vmax.f32 %v5946_v33, %v5898_v19 }
 0x16b   : > { %v1333_v30 = vmax.f32 %v1269_v54, %v1301_v49  ;;  %v1334_v52 = vmax.f32 %v1270_v44, %v1302_v0  ;;  %v1365_v32 = vld [vmem:[#allocation3 + $0xda] sm:$0xff]  ;;  %v1366_v47 = vld [vmem:[#allocation3 + $0xe2] sm:$0xff]  ;;  %v2309_v10 = vmax.f32 %v5953_v12, %v5869_v55  ;;  %v2310_v21 = vmax.f32 %v5955_v3, %v5985_v46  ;;  %v2364_v46 = vld [vmem:[#allocation2 + $0xd0] sm:$0xf] }
 0x16c   : > { %v1429_v24 = vld [vmem:[#allocation3 + $0xdb] sm:$0xff]  ;;  %v2495_v23 = vld [vmem:[#allocation3 + $0x8] sm:$0xff]  ;;  %v2311_v8 = vmax.f32 %v5958_v36, %v5906_v60  ;;  %v2312_v16 = vmax.f32 %v5961_v18, %v5908_v20  ;;  %v2313_v35 = vmax.f32 %v5969_v39, %v5987_v61  ;;  %v2314_v56 = vmax.f32 %v5972_v29, %v5930_v58  ;;  %v6031_v61 = vld [vmem:[#allocation3 + $0xf1] sm:$0xff] }
 0x16d   : > { %v1397_v9 = vmax.f32 %v1333_v30, %v1365_v32  ;;  %v1398_v22 = vmax.f32 %v1334_v52, %v1366_v47  ;;  %v5999_v50 = vld [vmem:[#allocation2 + $0xc0] sm:$0xff]  ;;  %v6005_v41 = vld [vmem:[#allocation2 + $0xc8] sm:$0xff]  ;;  %v2315_v34 = vmax.f32 %v5975_v4, %v5932_v45  ;;  %v2316_v12 = vmax.f32 %v5977_v40, %v5991_v15  ;;  %v2361_v52 = vld [vmem:[#allocation2 + $0xb8] sm:$0xf] }
 0x16e   : > { %v1430_v26 = vld [vmem:[#allocation3 + $0xe3] sm:$0xff]  ;;  %v2317_v3 = vmax.f32 %v5980_v42, %v5999_v50  ;;  %v2318_v0 = vmax.f32 %v5983_v5, %v6005_v41  ;;  %v2319_v39 = vmax.f32 %v5989_v7, %v6007_v63  ;;  %v2401_v40 = vmax.f32 %v2305_v53, %v5898_v19  ;;  %v6035_v15 = vld [vmem:[#allocation2 + $0xd8] sm:$0xff] }
 0x16f   : > { %v1461_v11 = vmax.f32 %v1397_v9, %v1429_v24  ;;  %v1462_v13 = vmax.f32 %v1398_v22, %v1430_v26  ;;  %v1493_v37 = vld [vmem:[#allocation3 + $0xdc] sm:$0xff]  ;;  %v1494_v33 = vld [vmem:[#allocation3 + $0xe4] sm:$0xff]  ;;  %v2402_v42 = vmax.f32 %v2306_v43, %v5869_v55  ;;  %v2404_v9 = vmax.f32 %v2308_v38, %v5906_v60  ;;  %v6043_v55 = vld [vmem:[#allocation3 + $0x110] sm:$0xff] }
 0x170   : > { %v2527_v48 = vld [vmem:[#allocation3 + $0x9] sm:$0xff]  ;;  %v2358_v29 = vld [vmem:[#allocation2 + $0xa0] sm:$0xf]  ;;  %v2405_v22 = vmax.f32 %v2309_v10, %v5908_v20  ;;  %v6039_v24 = vld [vmem:[#allocation3 + $0xf8] sm:$0xff]  ;;  %2449 = vst.msk [vmem:[#allocation3 + $0x18] sm:$0xff] %vm673_vm2, %v2401_v40 }
 0x171   : > { %v2494_v2 = vld [vmem:[#allocation3] sm:$0xff]  ;;  %v2559_v27 = vmax.f32 %v2495_v23, %v2527_v48  ;;  %v2355_v36 = vld [vmem:[#allocation2 + $0x88] sm:$0xf]  ;;  %v1525_v18 = vmax.f32 %v1461_v11, %v1493_v37  ;;  %v1526_v14 = vmax.f32 %v1462_v13, %v1494_v33  ;;  %v2406_v11 = vmax.f32 %v2310_v21, %v2358_v29  ;;  %2450 = vst.msk [vmem:[#allocation3 + $0x20] sm:$0xff] %vm673_vm2, %v2402_v42  ;;  %v1271_v38 = vld [vmem:[#allocation3 + $0xf0] sm:$0xff] }
 0x172   : > { %v2526_v57 = vld [vmem:[#allocation3 + $0x1] sm:$0xff]  ;;  %v2591_v49 = vld [vmem:[#allocation3 + $0xa] sm:$0xff]  ;;  %v2403_v7 = vmax.f32 %v2307_v59, %v2355_v36  ;;  %v6041_v19 = vld [vmem:[#allocation3 + $0xf9] sm:$0xff]  ;;  %v2407_v59 = vmax.f32 %v2311_v8, %v5930_v58  ;;  %v2409_v48 = vmax.f32 %v2313_v35, %v2361_v52  ;;  %v2410_v37 = vmax.f32 %v2314_v56, %v5999_v50  ;;  %2452 = vst.msk [vmem:[#allocation3 + $0x30] sm:$0xff] %vm673_vm2, %v2404_v9 }
 0x173   : > { %v2558_v54 = vmax.f32 %v2494_v2, %v2526_v57  ;;  %v2590_v44 = vld [vmem:[#allocation3 + $0x2] sm:$0xff]  ;;  %v2623_v30 = vmax.f32 %v2559_v27, %v2591_v49  ;;  %v1548_v32 = vpack.c.bf16 %v1526_v14, %v1525_v18  ;;  %2000 = vst.msk [vmem:[#allocation2 + $0x10a] sm:$0xff] %vm673_vm2, %v1525_v18  ;;  %2001 = vst.msk [vmem:[#allocation2 + $0x112] sm:$0xff] %vm673_vm2, %v1526_v14  ;;  %v2655_v47 = vld [vmem:[#allocation3 + $0xb] sm:$0xff] }
 0x174   : > { %v2654_v5 = vld [vmem:[#allocation3 + $0x3] sm:$0xff]  ;;  %v6052_v10 = vld [vmem:[#allocation3 + $0x111] sm:$0xff]  ;;  %v2408_v57 = vmax.f32 %v2312_v16, %v5932_v45  ;;  %v2411_v21 = vmax.f32 %v2315_v34, %v6005_v41  ;;  %2451 = vst.msk [vmem:[#allocation3 + $0x28] sm:$0xf] %vm676_vm3, %v2403_v7  ;;  %v2412_v36 = vmax.f32 %v2316_v12, %v2364_v46  ;;  %v2413_v18 = vmax.f32 %v2317_v3, %v6035_v15  ;;  %v6066_v56 = vld [vmem:[#allocation3 + $0x139] sm:$0xff] }
 0x175   : > { %v2622_v4 = vmax.f32 %v2558_v54, %v2590_v44  ;;  %v6045_v53 = vld [vmem:[#allocation3 + $0x109] sm:$0xff]  ;;  %v2687_v23 = vmax.f32 %v2623_v30, %v2655_v47  ;;  %v6047_v26 = vld [vmem:[#allocation2 + $0xe0] sm:$0xff]  ;;  %4581 = vmatmul.mubr.msk.bf16.gmra.mrb[48].mxu0 %vm673_vm2, %v1548_v32  ;;  %2453 = vst.msk [vmem:[#allocation3 + $0x38] sm:$0xff] %vm673_vm2, %v2405_v22  ;;  %2455 = vst.msk [vmem:[#allocation3 + $0x48] sm:$0xff] %vm673_vm2, %v2407_v59  ;;  %v6072_v34 = vmax.f32 %v911_v6, %v5849_v25 }
 0x176   : > { %v2367_v63 = vld [vmem:[#allocation2 + $0xe8] sm:$0xf]  ;;  %v2719_v2 = vld [vmem:[#allocation3 + $0xc] sm:$0xff]  ;;  %2454 = vst.msk [vmem:[#allocation3 + $0x40] sm:$0xf] %vm676_vm3, %v2406_v11  ;;  %v2414_v14 = vmax.f32 %v2318_v0, %v6047_v26  ;;  %v1335_v3 = vmax.f32 %v1271_v38, %v6031_v61  ;;  %v1368_v44 = vld [vmem:[#allocation3 + $0xfa] sm:$0xff]  ;;  %v1336_v17 = vmax.f32 %v6039_v24, %v6041_v19  ;;  %v1101_v24 = vmax.f32 %v5866_v31, %v5849_v25 }
 0x177   : > { %v2686_v43 = vmax.f32 %v2622_v4, %v2654_v5  ;;  %v2718_v13 = vld [vmem:[#allocation3 + $0x4] sm:$0xff]  ;;  %v2751_v27 = vmax.f32 %v2687_v23, %v2719_v2  ;;  %v1367_v50 = vld [vmem:[#allocation3 + $0xf2] sm:$0xff]  ;;  %v2415_v12 = vmax.f32 %v2319_v39, %v2367_v63  ;;  %2456 = vst.msk [vmem:[#allocation3 + $0x50] sm:$0xff] %vm673_vm2, %v2408_v57  ;;  %2458 = vst.msk [vmem:[#allocation3 + $0x60] sm:$0xff] %vm673_vm2, %v2410_v37 }
 0x178   : > { %v1273_v8 = vld [vmem:[#allocation3 + $0x108] sm:$0xff]  ;;  %2457 = vst.msk [vmem:[#allocation3 + $0x58] sm:$0xf] %vm676_vm3, %v2409_v48  ;;  %v1370_v29 = vld [vmem:[#allocation3 + $0x112] sm:$0xff]  ;;  %v1275_v4 = vld [vmem:[#allocation3 + $0x120] sm:$0xff]  ;;  %v1338_v39 = vmax.f32 %v6043_v55, %v6052_v10  ;;  %v1399_v40 = vmax.f32 %v1335_v3, %v1367_v50  ;;  %v1400_v19 = vmax.f32 %v1336_v17, %v1368_v44 }
 0x179   : > { %v6061_v33 = vld [vmem:[#allocation3 + $0x128] sm:$0xff]  ;;  %v2750_v54 = vmax.f32 %v2686_v43, %v2718_v13  ;;  %2459 = vst.msk [vmem:[#allocation3 + $0x68] sm:$0xff] %vm673_vm2, %v2411_v21  ;;  %3045 = vst.msk [vmem:[#allocation2 + $0x3a] sm:$0xff] %vm673_vm2, %v2751_v27  ;;  %v1431_v6 = vld [vmem:[#allocation3 + $0xf3] sm:$0xff]  ;;  %v1337_v0 = vmax.f32 %v1273_v8, %v6045_v53 }
 0x17a   : > { %v1307_v16 = vld [vmem:[#allocation3 + $0x121] sm:$0xff]  ;;  %v1308_v35 = vld [vmem:[#allocation3 + $0x129] sm:$0xff]  ;;  %2460 = vst.msk [vmem:[#allocation3 + $0x70] sm:$0xf] %vm676_vm3, %v2412_v36  ;;  %v1277_v30 = vld [vmem:[#allocation3 + $0x138] sm:$0xff]  ;;  %v1402_v43 = vmax.f32 %v1338_v39, %v1370_v29  ;;  %v1463_v13 = vmax.f32 %v1399_v40, %v1431_v6 }
 0x17b   : > { %v1369_v49 = vld [vmem:[#allocation3 + $0x10a] sm:$0xff]  ;;  %v2782_v28 = vpack.c.bf16 %v2751_v27, %v2750_v54  ;;  %3044 = vst.msk [vmem:[#allocation2 + $0x32] sm:$0xff] %vm673_vm2, %v2750_v54  ;;  %2461 = vst.msk [vmem:[#allocation3 + $0x78] sm:$0xff] %vm673_vm2, %v2413_v18  ;;  %v6089_v52 = vld [vmem:[#allocation3 + $0x140] sm:$0xff]  ;;  %v1339_v5 = vmax.f32 %v1275_v4, %v1307_v16  ;;  %v1340_v47 = vmax.f32 %v6061_v33, %v1308_v35 }
 0x17c   : > { %v1310_v46 = vld [vmem:[#allocation3 + $0x141] sm:$0xff]  ;;  %2462 = vst.msk [vmem:[#allocation3 + $0x80] sm:$0xff] %vm673_vm2, %v2414_v14  ;;  %v1433_v61 = vld [vmem:[#allocation3 + $0x10b] sm:$0xff]  ;;  %v1434_v32 = vld [vmem:[#allocation3 + $0x113] sm:$0xff]  ;;  %v1341_v22 = vmax.f32 %v1277_v30, %v6066_v56  ;;  %v1401_v53 = vmax.f32 %v1337_v0, %v1369_v49 }
 0x17d   : > { %2463 = vst.msk [vmem:[#allocation3 + $0x88] sm:$0xf] %vm676_vm3, %v2415_v12  ;;  %v1432_v42 = vld [vmem:[#allocation3 + $0xfb] sm:$0xff]  ;;  %v1372_v9 = vld [vmem:[#allocation3 + $0x12a] sm:$0xff]  ;;  %4632 = vmatprep.mubr.msk.bf16.mxu1 %vm673_vm2, %v2782_v28  ;;  %v1342_v21 = vmax.f32 %v6089_v52, %v1310_v46  ;;  %v1466_v18 = vmax.f32 %v1402_v43, %v1434_v32  ;;  %v4828_v43 = vld [vmem:[%s7038_s3 + $0x3] sm:$0x1] }
 0x17e   : > { %v1371_v7 = vld [vmem:[#allocation3 + $0x122] sm:$0xff]  ;;  %v1495_v55 = vld [vmem:[#allocation3 + $0xf4] sm:$0xff]  ;;  %v1436_v63 = vld [vmem:[#allocation3 + $0x12b] sm:$0xff]  ;;  %v1404_v37 = vmax.f32 %v1340_v47, %v1372_v9  ;;  %v1464_v27 = vmax.f32 %v1400_v19, %v1432_v42  ;;  %v1465_v36 = vmax.f32 %v1401_v53, %v1433_v61 }
 0x17f   : > { %v1435_v23 = vld [vmem:[#allocation3 + $0x123] sm:$0xff]  ;;  %v1373_v11 = vld [vmem:[#allocation3 + $0x13a] sm:$0xff]  ;;  %v1497_v57 = vld [vmem:[#allocation3 + $0x10c] sm:$0xff]  ;;  %v1403_v48 = vmax.f32 %v1339_v5, %v1371_v7  ;;  %v1527_v49 = vmax.f32 %v1463_v13, %v1495_v55 }
 0x180   : > { %v6098_v59 = vld [vmem:[#allocation3 + $0x18] sm:$0xff]  ;;  %v6100_v38 = vld [vmem:[#allocation3 + $0x20] sm:$0xff]  ;;  %v6105_v8 = vld [vmem:[#allocation3 + $0x30] sm:$0xff]  ;;  %v6111_v56 = vmax.f32 %v1341_v22, %v1373_v11  ;;  %v1468_v4 = vmax.f32 %v1404_v37, %v1436_v63  ;;  %v1529_v30 = vmax.f32 %v1465_v36, %v1497_v57 }
 0x181   : > { %v6102_v10 = vld [vmem:[#allocation3 + $0x19] sm:$0xff]  ;;  %v6109_v54 = vld [vmem:[#allocation3 + $0x21] sm:$0xff]  ;;  %v1500_v35 = vld [vmem:[#allocation3 + $0x12c] sm:$0xff]  ;;  %v1467_v29 = vmax.f32 %v1403_v48, %v1435_v23  ;;  %2002 = vst.msk [vmem:[#allocation2 + $0x122] sm:$0xff] %vm673_vm2, %v1527_v49  ;;  %v6132_v23 = vsel %vm1605_vm4, %v4828_v43, 0 }
 0x182   : > { %v1496_v2 = vld [vmem:[#allocation3 + $0xfc] sm:$0xff]  ;;  %v1498_v50 = vld [vmem:[#allocation3 + $0x114] sm:$0xff]  ;;  %v1499_v16 = vld [vmem:[#allocation3 + $0x124] sm:$0xff]  ;;  %v2560_v44 = vmax.f32 %v6098_v59, %v6102_v10  ;;  %v2561_v6 = vmax.f32 %v6100_v38, %v6109_v54  ;;  %v1532_v5 = vmax.f32 %v1468_v4, %v1500_v35  ;;  %2004 = vst.msk [vmem:[#allocation2 + $0x13a] sm:$0xff] %vm673_vm2, %v1529_v30 }
 0x183   : > { %v6107_v33 = vld [vmem:[#allocation3 + $0x38] sm:$0xff]  ;;  %v6113_v14 = vld [vmem:[#allocation3 + $0x48] sm:$0xff]  ;;  %v2501_v28 = vld [vmem:[#allocation3 + $0x50] sm:$0xff]  ;;  %v1528_v39 = vmax.f32 %v1464_v27, %v1496_v2  ;;  %v1530_v61 = vmax.f32 %v1466_v18, %v1498_v50  ;;  %v1531_v32 = vmax.f32 %v1467_v29, %v1499_v16 }
 0x184   : > { %v2530_v12 = vld [vmem:[#allocation3 + $0x31] sm:$0xff]  ;;  %v6115_v3 = vld [vmem:[#allocation3 + $0x39] sm:$0xff]  ;;  %v1374_v52 = vld [vmem:[#allocation3 + $0x142] sm:$0xff]  ;;  %2007 = vst.msk [vmem:[#allocation2 + $0x15a] sm:$0xff] %vm673_vm2, %v1532_v5 }
 0x185   : > { %v6119_v17 = vld [vmem:[#allocation3 + $0x60] sm:$0xff]  ;;  %v2562_v0 = vmax.f32 %v6105_v8, %v2530_v12  ;;  %v2503_v46 = vld [vmem:[#allocation3 + $0x68] sm:$0xff]  ;;  %v2504_v40 = vld [vmem:[#allocation3 + $0x78] sm:$0xff]  ;;  %v1406_v47 = vmax.f32 %v1342_v21, %v1374_v52  ;;  %v2563_v55 = vmax.f32 %v6107_v33, %v6115_v3  ;;  %v1549_v63 = vpack.c.bf16 %v1528_v39, %v1527_v49  ;;  %2003 = vst.msk [vmem:[#allocation2 + $0x12a] sm:$0xff] %vm673_vm2, %v1528_v39 }
 0x186   : > { %v2532_v42 = vld [vmem:[#allocation3 + $0x49] sm:$0xff]  ;;  %v1437_v7 = vld [vmem:[#allocation3 + $0x13b] sm:$0xff]  ;;  %v2533_v22 = vld [vmem:[#allocation3 + $0x51] sm:$0xff]  ;;  %v1550_v57 = vpack.c.bf16 %v1530_v61, %v1529_v30  ;;  %2005 = vst.msk [vmem:[#allocation2 + $0x142] sm:$0xff] %vm673_vm2, %v1530_v61  ;;  %v1551_v48 = vpack.c.bf16 %v1532_v5, %v1531_v32 }
 0x187   : > { %v2505_v9 = vld [vmem:[#allocation3 + $0x80] sm:$0xff]  ;;  %v2564_v53 = vmax.f32 %v6113_v14, %v2532_v42  ;;  %v2535_v59 = vld [vmem:[#allocation3 + $0x69] sm:$0xff]  ;;  %v2565_v13 = vmax.f32 %v2501_v28, %v2533_v22  ;;  %2006 = vst.msk [vmem:[#allocation2 + $0x152] sm:$0xff] %vm673_vm2, %v1531_v32  ;;  %v2594_v36 = vld [vmem:[#allocation3 + $0x32] sm:$0xff]  ;;  %4584 = vmatprep.mubr.msk.bf16.mxu0 %vm673_vm2, %v1549_v63  ;;  %v1469_v18 = vmax.f32 %v6111_v56, %v1437_v7 }
 0x188   : > { %v2534_v19 = vld [vmem:[#allocation3 + $0x61] sm:$0xff]  ;;  %v2536_v38 = vld [vmem:[#allocation3 + $0x79] sm:$0xff]  ;;  %v2567_v21 = vmax.f32 %v2503_v46, %v2535_v59  ;;  %v2596_v14 = vld [vmem:[#allocation3 + $0x4a] sm:$0xff]  ;;  %v2626_v29 = vmax.f32 %v2562_v0, %v2594_v36  ;;  %4585 = vmatmul.mubr.msk.bf16.gmra.mrb[52].mxu0 %vm673_vm2, %v1550_v57 }
 0x189   : > { %v1438_v11 = vld [vmem:[#allocation3 + $0x143] sm:$0xff]  ;;  %v2566_v2 = vmax.f32 %v6119_v17, %v2534_v19  ;;  %v2568_v8 = vmax.f32 %v2504_v40, %v2536_v38  ;;  %v2592_v54 = vld [vmem:[#allocation3 + $0x1a] sm:$0xff]  ;;  %v2597_v12 = vld [vmem:[#allocation3 + $0x52] sm:$0xff]  ;;  %v2628_v52 = vmax.f32 %v2564_v53, %v2596_v14  ;;  %4588 = vmatprep.mubr.msk.bf16.mxu0 %vm673_vm2, %v1551_v48  ;;  %v2129_v53 = vmax.f32 %v5908_v20, %v5932_v45 }
 0x18a   : > { %v2537_v10 = vld [vmem:[#allocation3 + $0x81] sm:$0xff]  ;;  %v6142_v16 = vld [vmem:[#allocation2 + $0xb8] sm:$0xf]  ;;  %v2624_v3 = vmax.f32 %v2560_v44, %v2592_v54  ;;  %v1470_v4 = vmax.f32 %v1406_v47, %v1438_v11  ;;  %v2599_v17 = vld [vmem:[#allocation3 + $0x6a] sm:$0xff]  ;;  %v2629_v46 = vmax.f32 %v2565_v13, %v2597_v12 }
 0x18b   : > { %v1501_v37 = vld [vmem:[#allocation3 + $0x13c] sm:$0xff]  ;;  %v2569_v33 = vmax.f32 %v2505_v9, %v2537_v10  ;;  %v1502_v50 = vld [vmem:[#allocation3 + $0x144] sm:$0xff]  ;;  %v2631_v32 = vmax.f32 %v2567_v21, %v2599_v17  ;;  %v2178_v7 = vld [vmem:[#allocation2 + $0xd0] sm:$0xf] }
 0x18c   : > { %v2593_v27 = vld [vmem:[#allocation3 + $0x22] sm:$0xff]  ;;  %v2595_v35 = vld [vmem:[#allocation3 + $0x3a] sm:$0xff]  ;;  %v1533_v56 = vmax.f32 %v1469_v18, %v1501_v37  ;;  %v1534_v0 = vmax.f32 %v1470_v4, %v1502_v50  ;;  %v2660_v19 = vld [vmem:[#allocation3 + $0x4b] sm:$0xff] }
 0x18d   : > { %v2625_v49 = vmax.f32 %v2561_v6, %v2593_v27  ;;  %v2598_v28 = vld [vmem:[#allocation3 + $0x62] sm:$0xff]  ;;  %v2600_v39 = vld [vmem:[#allocation3 + $0x7a] sm:$0xff]  ;;  %v2627_v30 = vmax.f32 %v2563_v55, %v2595_v35  ;;  %v2663_v59 = vld [vmem:[#allocation3 + $0x6b] sm:$0xff]  ;;  %v2692_v13 = vmax.f32 %v2628_v52, %v2660_v19 }
 0x18e   : > { %v2034_v40 = vld [vmem:[#allocation2 + $0xa0] sm:$0xf]  ;;  %v2630_v61 = vmax.f32 %v2566_v2, %v2598_v28  ;;  %v2632_v5 = vmax.f32 %v2568_v8, %v2600_v39  ;;  %v2658_v47 = vld [vmem:[#allocation3 + $0x33] sm:$0xff]  ;;  %2008 = vst.msk [vmem:[#allocation2 + $0x16a] sm:$0xff] %vm673_vm2, %v1533_v56  ;;  %v1552_v2 = vpack.c.bf16 %v1534_v0, %v1533_v56  ;;  %2009 = vst.msk [vmem:[#allocation2 + $0x172] sm:$0xff] %vm673_vm2, %v1534_v0 }
 0x18f   : > { %v2601_v42 = vld [vmem:[#allocation3 + $0x82] sm:$0xff]  ;;  %v2661_v63 = vld [vmem:[#allocation3 + $0x53] sm:$0xff]  ;;  %v2690_v38 = vmax.f32 %v2626_v29, %v2658_v47  ;;  %v2130_v27 = vmax.f32 %v2034_v40, %v6142_v16  ;;  %v2225_v29 = vmax.f32 %v2129_v53, %v6005_v41 }
 0x190   : > { %v2656_v44 = vld [vmem:[#allocation3 + $0x1b] sm:$0xff]  ;;  %v2657_v6 = vld [vmem:[#allocation3 + $0x23] sm:$0xff]  ;;  %v2633_v9 = vmax.f32 %v2569_v33, %v2601_v42  ;;  %v2693_v21 = vmax.f32 %v2629_v46, %v2661_v63  ;;  %v2695_v33 = vmax.f32 %v2631_v32, %v2663_v59  ;;  %v2724_v17 = vld [vmem:[#allocation3 + $0x4c] sm:$0xff]  ;;  %4589 = vmatmul.mubr.msk.bf16.gmra.mrb[56].mxu0 %vm673_vm2, %v1552_v2 }
 0x191   : > { %v2659_v22 = vld [vmem:[#allocation3 + $0x3b] sm:$0xff]  ;;  %v2688_v43 = vmax.f32 %v2624_v3, %v2656_v44  ;;  %v2689_v55 = vmax.f32 %v2625_v49, %v2657_v6  ;;  %v2662_v11 = vld [vmem:[#allocation3 + $0x63] sm:$0xff]  ;;  %v2226_v56 = vmax.f32 %v2130_v27, %v2178_v7  ;;  %v2727_v40 = vld [vmem:[#allocation3 + $0x6c] sm:$0xff]  ;;  %v6164_v32 = vmax.f32 %v2692_v13, %v2724_v17 }
 0x192   : > { %v2691_v10 = vmax.f32 %v2627_v30, %v2659_v22  ;;  %v6150_v57 = vld [vmem:[#allocation2 + $0x1b8] sm:$0xff]  ;;  %v2665_v37 = vld [vmem:[#allocation3 + $0x83] sm:$0xff]  ;;  %v2694_v8 = vmax.f32 %v2630_v61, %v2662_v11  ;;  %v2321_v6 = vmax.f32 %v2225_v29, %v6047_v26  ;;  %v2085_v59 = vld [vmem:[#allocation2 + $0xd0] sm:$0xf]  ;;  %v2132_v27 = vmax.f32 %v5932_v45, %v6005_v41 }
 0x193   : > { %v2664_v48 = vld [vmem:[#allocation3 + $0x7b] sm:$0xff]  ;;  %v6153_v20 = vld [vmem:[#allocation2 + $0xe8] sm:$0xf]  ;;  %v2697_v35 = vmax.f32 %v2633_v9, %v2665_v37  ;;  %v6173_v9 = vmax.f32 %v2695_v33, %v2727_v40  ;;  %v1104_v53 = vmax.f32 %v6072_v34, %v6150_v57  ;;  %3050 = vst.msk [vmem:[#allocation2 + $0x7a] sm:$0xff] %vm673_vm2, %v6164_v32  ;;  %v6215_v37 = vld [vmem:[#allocation2 + $0x1d0] sm:$0xff] }
 0x194   : > { %v2720_v54 = vld [vmem:[#allocation3 + $0x1c] sm:$0xff]  ;;  %v2696_v50 = vmax.f32 %v2632_v5, %v2664_v48  ;;  %v2721_v14 = vld [vmem:[#allocation3 + $0x24] sm:$0xff]  ;;  %v2722_v12 = vld [vmem:[#allocation3 + $0x34] sm:$0xff]  ;;  %v2228_v45 = vmax.f32 %v2132_v27, %v6047_v26 }
 0x195   : > { %v6155_v36 = vld [vmem:[#allocation2 + $0xf8] sm:$0xff]  ;;  %v2752_v49 = vmax.f32 %v2688_v43, %v2720_v54  ;;  %v6162_v28 = vld [vmem:[#allocation2 + $0x28] sm:$0xf]  ;;  %v2753_v30 = vmax.f32 %v2689_v55, %v2721_v14  ;;  %v2754_v52 = vmax.f32 %v2690_v38, %v2722_v12  ;;  %v6182_v19 = vld [vmem:[#allocation2 + $0x40] sm:$0xf]  ;;  %v2322_v38 = vmax.f32 %v2226_v56, %v6153_v20  ;;  %3053 = vst.msk [vmem:[#allocation2 + $0x9a] sm:$0xff] %vm673_vm2, %v6173_v9 }
 0x196   : > { %v6157_v18 = vld [vmem:[#allocation2 + $0x38] sm:$0xff]  ;;  %v2726_v39 = vld [vmem:[#allocation3 + $0x64] sm:$0xff]  ;;  %v2370_v43 = vld [vmem:[#allocation2 + $0x100] sm:$0xf]  ;;  %v2417_v13 = vmax.f32 %v2321_v6, %v6155_v36 }
 0x197   : > { %v2723_v3 = vld [vmem:[#allocation3 + $0x3c] sm:$0xff]  ;;  %v2725_v16 = vld [vmem:[#allocation3 + $0x54] sm:$0xff]  ;;  %v2729_v61 = vld [vmem:[#allocation3 + $0x84] sm:$0xff]  ;;  %v6168_v44 = vmax.f32 %v2694_v8, %v2726_v39  ;;  %3046 = vst.msk [vmem:[#allocation2 + $0x4a] sm:$0xff] %vm673_vm2, %v2752_v49  ;;  %v2783_v22 = vpack.c.bf16 %v2753_v30, %v2752_v49  ;;  %v2418_v33 = vmax.f32 %v2322_v38, %v2370_v43  ;;  %v2128_v49 = vmax.f32 %v5906_v60, %v5930_v58 }
 0x198   : > { %v6160_v4 = vld [vmem:[#allocation2 + $0x1b8] sm:$0xff]  ;;  %v2755_v46 = vmax.f32 %v2691_v10, %v2723_v3  ;;  %v6166_v5 = vmax.f32 %v2693_v21, %v2725_v16  ;;  %v960_v0 = vld [vmem:[#allocation2 + $0x1a8] sm:$0xf]  ;;  %v6177_v7 = vmax.f32 %v2697_v35, %v2729_v61  ;;  %3047 = vst.msk [vmem:[#allocation2 + $0x52] sm:$0xff] %vm673_vm2, %v2753_v30  ;;  %3048 = vst.msk [vmem:[#allocation2 + $0x62] sm:$0xff] %vm673_vm2, %v2754_v52 }
 0x199   : > { %v2728_v42 = vld [vmem:[#allocation3 + $0x7c] sm:$0xff]  ;;  %v1008_v55 = vmax.f32 %v912_v62, %v960_v0  ;;  %v2037_v63 = vld [vmem:[#allocation2 + $0xb8] sm:$0xf]  ;;  %3052 = vst.msk [vmem:[#allocation2 + $0x92] sm:$0xff] %vm673_vm2, %v6168_v44  ;;  %4633 = vmatmul.mubr.msk.bf16.vlgmr.msra.gmra.mrb[16].mxu1 %vm673_vm2, %v2783_v22  ;;  %v1198_v2 = vmax.f32 %v1101_v24, %v6160_v4  ;;  %v3177_v21 = vmax.f32 %v6162_v28, %v6182_v19  ;;  %v6223_v54 = vld [vmem:[#allocation2 + $0x128] sm:$0xff] }
 0x19a   : > { %v6175_v47 = vmax.f32 %v2696_v50, %v2728_v42  ;;  %3049 = vst.msk [vmem:[#allocation2 + $0x6a] sm:$0xff] %vm673_vm2, %v2755_v46  ;;  %3051 = vst.msk [vmem:[#allocation2 + $0x82] sm:$0xff] %vm673_vm2, %v6166_v5  ;;  %v2784_v11 = vpack.c.bf16 %v2755_v46, %v2754_v52  ;;  %v6196_v10 = vld [vmem:[#allocation2 + $0x140] sm:$0xff]  ;;  %v6213_v57 = vld [vmem:[#allocation2 + $0x158] sm:$0xff]  ;;  %4665 = vmatpush3.bf16.msra.mxu1 %v6132_v23  ;;  %v2785_v8 = vpack.c.bf16 %v6166_v5, %v6164_v32 }
 0x19b   : > { %v4829_v1 = vld [vmem:[#allocation2 + $0x20] sm:$0xff]  ;;  %3055 = vst.msk [vmem:[#allocation2 + $0xb2] sm:$0xff] %vm673_vm2, %v6177_v7  ;;  %v2181_v25 = vld [vmem:[#allocation2 + $0xe8] sm:$0xf]  ;;  %2465 = vst.msk [vmem:[#allocation3 + $0x98] sm:$0xff] %vm673_vm2, %v2417_v13  ;;  %v2786_v31 = vpack.c.bf16 %v6173_v9, %v6168_v44  ;;  %v2147_v24 = vmax.f32 %v6223_v54, %v6196_v10  ;;  %v2133_v20 = vmax.f32 %v2037_v63, %v2085_v59 }
 0x19c   : > { %v3176_v51 = vmax.f32 %v4829_v1, %v6157_v18  ;;  %v7114_v62 = vld [vmem:[#allocation12_spill] sm:$0xff]  ;;  %3054 = vst.msk [vmem:[#allocation2 + $0xaa] sm:$0xff] %vm673_vm2, %v6175_v47  ;;  %4636 = vmatprep.mubr.msk.bf16.mxu1 %vm673_vm2, %v2784_v11  ;;  %1246 = vst.msk [vmem:[#allocation3 + $0x158] sm:$0xff] %vm673_vm2, %v1198_v2  ;;  %v6231_v23 = vld [vmem:[#allocation2 + $0xe8] sm:$0xf]  ;;  %v2150_v14 = vmax.f32 %v6196_v10, %v6213_v57  ;;  %v1201_v3 = vmax.f32 %v1104_v53, %v6215_v37 }
 0x19d   : > { %v3269_v34 = vmax.f32 %v7114_v62, %v6157_v18  ;;  %v1057_v48 = vld [vmem:[#allocation2 + $0x1c0] sm:$0xf]  ;;  %v1154_v50 = vld [vmem:[#allocation2 + $0x1d8] sm:$0xf]  ;;  %2466 = vst.msk [vmem:[#allocation3 + $0xa0] sm:$0xf] %vm676_vm3, %v2418_v33  ;;  %v6244_v28 = vmax.f32 %v2147_v24, %v6213_v57  ;;  %v2229_v17 = vmax.f32 %v2133_v20, %v2181_v25  ;;  %v2787_v30 = vpack.c.bf16 %v6177_v7, %v6175_v47 }
 0x19e   : > { %v6235_v35 = vld [vmem:[#allocation2 + $0xc0] sm:$0xff]  ;;  %v1105_v12 = vmax.f32 %v1008_v55, %v1057_v48  ;;  %v2040_v29 = vld [vmem:[#allocation2 + $0xd0] sm:$0xf]  ;;  %1249 = vst.msk [vmem:[#allocation3 + $0x170] sm:$0xff] %vm673_vm2, %v1201_v3  ;;  %v2135_v60 = vmax.f32 %v6005_v41, %v6047_v26  ;;  %v2373_v19 = vld [vmem:[#allocation2 + $0x118] sm:$0xf]  ;;  %v2324_v41 = vmax.f32 %v2228_v45, %v6155_v36 }
 0x19f   : > { %v2277_v16 = vld [vmem:[#allocation2 + $0x100] sm:$0xf]  ;;  %v6247_v39 = vld [vmem:[#allocation2 + $0x110] sm:$0xff]  ;;  %v3225_v56 = vld [vmem:[#allocation2 + $0x58] sm:$0xf]  ;;  %v2136_v42 = vmax.f32 %v2040_v29, %v6231_v23  ;;  %v6256_v61 = vmax.f32 %v2128_v49, %v6235_v35 }
 0x1a0   : > { %v3086_v52 = vld [vmem:[#allocation2 + $0x50] sm:$0xff]  ;;  %v1202_v40 = vmax.f32 %v1105_v12, %v1154_v50  ;;  %v3273_v0 = vmax.f32 %v3177_v21, %v3225_v56  ;;  %v3084_v22 = vld [vmem:[#allocation2 + $0x40] sm:$0xf]  ;;  %v3326_v43 = vld [vmem:[#allocation2 + $0x98] sm:$0xff]  ;;  %v2325_v11 = vmax.f32 %v2229_v17, %v2277_v16  ;;  %v2231_v59 = vmax.f32 %v2135_v60, %v6155_v36 }
 0x1a1   : > { %v3134_v46 = vld [vmem:[#allocation2 + $0x68] sm:$0xff]  ;;  %v3179_v32 = vmax.f32 %v6157_v18, %v3086_v52  ;;  %v3230_v44 = vld [vmem:[#allocation2 + $0x80] sm:$0xff]  ;;  %v3272_v6 = vmax.f32 %v3176_v51, %v3086_v52  ;;  %v3321_v9 = vld [vmem:[#allocation2 + $0x70] sm:$0xf]  ;;  %v3365_v55 = vmax.f32 %v3269_v34, %v3086_v52  ;;  %4637 = vmatmul.mubr.msk.bf16.gmra.mrb[20].mxu1 %vm673_vm2, %v2785_v8  ;;  %v2420_v23 = vmax.f32 %v2324_v41, %v6247_v39 }
 0x1a2   : > { %v3182_v5 = vmax.f32 %v3086_v52, %v3134_v46  ;;  %v3417_v53 = vld [vmem:[#allocation2 + $0x88] sm:$0xf]  ;;  %v3132_v63 = vld [vmem:[#allocation2 + $0x58] sm:$0xf]  ;;  %1250 = vst.msk [vmem:[#allocation3 + $0x178] sm:$0xf] %vm676_vm3, %v1202_v40  ;;  %v3369_v62 = vmax.f32 %v3273_v0, %v3321_v9  ;;  %4640 = vmatprep.mubr.msk.bf16.mxu1 %vm673_vm2, %v2786_v31  ;;  %v2421_v27 = vmax.f32 %v2325_v11, %v2373_v19 }
 0x1a3   : > { %v3275_v38 = vmax.f32 %v3179_v32, %v3134_v46  ;;  %v3368_v1 = vmax.f32 %v3272_v6, %v3134_v46  ;;  %v3228_v51 = vld [vmem:[#allocation2 + $0x70] sm:$0xf]  ;;  %v2184_v2 = vld [vmem:[#allocation2 + $0x100] sm:$0xf]  ;;  %v6265_v34 = vld [vmem:[#allocation2 + $0x118] sm:$0xf]  ;;  %v3461_v21 = vmax.f32 %v3365_v55, %v3134_v46  ;;  %v3180_v33 = vmax.f32 %v3084_v22, %v3132_v63 }
 0x1a4   : > { %v3278_v18 = vmax.f32 %v3182_v5, %v3230_v44  ;;  %v6263_v13 = vld [vmem:[#allocation2 + $0x170] sm:$0xff]  ;;  %v3324_v25 = vld [vmem:[#allocation2 + $0x88] sm:$0xf]  ;;  %v3465_v3 = vmax.f32 %v3369_v62, %v3417_v53  ;;  %v3087_v8 = vld [vmem:[#allocation2 + $0x58] sm:$0xf]  ;;  %2468 = vst.msk [vmem:[#allocation3 + $0xb0] sm:$0xff] %vm673_vm2, %v2420_v23  ;;  %v2232_v31 = vmax.f32 %v2136_v42, %v2184_v2  ;;  %v2320_v52 = vmax.f32 %v6256_v61, %v6035_v15 }
 0x1a5   : > { %v3422_v48 = vld [vmem:[#allocation2 + $0xb0] sm:$0xff]  ;;  %v3371_v20 = vmax.f32 %v3275_v38, %v3230_v44  ;;  %v3464_v12 = vmax.f32 %v3368_v1, %v3230_v44  ;;  %v3231_v49 = vld [vmem:[#allocation2 + $0x88] sm:$0xf]  ;;  %v2507_v29 = vld [vmem:[#allocation3 + $0x98] sm:$0xff]  ;;  %3509 = vst.msk [vmem:[#allocation3 + $0x8] sm:$0xff] %vm673_vm2, %v3461_v21  ;;  %v3276_v45 = vmax.f32 %v3180_v33, %v3228_v51  ;;  %v2327_v6 = vmax.f32 %v2231_v59, %v6247_v39 }
 0x1a6   : > { %v3135_v24 = vld [vmem:[#allocation2 + $0x70] sm:$0xf]  ;;  %v3374_v50 = vmax.f32 %v3278_v18, %v3326_v43  ;;  %v2539_v16 = vld [vmem:[#allocation3 + $0x99] sm:$0xff]  ;;  %2469 = vst.msk [vmem:[#allocation3 + $0xb8] sm:$0xf] %vm676_vm3, %v2421_v27  ;;  %v2153_v61 = vmax.f32 %v6213_v57, %v6263_v13  ;;  %v2138_v38 = vmax.f32 %v6047_v26, %v6155_v36  ;;  %v2339_v26 = vmax.f32 %v6244_v28, %v6263_v13 }
 0x1a7   : > { %v3183_v17 = vmax.f32 %v3087_v8, %v3135_v24  ;;  %v6274_v46 = vld [vmem:[#allocation2 + $0xf0] sm:$0xff]  ;;  %v3467_v56 = vmax.f32 %v3371_v20, %v3326_v43  ;;  %3513 = vst.msk [vmem:[#allocation3 + $0x28] sm:$0xf] %vm676_vm3, %v3465_v3  ;;  %v3420_v60 = vld [vmem:[#allocation2 + $0xa0] sm:$0xf]  ;;  %v2571_v5 = vmax.f32 %v2507_v29, %v2539_v16  ;;  %v3372_v9 = vmax.f32 %v3276_v45, %v3324_v25  ;;  %v1280_v15 = vld [vmem:[#allocation3 + $0x158] sm:$0xff] }
 0x1a8   : > { %v3470_v40 = vmax.f32 %v3374_v50, %v3422_v48  ;;  %3512 = vst.msk [vmem:[#allocation3 + $0x20] sm:$0xff] %vm673_vm2, %v3464_v12  ;;  %v3327_v32 = vld [vmem:[#allocation2 + $0xa0] sm:$0xf]  ;;  %v1279_v44 = vld [vmem:[#allocation3 + $0x150] sm:$0xff]  ;;  %v3423_v22 = vld [vmem:[#allocation2 + $0xb8] sm:$0xf]  ;;  %v2328_v43 = vmax.f32 %v2232_v31, %v6265_v34  ;;  %v2416_v11 = vmax.f32 %v2320_v52, %v6274_v46  ;;  %v2423_v59 = vmax.f32 %v2327_v6, %v6223_v54 }
 0x1a9   : > { %v2376_v0 = vld [vmem:[#allocation2 + $0x130] sm:$0xf]  ;;  %v3279_v42 = vmax.f32 %v3183_v17, %v3231_v49  ;;  %v2603_v19 = vld [vmem:[#allocation3 + $0x9a] sm:$0xff]  ;;  %3515 = vst.msk [vmem:[#allocation3 + $0x38] sm:$0xff] %vm673_vm2, %v3467_v56  ;;  %v3138_v53 = vld [vmem:[#allocation2 + $0x88] sm:$0xf]  ;;  %v3468_v18 = vmax.f32 %v3372_v9, %v3420_v60  ;;  %v6292_v48 = vmax.f32 %v2150_v14, %v6263_v13  ;;  %4641 = vmatmul.mubr.msk.bf16.gmra.mrb[24].mxu1 %vm673_vm2, %v2787_v30 }
 0x1aa   : > { %3518 = vst.msk [vmem:[#allocation3 + $0x50] sm:$0xff] %vm673_vm2, %v3470_v40  ;;  %v2635_v55 = vmax.f32 %v2571_v5, %v2603_v19  ;;  %v1311_v63 = vld [vmem:[#allocation3 + $0x151] sm:$0xff]  ;;  %v1312_v41 = vld [vmem:[#allocation3 + $0x159] sm:$0xff]  ;;  %v2424_v27 = vmax.f32 %v2328_v43, %v2376_v0  ;;  %2464 = vst.msk [vmem:[#allocation3 + $0x90] sm:$0xff] %vm673_vm2, %v2416_v11  ;;  %v2234_v47 = vmax.f32 %v2138_v38, %v6247_v39 }
 0x1ab   : > { %v3375_v1 = vmax.f32 %v3279_v42, %v3327_v32  ;;  %v2667_v62 = vld [vmem:[#allocation3 + $0x9b] sm:$0xff]  ;;  %v3090_v2 = vld [vmem:[#allocation2 + $0x70] sm:$0xf]  ;;  %v1343_v34 = vmax.f32 %v1279_v44, %v1311_v63  ;;  %v1344_v25 = vmax.f32 %v1280_v15, %v1312_v41  ;;  %2471 = vst.msk [vmem:[#allocation3 + $0xc8] sm:$0xff] %vm673_vm2, %v2423_v59  ;;  %v1281_v49 = vld [vmem:[#allocation3 + $0x168] sm:$0xff]  ;;  %v2131_v56 = vmax.f32 %v5930_v58, %v6235_v35 }
 0x1ac   : > { %v2731_v51 = vld [vmem:[#allocation3 + $0x9c] sm:$0xff]  ;;  %v2699_v21 = vmax.f32 %v2635_v55, %v2667_v62  ;;  %v1375_v24 = vld [vmem:[#allocation3 + $0x152] sm:$0xff]  ;;  %3516 = vst.msk [vmem:[#allocation3 + $0x40] sm:$0xf] %vm676_vm3, %v3468_v18  ;;  %v3186_v20 = vmax.f32 %v3090_v2, %v3138_v53  ;;  %2472 = vst.msk [vmem:[#allocation3 + $0xd0] sm:$0xf] %vm676_vm3, %v2424_v27  ;;  %v2141_v40 = vmax.f32 %v6155_v36, %v6247_v39 }
 0x1ad   : > { %v3234_v33 = vld [vmem:[#allocation2 + $0xa0] sm:$0xf]  ;;  %v3471_v14 = vmax.f32 %v3375_v1, %v3423_v22  ;;  %v1407_v50 = vmax.f32 %v1343_v34, %v1375_v24  ;;  %v1439_v12 = vld [vmem:[#allocation3 + $0x153] sm:$0xff]  ;;  %v6320_v44 = vld [vmem:[#allocation2 + $0xe8] sm:$0xf]  ;;  %v2330_v42 = vmax.f32 %v2234_v47, %v6223_v54 }
 0x1ae   : > { %v1376_v23 = vld [vmem:[#allocation3 + $0x15a] sm:$0xff]  ;;  %v6308_v7 = vmax.f32 %v2699_v21, %v2731_v51  ;;  %v2509_v16 = vld [vmem:[#allocation3 + $0xb0] sm:$0xff]  ;;  %v6318_v60 = vmax.f32 %v3186_v20, %v3234_v33  ;;  %v3093_v0 = vld [vmem:[#allocation2 + $0x88] sm:$0xf]  ;;  %v2237_v63 = vmax.f32 %v2141_v40, %v6223_v54 }
 0x1af   : > { %v1440_v3 = vld [vmem:[#allocation3 + $0x15b] sm:$0xff]  ;;  %v1408_v45 = vmax.f32 %v1344_v25, %v1376_v23  ;;  %v2541_v31 = vld [vmem:[#allocation3 + $0xb1] sm:$0xff]  ;;  %3519 = vst.msk [vmem:[#allocation3 + $0x58] sm:$0xf] %vm676_vm3, %v3471_v14  ;;  %v1471_v32 = vmax.f32 %v1407_v50, %v1439_v12  ;;  %v1313_v9 = vld [vmem:[#allocation3 + $0x169] sm:$0xff]  ;;  %v2426_v62 = vmax.f32 %v2330_v42, %v6196_v10 }
 0x1b0   : > { %v6303_v8 = vld [vmem:[#allocation2 + $0xa0] sm:$0xf]  ;;  %v6310_v30 = vld [vmem:[#allocation2 + $0xb8] sm:$0xf]  ;;  %v1282_v52 = vld [vmem:[#allocation3 + $0x170] sm:$0xff]  ;;  %v2573_v6 = vmax.f32 %v2509_v16, %v2541_v31  ;;  %3057 = vst.msk [vmem:[#allocation2 + $0xca] sm:$0xff] %vm673_vm2, %v6308_v7  ;;  %v1345_v55 = vmax.f32 %v1281_v49, %v1313_v9  ;;  %v2333_v27 = vmax.f32 %v2237_v63, %v6196_v10  ;;  %v2144_v49 = vmax.f32 %v6247_v39, %v6223_v54 }
 0x1b1   : > { %v6305_v29 = vld [vmem:[#allocation2 + $0x100] sm:$0xf]  ;;  %v1503_v17 = vld [vmem:[#allocation3 + $0x154] sm:$0xff]  ;;  %v1472_v22 = vmax.f32 %v1408_v45, %v1440_v3  ;;  %v3189_v36 = vmax.f32 %v3093_v0, %v6303_v8  ;;  %v1377_v18 = vld [vmem:[#allocation3 + $0x16a] sm:$0xff]  ;;  %v3378_v14 = vmax.f32 %v6318_v60, %v6310_v30  ;;  %2474 = vst.msk [vmem:[#allocation3 + $0xe0] sm:$0xff] %vm673_vm2, %v2426_v62 }
 0x1b2   : > { %v1504_v5 = vld [vmem:[#allocation3 + $0x15c] sm:$0xff]  ;;  %v2605_v19 = vld [vmem:[#allocation3 + $0xb2] sm:$0xff]  ;;  %v1535_v41 = vmax.f32 %v1471_v32, %v1503_v17  ;;  %v1409_v34 = vmax.f32 %v1345_v55, %v1377_v18  ;;  %v2139_v23 = vmax.f32 %v6320_v44, %v6305_v29  ;;  %v2511_v3 = vld [vmem:[#allocation3 + $0xc8] sm:$0xff]  ;;  %v2429_v31 = vmax.f32 %v2333_v27, %v6213_v57 }
 0x1b3   : > { %v3237_v15 = vld [vmem:[#allocation2 + $0xb8] sm:$0xf]  ;;  %v2637_v11 = vmax.f32 %v2573_v6, %v2605_v19  ;;  %v1536_v51 = vmax.f32 %v1472_v22, %v1504_v5  ;;  %v1441_v21 = vld [vmem:[#allocation3 + $0x16b] sm:$0xff]  ;;  %v6330_v25 = vld [vmem:[#allocation2 + $0x100] sm:$0xf] }
 0x1b4   : > { %v1314_v43 = vld [vmem:[#allocation3 + $0x171] sm:$0xff]  ;;  %2010 = vst.msk [vmem:[#allocation2 + $0x182] sm:$0xff] %vm673_vm2, %v1535_v41  ;;  %v1473_v29 = vmax.f32 %v1409_v34, %v1441_v21  ;;  %v3096_v30 = vld [vmem:[#allocation2 + $0xa0] sm:$0xf]  ;;  %v6347_v40 = vmax.f32 %v3189_v36, %v3237_v15  ;;  %v2543_v32 = vld [vmem:[#allocation3 + $0xc9] sm:$0xff] }
 0x1b5   : > { %v6326_v53 = vld [vmem:[#allocation2 + $0x118] sm:$0xf]  ;;  %v1346_v38 = vmax.f32 %v1282_v52, %v1314_v43  ;;  %v2506_v12 = vld [vmem:[#allocation3 + $0x90] sm:$0xff]  ;;  %v1553_v47 = vpack.c.bf16 %v1536_v51, %v1535_v41  ;;  %2011 = vst.msk [vmem:[#allocation2 + $0x18a] sm:$0xff] %vm673_vm2, %v1536_v51  ;;  %v2575_v0 = vmax.f32 %v2511_v3, %v2543_v32  ;;  %2477 = vst.msk [vmem:[#allocation3 + $0xf8] sm:$0xff] %vm673_vm2, %v2429_v31 }
 0x1b6   : > { %v2669_v59 = vld [vmem:[#allocation3 + $0xb3] sm:$0xff]  ;;  %v2142_v54 = vmax.f32 %v6330_v25, %v6326_v53  ;;  %v2607_v9 = vld [vmem:[#allocation3 + $0xca] sm:$0xff] }
 0x1b7   : > { %v1378_v1 = vld [vmem:[#allocation3 + $0x172] sm:$0xff]  ;;  %v2701_v20 = vmax.f32 %v2637_v11, %v2669_v59  ;;  %4592 = vmatprep.mubr.msk.bf16.mxu0 %vm673_vm2, %v1553_v47  ;;  %v6367_v59 = vmax.f32 %v2144_v49, %v6196_v10  ;;  %v2639_v18 = vmax.f32 %v2575_v0, %v2607_v9  ;;  %v6370_v51 = vld [vmem:[#allocation2 + $0x108] sm:$0xff] }
 0x1b8   : > { %v2733_v2 = vld [vmem:[#allocation3 + $0xb4] sm:$0xff]  ;;  %v1410_v50 = vmax.f32 %v1346_v38, %v1378_v1  ;;  %v1505_v45 = vld [vmem:[#allocation3 + $0x16c] sm:$0xff] }
 0x1b9   : > { %v1442_v33 = vld [vmem:[#allocation3 + $0x173] sm:$0xff]  ;;  %v6345_v52 = vmax.f32 %v2701_v20, %v2733_v2  ;;  %v1537_v6 = vmax.f32 %v1473_v29, %v1505_v45  ;;  %v2379_v2 = vld [vmem:[#allocation2 + $0x148] sm:$0xf] }
 0x1ba   : > { %v6332_v24 = vld [vmem:[#allocation2 + $0xb8] sm:$0xf]  ;;  %v1474_v60 = vmax.f32 %v1410_v50, %v1442_v33  ;;  %v6351_v39 = vld [vmem:[#allocation2 + $0xf0] sm:$0xff]  ;;  %v2395_v25 = vld [vmem:[#allocation2 + $0x1c8] sm:$0xff] }
 0x1bb   : > { %v2538_v8 = vld [vmem:[#allocation3 + $0x91] sm:$0xff]  ;;  %v3192_v22 = vmax.f32 %v3096_v30, %v6332_v24  ;;  %3059 = vst.msk [vmem:[#allocation2 + $0xe2] sm:$0xff] %vm673_vm2, %v6345_v52  ;;  %2012 = vst.msk [vmem:[#allocation2 + $0x19a] sm:$0xff] %vm673_vm2, %v1537_v6  ;;  %v6381_v27 = vld [vmem:[#allocation2 + $0x180] sm:$0xff] }
 0x1bc   : > { %v1506_v17 = vld [vmem:[#allocation3 + $0x174] sm:$0xff]  ;;  %v2570_v16 = vmax.f32 %v2506_v12, %v2538_v8  ;;  %v3426_v15 = vld [vmem:[#allocation2 + $0xd0] sm:$0xf]  ;;  %v2108_v3 = vld [vmem:[#allocation2 + $0x188] sm:$0xff] }
 0x1bd   : > { %v2602_v5 = vld [vmem:[#allocation3 + $0x92] sm:$0xff]  ;;  %v1538_v55 = vmax.f32 %v1474_v60, %v1506_v17  ;;  %v3474_v38 = vmax.f32 %v3378_v14, %v3426_v15  ;;  %v2342_v30 = vmax.f32 %v6292_v48, %v2108_v3  ;;  %v2435_v31 = vmax.f32 %v2339_v26, %v2108_v3 }
 0x1be   : > { %v2666_v44 = vld [vmem:[#allocation3 + $0x93] sm:$0xff]  ;;  %v2634_v42 = vmax.f32 %v2570_v16, %v2602_v5  ;;  %v2671_v10 = vld [vmem:[#allocation3 + $0xcb] sm:$0xff]  ;;  %v2156_v16 = vmax.f32 %v6263_v13, %v2108_v3 }
 0x1bf   : > { %v6355_v19 = vld [vmem:[#allocation2 + $0xd8] sm:$0xff]  ;;  %v6360_v43 = vld [vmem:[#allocation2 + $0xd0] sm:$0xf]  ;;  %2013 = vst.msk [vmem:[#allocation2 + $0x1a2] sm:$0xff] %vm673_vm2, %v1538_v55  ;;  %v2703_v14 = vmax.f32 %v2639_v18, %v2671_v10  ;;  %v7116_v5 = vld [vmem:[#allocation5_spill] sm:$0xff]  ;;  %v2336_v18 = vmax.f32 %v6367_v59, %v6213_v57 }
 0x1c0   : > { %v2187_v36 = vld [vmem:[#allocation2 + $0x118] sm:$0xf]  ;;  %v3240_v63 = vld [vmem:[#allocation2 + $0xd0] sm:$0xf]  ;;  %v2227_v41 = vmax.f32 %v2131_v56, %v6355_v19  ;;  %v2698_v1 = vmax.f32 %v2634_v42, %v2666_v44  ;;  %v2134_v34 = vmax.f32 %v6235_v35, %v6355_v19  ;;  %v3381_v58 = vmax.f32 %v6347_v40, %v6360_v43  ;;  %3522 = vst.msk [vmem:[#allocation3 + $0x70] sm:$0xf] %vm676_vm3, %v3474_v38 }
 0x1c1   : > { %v2235_v11 = vmax.f32 %v2139_v23, %v2187_v36  ;;  %v2283_v62 = vld [vmem:[#allocation2 + $0x130] sm:$0xf]  ;;  %v1554_v56 = vpack.c.bf16 %v1538_v55, %v1537_v6  ;;  %v2730_v21 = vld [vmem:[#allocation3 + $0x94] sm:$0xff]  ;;  %v6379_v23 = vld [vmem:[#allocation2 + $0x168] sm:$0xff]  ;;  %v6383_v35 = vmax.f32 %v3192_v22, %v3240_v63  ;;  %v2137_v17 = vmax.f32 %v6355_v19, %v6351_v39  ;;  %2483 = vst.msk [vmem:[#allocation3 + $0x128] sm:$0xff] %vm673_vm2, %v2435_v31 }
 0x1c2   : > { %v2323_v33 = vmax.f32 %v2227_v41, %v6274_v46  ;;  %v2762_v20 = vmax.f32 %v2698_v1, %v2730_v21  ;;  %v6385_v50 = vld [vmem:[#allocation2 + $0x130] sm:$0xf]  ;;  %v2230_v12 = vmax.f32 %v2134_v34, %v6274_v46  ;;  %v2155_v49 = vmax.f32 %v6379_v23, %v6381_v27  ;;  %v2061_v40 = vld [vmem:[#allocation2 + $0x178] sm:$0xf]  ;;  %v2286_v42 = vld [vmem:[#allocation2 + $0x148] sm:$0xf] }
 0x1c3   : > { %v2331_v24 = vmax.f32 %v2235_v11, %v2283_v62  ;;  %4593 = vmatmul.mubr.msk.bf16.gmra.mrb[60].mxu0 %vm673_vm2, %v1554_v56  ;;  %v2109_v8 = vld [vmem:[#allocation2 + $0x190] sm:$0xf]  ;;  %v2249_v46 = vmax.f32 %v2153_v61, %v2108_v3  ;;  %v7115_v32 = vld [vmem:[#allocation7_spill] sm:$0xff]  ;;  %v6419_v22 = vld [vmem:[#allocation2 + $0x120] sm:$0xff]  ;;  %v2233_v63 = vmax.f32 %v2137_v17, %v6370_v51 }
 0x1c4   : > { %v2419_v47 = vmax.f32 %v2323_v33, %v6370_v51  ;;  %v2190_v45 = vld [vmem:[#allocation2 + $0x130] sm:$0xf]  ;;  %v7117_v44 = vpack.c.bf16 %v7115_v32, %v7116_v5  ;;  %3056 = vst.msk [vmem:[#allocation2 + $0xc2] sm:$0xff] %vm673_vm2, %v2762_v20  ;;  %v2157_v0 = vmax.f32 %v2061_v40, %v2109_v8  ;;  %v2788_v48 = vpack.c.bf16 %v6308_v7, %v2762_v20  ;;  %v2049_v28 = vld [vmem:[#allocation2 + $0x118] sm:$0xf]  ;;  %v2513_v3 = vld [vmem:[#allocation3 + $0xe0] sm:$0xff] }
 0x1c5   : > { %v2427_v29 = vmax.f32 %v2331_v24, %v2379_v2  ;;  %v2735_v60 = vld [vmem:[#allocation3 + $0xcc] sm:$0xff]  ;;  %v2238_v26 = vmax.f32 %v2142_v54, %v2190_v45  ;;  %v3429_v19 = vld [vmem:[#allocation2 + $0xe8] sm:$0xf]  ;;  %v2301_v36 = vld [vmem:[#allocation2 + $0x1c0] sm:$0xf]  ;;  %v2326_v7 = vmax.f32 %v2230_v12, %v6370_v51  ;;  %v2145_v55 = vmax.f32 %v2049_v28, %v6385_v50 }
 0x1c6   : > { %4598 = vmatprep.mubr.msk.bf16.mxu0 %vm673_vm2, %v7117_v44  ;;  %v6406_v6 = vld [vmem:[#allocation2 + $0xd0] sm:$0xf]  ;;  %v6411_v61 = vmax.f32 %v2703_v14, %v2735_v60  ;;  %2467 = vst.msk [vmem:[#allocation3 + $0xa8] sm:$0xff] %vm673_vm2, %v2419_v47  ;;  %v6422_v15 = vld [vmem:[#allocation2 + $0xe8] sm:$0xf]  ;;  %v3477_v41 = vmax.f32 %v3381_v58, %v3429_v19  ;;  %v6429_v53 = vld [vmem:[#allocation2 + $0x198] sm:$0xff]  ;;  %4644 = vmatprep.mubr.msk.bf16.mxu1 %vm673_vm2, %v2788_v48 }
 0x1c7   : > { %v6409_v9 = vld [vmem:[#allocation2 + $0x1b0] sm:$0xff]  ;;  %2475 = vst.msk [vmem:[#allocation3 + $0xe8] sm:$0xf] %vm676_vm3, %v2427_v29  ;;  %v6424_v43 = vld [vmem:[#allocation2 + $0xb8] sm:$0xf]  ;;  %v3384_v54 = vmax.f32 %v6383_v35, %v6422_v15  ;;  %v2204_v1 = vld [vmem:[#allocation2 + $0x1a0] sm:$0xff]  ;;  %v2251_v2 = vmax.f32 %v2155_v49, %v6429_v53  ;;  %v2334_v34 = vmax.f32 %v2238_v26, %v2286_v42  ;;  %v2422_v58 = vmax.f32 %v2326_v7, %v6419_v22 }
 0x1c8   : > { %3061 = vst.msk [vmem:[#allocation2 + $0xfa] sm:$0xff] %vm673_vm2, %v6411_v61  ;;  %v3195_v11 = vmax.f32 %v6424_v43, %v6406_v6  ;;  %v2382_v38 = vld [vmem:[#allocation2 + $0x160] sm:$0xf]  ;;  %v2205_v62 = vld [vmem:[#allocation2 + $0x1a8] sm:$0xf]  ;;  %v2329_v10 = vmax.f32 %v2233_v63, %v6419_v22  ;;  %v2252_v21 = vmax.f32 %v2156_v16, %v2204_v1  ;;  %v2345_v24 = vmax.f32 %v2249_v46, %v2204_v1  ;;  %v6444_v12 = vld [vmem:[#allocation2 + $0x138] sm:$0xff] }
 0x1c9   : > { %v2193_v56 = vld [vmem:[#allocation2 + $0x148] sm:$0xf]  ;;  %3525 = vst.msk [vmem:[#allocation3 + $0x88] sm:$0xf] %vm676_vm3, %v3477_v41  ;;  %v2253_v33 = vmax.f32 %v2157_v0, %v2205_v62  ;;  %v2438_v14 = vmax.f32 %v2342_v30, %v2204_v1  ;;  %v2289_v50 = vld [vmem:[#allocation2 + $0x160] sm:$0xf]  ;;  %v2347_v57 = vmax.f32 %v2251_v2, %v6409_v9  ;;  %v2430_v8 = vmax.f32 %v2334_v34, %v2382_v38 }
 0x1ca   : > { %v2100_v20 = vld [vmem:[#allocation2 + $0x148] sm:$0xf]  ;;  %v2397_v59 = vld [vmem:[#allocation2 + $0x1d8] sm:$0xf]  ;;  %2470 = vst.msk [vmem:[#allocation3 + $0xc0] sm:$0xff] %vm673_vm2, %v2422_v58  ;;  %v2241_v49 = vmax.f32 %v2145_v55, %v2193_v56  ;;  %v2425_v47 = vmax.f32 %v2329_v10, %v6444_v12  ;;  %v2348_v29 = vmax.f32 %v2252_v21, %v6160_v4  ;;  %v2441_v17 = vmax.f32 %v2345_v24, %v6160_v4  ;;  %v7118_v16 = vld [vmem:[#allocation6_spill] sm:$0xff] }
 0x1cb   : > { %v2349_v45 = vmax.f32 %v2253_v33, %v2301_v36  ;;  %2486 = vst.msk [vmem:[#allocation3 + $0x140] sm:$0xff] %vm673_vm2, %v2438_v14  ;;  %v7119_v46 = vld [vmem:[#allocation4_spill] sm:$0xff]  ;;  %v2052_v31 = vld [vmem:[#allocation2 + $0x130] sm:$0xf]  ;;  %v2385_v40 = vld [vmem:[#allocation2 + $0x178] sm:$0xf]  ;;  %v2432_v60 = vmax.f32 %v2336_v18, %v6263_v13  ;;  %v2443_v5 = vmax.f32 %v2347_v57, %v2395_v25  ;;  %v2140_v19 = vmax.f32 %v6351_v39, %v6370_v51 }
 0x1cc   : > { %v7120_v30 = vpack.c.bf16 %v7118_v16, %v7119_v46  ;;  %v2196_v32 = vld [vmem:[#allocation2 + $0x160] sm:$0xf]  ;;  %2478 = vst.msk [vmem:[#allocation3 + $0x100] sm:$0xf] %vm676_vm3, %v2430_v8  ;;  %v7121_v28 = vld [vmem:[#allocation13_spill] sm:$0xff]  ;;  %v7122_v4 = vld [vmem:[#allocation10_spill] sm:$0xff]  ;;  %v2337_v42 = vmax.f32 %v2241_v49, %v2289_v50  ;;  %v2148_v36 = vmax.f32 %v2052_v31, %v2100_v20  ;;  %v2444_v13 = vmax.f32 %v2348_v29, %v6215_v37 }
 0x1cd   : > { %v2508_v44 = vld [vmem:[#allocation3 + $0xa8] sm:$0xff]  ;;  %v7123_v26 = vpack.c.bf16 %v7121_v28, %v7122_v4  ;;  %2473 = vst.msk [vmem:[#allocation3 + $0xd8] sm:$0xff] %vm673_vm2, %v2425_v47  ;;  %v2445_v7 = vmax.f32 %v2349_v45, %v2397_v59  ;;  %2489 = vst.msk [vmem:[#allocation3 + $0x158] sm:$0xff] %vm673_vm2, %v2441_v17  ;;  %v6468_v25 = vld [vmem:[#allocation2 + $0x160] sm:$0xf]  ;;  %v2236_v2 = vmax.f32 %v2140_v19, %v6419_v22 }
 0x1ce   : > { %4599 = vmatmul.mubr.msk.bf16.vlgmr.msra.gmra.mrb[32].mxu0 %vm673_vm2, %v7120_v30  ;;  %v2540_v0 = vld [vmem:[#allocation3 + $0xa9] sm:$0xff]  ;;  %v2545_v48 = vld [vmem:[#allocation3 + $0xe1] sm:$0xff]  ;;  %2480 = vst.msk [vmem:[#allocation3 + $0x110] sm:$0xff] %vm673_vm2, %v2432_v60  ;;  %v2292_v38 = vld [vmem:[#allocation2 + $0x178] sm:$0xf]  ;;  %v2433_v39 = vmax.f32 %v2337_v42, %v2385_v40  ;;  %v2244_v37 = vmax.f32 %v2148_v36, %v2196_v32  ;;  %v2143_v34 = vmax.f32 %v6370_v51, %v6419_v22 }
 0x1cf   : > { %4602 = vmatprep.mubr.msk.bf16.mxu0 %vm673_vm2, %v7123_v26  ;;  %v2572_v55 = vmax.f32 %v2508_v44, %v2540_v0  ;;  %v2577_v63 = vmax.f32 %v2513_v3, %v2545_v48  ;;  %v3243_v41 = vld [vmem:[#allocation2 + $0xe8] sm:$0xf]  ;;  %2491 = vst.msk [vmem:[#allocation3 + $0x168] sm:$0xff] %vm673_vm2, %v2443_v5  ;;  %v3432_v18 = vld [vmem:[#allocation2 + $0x100] sm:$0xf]  ;;  %2492 = vst.msk [vmem:[#allocation3 + $0x170] sm:$0xff] %vm673_vm2, %v2444_v13  ;;  %v2332_v20 = vmax.f32 %v2236_v2, %v6444_v12 }
 0x1d0   : > { %v2604_v1 = vld [vmem:[#allocation3 + $0xaa] sm:$0xff]  ;;  %v2609_v62 = vld [vmem:[#allocation3 + $0xe2] sm:$0xff]  ;;  %2493 = vst.msk [vmem:[#allocation3 + $0x178] sm:$0xf] %vm676_vm3, %v2445_v7  ;;  %v3480_v58 = vmax.f32 %v3384_v54, %v3432_v18  ;;  %v6486_v51 = vmax.f32 %v3195_v11, %v3243_v41  ;;  %2481 = vst.msk [vmem:[#allocation3 + $0x118] sm:$0xf] %vm676_vm3, %v2433_v39  ;;  %v2340_v50 = vmax.f32 %v2244_v37, %v2292_v38 }
 0x1d1   : > { %v2636_v56 = vmax.f32 %v2572_v55, %v2604_v1  ;;  %v2641_v10 = vmax.f32 %v2577_v63, %v2609_v62  ;;  %v6479_v21 = vld [vmem:[#allocation2 + $0x148] sm:$0xf]  ;;  %v6481_v33 = vld [vmem:[#allocation2 + $0x150] sm:$0xff]  ;;  %v2510_v57 = vld [vmem:[#allocation3 + $0xc0] sm:$0xff]  ;;  %v2239_v6 = vmax.f32 %v2143_v34, %v6444_v12  ;;  %v2146_v17 = vmax.f32 %v6419_v22, %v6444_v12 }
 0x1d2   : > { %v2668_v24 = vld [vmem:[#allocation3 + $0xab] sm:$0xff]  ;;  %v2673_v14 = vld [vmem:[#allocation3 + $0xe3] sm:$0xff]  ;;  %3528 = vst.msk [vmem:[#allocation3 + $0xa0] sm:$0xf] %vm676_vm3, %v3480_v58  ;;  %v2515_v59 = vld [vmem:[#allocation3 + $0xf8] sm:$0xff]  ;;  %v2151_v8 = vmax.f32 %v6479_v21, %v6468_v25  ;;  %v2428_v29 = vmax.f32 %v2332_v20, %v6481_v33  ;;  %v2149_v44 = vmax.f32 %v6444_v12, %v6481_v33  ;;  %v2152_v12 = vmax.f32 %v6481_v33, %v6379_v23 }
 0x1d3   : > { %v2388_v35 = vld [vmem:[#allocation2 + $0x190] sm:$0xf]  ;;  %v2700_v15 = vmax.f32 %v2636_v56, %v2668_v24  ;;  %v2705_v54 = vmax.f32 %v2641_v10, %v2673_v14  ;;  %v2542_v3 = vld [vmem:[#allocation3 + $0xc1] sm:$0xff]  ;;  %v2547_v30 = vld [vmem:[#allocation3 + $0xf9] sm:$0xff]  ;;  %v2335_v5 = vmax.f32 %v2239_v6, %v6481_v33  ;;  %v2242_v36 = vmax.f32 %v2146_v17, %v6481_v33 }
 0x1d4   : > { %v2732_v43 = vld [vmem:[#allocation3 + $0xac] sm:$0xff]  ;;  %v2737_v11 = vld [vmem:[#allocation3 + $0xe4] sm:$0xff]  ;;  %v6494_v49 = vld [vmem:[#allocation2 + $0x100] sm:$0xf]  ;;  %v2574_v47 = vmax.f32 %v2510_v57, %v2542_v3  ;;  %v2436_v45 = vmax.f32 %v2340_v50, %v2388_v35  ;;  %v2579_v0 = vmax.f32 %v2515_v59, %v2547_v30  ;;  %2476 = vst.msk [vmem:[#allocation3 + $0xf0] sm:$0xff] %vm673_vm2, %v2428_v29  ;;  %v2245_v38 = vmax.f32 %v2149_v44, %v6379_v23 }
 0x1d5   : > { %v2764_v16 = vmax.f32 %v2700_v15, %v2732_v43  ;;  %v6499_v46 = vmax.f32 %v2705_v54, %v2737_v11  ;;  %v2606_v31 = vld [vmem:[#allocation3 + $0xc2] sm:$0xff]  ;;  %v7124_v40 = vld [vmem:[#allocation11_spill] sm:$0xff]  ;;  %v7128_v42 = vld [vmem:[#allocation18_spill] sm:$0xff]  ;;  %v3387_v7 = vmax.f32 %v6486_v51, %v6494_v49  ;;  %v2431_v25 = vmax.f32 %v2335_v5, %v6379_v23 }
 0x1d6   : > { %v7125_v60 = vld [vmem:[#allocation8_spill] sm:$0xff]  ;;  %v2638_v48 = vmax.f32 %v2574_v47, %v2606_v31  ;;  %v2512_v4 = vld [vmem:[#allocation3 + $0xd8] sm:$0xff]  ;;  %2484 = vst.msk [vmem:[#allocation3 + $0x130] sm:$0xf] %vm676_vm3, %v2436_v45  ;;  %v2517_v63 = vld [vmem:[#allocation3 + $0x110] sm:$0xff]  ;;  %v2338_v34 = vmax.f32 %v2242_v36, %v6379_v23  ;;  %v2341_v24 = vmax.f32 %v2245_v38, %v6381_v27  ;;  %v2248_v20 = vmax.f32 %v2152_v12, %v6381_v27 }
 0x1d7   : > { %v7126_v32 = vpack.c.bf16 %v7124_v40, %v7125_v60  ;;  %v2670_v28 = vld [vmem:[#allocation3 + $0xc3] sm:$0xff]  ;;  %v2789_v13 = vpack.c.bf16 %v6345_v52, %v2764_v16  ;;  %3063 = vst.msk [vmem:[#allocation2 + $0x112] sm:$0xff] %vm673_vm2, %v6499_v46  ;;  %v2611_v55 = vld [vmem:[#allocation3 + $0xfa] sm:$0xff]  ;;  %3058 = vst.msk [vmem:[#allocation2 + $0xda] sm:$0xff] %vm673_vm2, %v2764_v16 }
 0x1d8   : > { %v6508_v22 = vld [vmem:[#allocation2 + $0x160] sm:$0xf]  ;;  %v2643_v18 = vmax.f32 %v2579_v0, %v2611_v55  ;;  %v2702_v1 = vmax.f32 %v2638_v48, %v2670_v28  ;;  %v2734_v62 = vld [vmem:[#allocation3 + $0xc4] sm:$0xff]  ;;  %v2106_v2 = vld [vmem:[#allocation2 + $0x178] sm:$0xf]  ;;  %2479 = vst.msk [vmem:[#allocation3 + $0x108] sm:$0xff] %vm673_vm2, %v2431_v25  ;;  %v2434_v29 = vmax.f32 %v2338_v34, %v6381_v27  ;;  %v2437_v45 = vmax.f32 %v2341_v24, %v6429_v53 }
 0x1d9   : > { %4603 = vmatmul.mubr.msk.bf16.gmra.mrb[36].mxu0 %vm673_vm2, %v7126_v32  ;;  %v7127_v26 = vld [vmem:[#allocation20_spill] sm:$0xff]  ;;  %v3150_v39 = vld [vmem:[#allocation2 + $0xe8] sm:$0xf]  ;;  %v2199_v37 = vld [vmem:[#allocation2 + $0x178] sm:$0xf]  ;;  %4645 = vmatmul.mubr.msk.bf16.gmra.mrb[28].mxu1 %vm673_vm2, %v2789_v13  ;;  %v2154_v14 = vmax.f32 %v6508_v22, %v2106_v2  ;;  %v2344_v16 = vmax.f32 %v2248_v20, %v6429_v53 }
 0x1da   : > { %v7129_v19 = vpack.c.bf16 %v7127_v26, %v7128_v42  ;;  %v2544_v41 = vld [vmem:[#allocation3 + $0xd9] sm:$0xff]  ;;  %v2549_v56 = vld [vmem:[#allocation3 + $0x111] sm:$0xff]  ;;  %v6529_v21 = vld [vmem:[#allocation3 + $0x128] sm:$0xff]  ;;  %v2247_v33 = vmax.f32 %v2151_v8, %v2199_v37  ;;  %v2766_v15 = vmax.f32 %v2702_v1, %v2734_v62  ;;  %2482 = vst.msk [vmem:[#allocation3 + $0x120] sm:$0xff] %vm673_vm2, %v2434_v29 }
 0x1db   : > { %v2576_v52 = vmax.f32 %v2512_v4, %v2544_v41  ;;  %v2675_v58 = vld [vmem:[#allocation3 + $0xfb] sm:$0xff]  ;;  %v3102_v23 = vld [vmem:[#allocation2 + $0xd0] sm:$0xf]  ;;  %v2581_v57 = vmax.f32 %v2517_v63, %v2549_v56  ;;  %v2391_v43 = vld [vmem:[#allocation2 + $0x1a8] sm:$0xf]  ;;  %2485 = vst.msk [vmem:[#allocation3 + $0x138] sm:$0xff] %vm673_vm2, %v2437_v45 }
 0x1dc   : > { %4606 = vmatprep.mubr.msk.bf16.mxu0 %vm673_vm2, %v7129_v19  ;;  %v2608_v10 = vld [vmem:[#allocation3 + $0xda] sm:$0xff]  ;;  %v2707_v50 = vmax.f32 %v2643_v18, %v2675_v58  ;;  %v2295_v6 = vld [vmem:[#allocation2 + $0x190] sm:$0xf]  ;;  %v2790_v31 = vpack.c.bf16 %v6411_v61, %v2766_v15  ;;  %3060 = vst.msk [vmem:[#allocation2 + $0xf2] sm:$0xff] %vm673_vm2, %v2766_v15  ;;  %v3105_v44 = vld [vmem:[#allocation2 + $0xe8] sm:$0xf]  ;;  %v3198_v48 = vmax.f32 %v3102_v23, %v3150_v39 }
 0x1dd   : > { %v2739_v35 = vld [vmem:[#allocation3 + $0xfc] sm:$0xff]  ;;  %v2640_v59 = vmax.f32 %v2576_v52, %v2608_v10  ;;  %v2613_v8 = vld [vmem:[#allocation3 + $0x112] sm:$0xff]  ;;  %v2343_v47 = vmax.f32 %v2247_v33, %v2295_v6  ;;  %v2298_v0 = vld [vmem:[#allocation2 + $0x1a8] sm:$0xf]  ;;  %v2440_v19 = vmax.f32 %v2344_v16, %v6409_v9 }
 0x1de   : > { %v3246_v54 = vld [vmem:[#allocation2 + $0x100] sm:$0xf]  ;;  %v2202_v17 = vld [vmem:[#allocation2 + $0x190] sm:$0xf]  ;;  %v6540_v30 = vmax.f32 %v2707_v50, %v2739_v35  ;;  %v2645_v40 = vmax.f32 %v2581_v57, %v2613_v8  ;;  %v7130_v53 = vld [vmem:[#allocation19_spill] sm:$0xff]  ;;  %4648 = vmatprep.mubr.msk.bf16.mxu1 %vm673_vm2, %v2790_v31 }
 0x1df   : > { %v6535_v3 = vld [vmem:[#allocation2 + $0x100] sm:$0xf]  ;;  %v2677_v60 = vld [vmem:[#allocation3 + $0x113] sm:$0xff]  ;;  %v2551_v4 = vld [vmem:[#allocation3 + $0x129] sm:$0xff]  ;;  %v2439_v22 = vmax.f32 %v2343_v47, %v2391_v43  ;;  %v2250_v61 = vmax.f32 %v2154_v14, %v2202_v17  ;;  %v3294_v18 = vmax.f32 %v3198_v48, %v3246_v54  ;;  %2488 = vst.msk [vmem:[#allocation3 + $0x150] sm:$0xff] %vm673_vm2, %v2440_v19 }
 0x1e0   : > { %v2672_v11 = vld [vmem:[#allocation3 + $0xdb] sm:$0xff]  ;;  %v2514_v28 = vld [vmem:[#allocation3 + $0xf0] sm:$0xff]  ;;  %v7131_v26 = vld [vmem:[#allocation17_spill] sm:$0xff]  ;;  %3065 = vst.msk [vmem:[#allocation2 + $0x12a] sm:$0xff] %vm673_vm2, %v6540_v30  ;;  %v2709_v12 = vmax.f32 %v2645_v40, %v2677_v60  ;;  %v2583_v41 = vmax.f32 %v6529_v21, %v2551_v4  ;;  %v3201_v9 = vmax.f32 %v3105_v44, %v6535_v3 }
 0x1e1   : > { %v2704_v32 = vmax.f32 %v2640_v59, %v2672_v11  ;;  %v2736_v5 = vld [vmem:[#allocation3 + $0xdc] sm:$0xff]  ;;  %v2546_v27 = vld [vmem:[#allocation3 + $0xf1] sm:$0xff]  ;;  %v7132_v42 = vpack.c.bf16 %v7130_v53, %v7131_v26  ;;  %2487 = vst.msk [vmem:[#allocation3 + $0x148] sm:$0xf] %vm676_vm3, %v2439_v22  ;;  %v2346_v34 = vmax.f32 %v2250_v61, %v2298_v0  ;;  %v2516_v24 = vld [vmem:[#allocation3 + $0x108] sm:$0xff] }
 0x1e2   : > { %v3435_v36 = vld [vmem:[#allocation2 + $0x118] sm:$0xf]  ;;  %v2578_v63 = vmax.f32 %v2514_v28, %v2546_v27  ;;  %v2394_v25 = vld [vmem:[#allocation2 + $0x1c0] sm:$0xf]  ;;  %v2615_v39 = vld [vmem:[#allocation3 + $0x12a] sm:$0xff] }
 0x1e3   : > { %4607 = vmatmul.mubr.msk.bf16.gmra.mrb[40].mxu0 %vm673_vm2, %v7132_v42  ;;  %v2741_v13 = vld [vmem:[#allocation3 + $0x114] sm:$0xff]  ;;  %v2768_v55 = vmax.f32 %v2704_v32, %v2736_v5  ;;  %v3483_v38 = vmax.f32 %v3387_v7, %v3435_v36  ;;  %v7133_v52 = vld [vmem:[#allocation24_spill] sm:$0xff]  ;;  %v2647_v56 = vmax.f32 %v2583_v41, %v2615_v39  ;;  %v2679_v21 = vld [vmem:[#allocation3 + $0x12b] sm:$0xff]  ;;  %v2442_v20 = vmax.f32 %v2346_v34, %v2394_v25 }
 0x1e4   : > { %v3342_v1 = vld [vmem:[#allocation2 + $0x118] sm:$0xf]  ;;  %v7134_v2 = vld [vmem:[#allocation22_spill] sm:$0xff]  ;;  %v6565_v58 = vmax.f32 %v2709_v12, %v2741_v13  ;;  %v3108_v35 = vld [vmem:[#allocation2 + $0x100] sm:$0xf] }
 0x1e5   : > { %v2610_v62 = vld [vmem:[#allocation3 + $0xf2] sm:$0xff]  ;;  %v7135_v37 = vpack.c.bf16 %v7133_v52, %v7134_v2  ;;  %v2791_v51 = vpack.c.bf16 %v6499_v46, %v2768_v55  ;;  %3062 = vst.msk [vmem:[#allocation2 + $0x10a] sm:$0xff] %vm673_vm2, %v2768_v55  ;;  %v2548_v14 = vld [vmem:[#allocation3 + $0x109] sm:$0xff]  ;;  %v2711_v46 = vmax.f32 %v2647_v56, %v2679_v21  ;;  %v2521_v15 = vld [vmem:[#allocation3 + $0x140] sm:$0xff]  ;;  %v3390_v54 = vmax.f32 %v3294_v18, %v3342_v1 }
 0x1e6   : > { %v3249_v49 = vld [vmem:[#allocation2 + $0x118] sm:$0xf]  ;;  %v2642_v7 = vmax.f32 %v2578_v63, %v2610_v62  ;;  %3531 = vst.msk [vmem:[#allocation3 + $0xb8] sm:$0xf] %vm676_vm3, %v3483_v38  ;;  %v2580_v23 = vmax.f32 %v2516_v24, %v2548_v14  ;;  %v2743_v3 = vld [vmem:[#allocation3 + $0x12c] sm:$0xff]  ;;  %v2518_v45 = vld [vmem:[#allocation3 + $0x120] sm:$0xff] }
 0x1e7   : > { %4610 = vmatprep.mubr.msk.bf16.mxu0 %vm673_vm2, %v7135_v37  ;;  %v2674_v10 = vld [vmem:[#allocation3 + $0xf3] sm:$0xff]  ;;  %4649 = vmatmul.mubr.msk.bf16.gmra.mrb[0].mxu1 %vm673_vm2, %v2791_v51  ;;  %3067 = vst.msk [vmem:[#allocation2 + $0x142] sm:$0xff] %vm673_vm2, %v6565_v58  ;;  %v3297_v57 = vmax.f32 %v3201_v9, %v3249_v49  ;;  %v2612_v6 = vld [vmem:[#allocation3 + $0x10a] sm:$0xff]  ;;  %v6574_v8 = vmax.f32 %v2711_v46, %v2743_v3  ;;  %v2550_v17 = vld [vmem:[#allocation3 + $0x121] sm:$0xff] }
 0x1e8   : > { %v3156_v33 = vld [vmem:[#allocation2 + $0x118] sm:$0xf]  ;;  %v2706_v50 = vmax.f32 %v2642_v7, %v2674_v10  ;;  %2490 = vst.msk [vmem:[#allocation3 + $0x160] sm:$0xf] %vm676_vm3, %v2442_v20  ;;  %v2644_v47 = vmax.f32 %v2580_v23, %v2612_v6  ;;  %v2676_v29 = vld [vmem:[#allocation3 + $0x10b] sm:$0xff]  ;;  %v2582_v60 = vmax.f32 %v2518_v45, %v2550_v17  ;;  %v2553_v4 = vld [vmem:[#allocation3 + $0x141] sm:$0xff] }
 0x1e9   : > { %v2738_v59 = vld [vmem:[#allocation3 + $0xf4] sm:$0xff]  ;;  %v3204_v11 = vmax.f32 %v3108_v35, %v3156_v33  ;;  %v3438_v16 = vld [vmem:[#allocation2 + $0x130] sm:$0xf]  ;;  %v7137_v5 = vld [vmem:[#allocation21_spill] sm:$0xff]  ;;  %3069 = vst.msk [vmem:[#allocation2 + $0x15a] sm:$0xff] %vm673_vm2, %v6574_v8  ;;  %v2585_v42 = vmax.f32 %v2521_v15, %v2553_v4 }
 0x1ea   : > { %v2770_v43 = vmax.f32 %v2706_v50, %v2738_v59  ;;  %v3345_v31 = vld [vmem:[#allocation2 + $0x130] sm:$0xf]  ;;  %v7136_v32 = vld [vmem:[#allocation23_spill] sm:$0xff]  ;;  %v3486_v0 = vmax.f32 %v3390_v54, %v3438_v16  ;;  %v2614_v26 = vld [vmem:[#allocation3 + $0x122] sm:$0xff]  ;;  %v2708_v19 = vmax.f32 %v2644_v47, %v2676_v29 }
 0x1eb   : > { %v3252_v40 = vld [vmem:[#allocation2 + $0x130] sm:$0xf]  ;;  %v7138_v44 = vpack.c.bf16 %v7136_v32, %v7137_v5  ;;  %v3393_v48 = vmax.f32 %v3297_v57, %v3345_v31  ;;  %v3111_v53 = vld [vmem:[#allocation2 + $0x118] sm:$0xf]  ;;  %v2617_v61 = vld [vmem:[#allocation3 + $0x142] sm:$0xff]  ;;  %v2646_v12 = vmax.f32 %v2582_v60, %v2614_v26 }
 0x1ec   : > { %v2792_v28 = vpack.c.bf16 %v6540_v30, %v2770_v43  ;;  %v3300_v27 = vmax.f32 %v3204_v11, %v3252_v40  ;;  %v2740_v22 = vld [vmem:[#allocation3 + $0x10c] sm:$0xff]  ;;  %3064 = vst.msk [vmem:[#allocation2 + $0x122] sm:$0xff] %vm673_vm2, %v2770_v43  ;;  %v2523_v13 = vld [vmem:[#allocation3 + $0x158] sm:$0xff]  ;;  %v2678_v41 = vld [vmem:[#allocation3 + $0x123] sm:$0xff]  ;;  %v2649_v9 = vmax.f32 %v2585_v42, %v2617_v61 }
 0x1ed   : > { %4611 = vmatmul.mubr.msk.bf16.gmra.mrb[44].mxu0 %vm673_vm2, %v7138_v44  ;;  %v3159_v36 = vld [vmem:[#allocation2 + $0x130] sm:$0xf]  ;;  %v6584_v55 = vld [vmem:[#allocation3 + $0x168] sm:$0xff]  ;;  %3534 = vst.msk [vmem:[#allocation3 + $0xd0] sm:$0xf] %vm676_vm3, %v3486_v0  ;;  %v2520_v25 = vld [vmem:[#allocation3 + $0x138] sm:$0xff]  ;;  %v2772_v39 = vmax.f32 %v2708_v19, %v2740_v22  ;;  %v2710_v52 = vmax.f32 %v2646_v12, %v2678_v41 }
 0x1ee   : > { %v6586_v63 = vld [vmem:[#allocation3 + $0x169] sm:$0xff]  ;;  %4652 = vmatprep.mubr.msk.bf16.mxu1 %vm673_vm2, %v2792_v28  ;;  %v3207_v30 = vmax.f32 %v3111_v53, %v3159_v36  ;;  %v2552_v38 = vld [vmem:[#allocation3 + $0x139] sm:$0xff]  ;;  %v2554_v50 = vld [vmem:[#allocation3 + $0x151] sm:$0xff] }
 0x1ef   : > { %v3441_v18 = vld [vmem:[#allocation2 + $0x148] sm:$0xf]  ;;  %v2584_v2 = vmax.f32 %v2520_v25, %v2552_v38  ;;  %v2616_v56 = vld [vmem:[#allocation3 + $0x13a] sm:$0xff]  ;;  %v6592_v10 = vld [vmem:[#allocation2 + $0x10] sm:$0xf]  ;;  %v2793_v33 = vpack.c.bf16 %v6565_v58, %v2772_v39  ;;  %3066 = vst.msk [vmem:[#allocation2 + $0x13a] sm:$0xff] %vm673_vm2, %v2772_v39  ;;  %v2588_v3 = vmax.f32 %v6584_v55, %v6586_v63 }
 0x1f0   : > { %v3348_v1 = vld [vmem:[#allocation2 + $0x148] sm:$0xf]  ;;  %v3489_v34 = vmax.f32 %v3393_v48, %v3441_v18  ;;  %v2522_v20 = vld [vmem:[#allocation3 + $0x150] sm:$0xff]  ;;  %v2555_v46 = vld [vmem:[#allocation3 + $0x159] sm:$0xff] }
 0x1f1   : > { %v2681_v62 = vld [vmem:[#allocation3 + $0x143] sm:$0xff]  ;;  %v3396_v51 = vmax.f32 %v3300_v27, %v3348_v1  ;;  %v2648_v14 = vmax.f32 %v2584_v2, %v2616_v56  ;;  %v2525_v35 = vld [vmem:[#allocation3 + $0x170] sm:$0xff]  ;;  %v2680_v23 = vld [vmem:[#allocation3 + $0x13b] sm:$0xff]  ;;  %v2586_v57 = vmax.f32 %v2522_v20, %v2554_v50  ;;  %v2587_v59 = vmax.f32 %v2523_v13, %v2555_v46  ;;  %4653 = vmatmul.mubr.msk.bf16.gmra.mrb[4].mxu1 %vm673_vm2, %v2793_v33 }
 0x1f2   : > { %v6590_v37 = vld [vmem:[#allocation2 + $0x28] sm:$0xf]  ;;  %v2713_v21 = vmax.f32 %v2649_v9, %v2681_v62  ;;  %3537 = vst.msk [vmem:[#allocation3 + $0xe8] sm:$0xf] %vm676_vm3, %v3489_v34  ;;  %v2744_v54 = vld [vmem:[#allocation3 + $0x13c] sm:$0xff]  ;;  %v2618_v29 = vld [vmem:[#allocation3 + $0x152] sm:$0xff] }
 0x1f3   : > { %v3255_v49 = vld [vmem:[#allocation2 + $0x148] sm:$0xf]  ;;  %v3444_v6 = vld [vmem:[#allocation2 + $0x160] sm:$0xf]  ;;  %v2712_v47 = vmax.f32 %v2648_v14, %v2680_v23  ;;  %v2650_v31 = vmax.f32 %v2586_v57, %v2618_v29  ;;  %v2682_v60 = vld [vmem:[#allocation3 + $0x153] sm:$0xff]  ;;  %v3174_v48 = vmax.f32 %v6592_v10, %v6590_v37 }
 0x1f4   : > { %v2742_v7 = vld [vmem:[#allocation3 + $0x124] sm:$0xff]  ;;  %v6600_v43 = vmax.f32 %v3207_v30, %v3255_v49  ;;  %v2619_v45 = vld [vmem:[#allocation3 + $0x15a] sm:$0xff]  ;;  %v3492_v17 = vmax.f32 %v3396_v51, %v3444_v6  ;;  %v2557_v0 = vld [vmem:[#allocation3 + $0x171] sm:$0xff] }
 0x1f5   : > { %v2774_v24 = vmax.f32 %v2710_v52, %v2742_v7  ;;  %v2745_v15 = vld [vmem:[#allocation3 + $0x144] sm:$0xff]  ;;  %v6604_v16 = vld [vmem:[#allocation2 + $0x160] sm:$0xf]  ;;  %v2651_v40 = vmax.f32 %v2587_v59, %v2619_v45  ;;  %v2776_v5 = vmax.f32 %v2712_v47, %v2744_v54  ;;  %v2746_v44 = vld [vmem:[#allocation3 + $0x154] sm:$0xff]  ;;  %v2714_v28 = vmax.f32 %v2650_v31, %v2682_v60 }
 0x1f6   : > { %v2777_v58 = vmax.f32 %v2713_v21, %v2745_v15  ;;  %v2683_v32 = vld [vmem:[#allocation3 + $0x15b] sm:$0xff]  ;;  %3540 = vst.msk [vmem:[#allocation3 + $0x100] sm:$0xf] %vm676_vm3, %v3492_v17  ;;  %v6611_v22 = vld [vmem:[#allocation2 + $0x128] sm:$0xff]  ;;  %v2589_v53 = vmax.f32 %v2525_v35, %v2557_v0  ;;  %v2621_v26 = vld [vmem:[#allocation3 + $0x172] sm:$0xff]  ;;  %v3399_v61 = vmax.f32 %v6600_v43, %v6604_v16 }
 0x1f7   : > { %v2794_v11 = vpack.c.bf16 %v6574_v8, %v2774_v24  ;;  %3068 = vst.msk [vmem:[#allocation2 + $0x152] sm:$0xff] %vm673_vm2, %v2774_v24  ;;  %v2620_v8 = vld [vmem:[#allocation3 + $0x16a] sm:$0xff]  ;;  %v2715_v27 = vmax.f32 %v2651_v40, %v2683_v32  ;;  %v2747_v4 = vld [vmem:[#allocation3 + $0x15c] sm:$0xff]  ;;  %3070 = vst.msk [vmem:[#allocation2 + $0x16a] sm:$0xff] %vm673_vm2, %v2776_v5  ;;  %v2778_v55 = vmax.f32 %v2714_v28, %v2746_v44 }
 0x1f8   : > { %3071 = vst.msk [vmem:[#allocation2 + $0x172] sm:$0xff] %vm673_vm2, %v2777_v58  ;;  %v2652_v42 = vmax.f32 %v2588_v3, %v2620_v8  ;;  %v2795_v19 = vpack.c.bf16 %v2777_v58, %v2776_v5  ;;  %v2684_v36 = vld [vmem:[#allocation3 + $0x16b] sm:$0xff]  ;;  %v2685_v12 = vld [vmem:[#allocation3 + $0x173] sm:$0xff]  ;;  %v6616_v30 = vld [vmem:[#allocation2 + $0x140] sm:$0xff]  ;;  %v2653_v41 = vmax.f32 %v2589_v53, %v2621_v26 }
 0x1f9   : > { %4656 = vmatprep.mubr.msk.bf16.mxu1 %vm673_vm2, %v2794_v11  ;;  %v2748_v13 = vld [vmem:[#allocation3 + $0x16c] sm:$0xff]  ;;  %v2779_v63 = vmax.f32 %v2715_v27, %v2747_v4  ;;  %v3222_v18 = vld [vmem:[#allocation2 + $0x40] sm:$0xf]  ;;  %v3209_v1 = vmax.f32 %v6611_v22, %v6616_v30  ;;  %v3318_v2 = vld [vmem:[#allocation2 + $0x58] sm:$0xf]  ;;  %3072 = vst.msk [vmem:[#allocation2 + $0x182] sm:$0xff] %vm673_vm2, %v2778_v55 }
 0x1fa   : > { %v2716_v25 = vmax.f32 %v2652_v42, %v2684_v36  ;;  %v3220_v38 = vld [vmem:[#allocation2 + $0x30] sm:$0xff]  ;;  %v7139_v9 = vld [vmem:[#allocation9_spill] sm:$0xff]  ;;  %v3270_v39 = vmax.f32 %v3174_v48, %v3222_v18  ;;  %v6621_v37 = vld [vmem:[#allocation2 + $0x60] sm:$0xff]  ;;  %v2717_v56 = vmax.f32 %v2653_v41, %v2685_v12  ;;  %4657 = vmatmul.mubr.msk.bf16.gmra.mrb[8].mxu1 %vm673_vm2, %v2795_v19 }
 0x1fb   : > { %v3268_v62 = vmax.f32 %v7139_v9, %v3220_v38  ;;  %v3316_v52 = vld [vmem:[#allocation2 + $0x48] sm:$0xff]  ;;  %v4830_v34 = vld [vmem:[#allocation2 + $0x18] sm:$0xff]  ;;  %v2796_v49 = vpack.c.bf16 %v2779_v63, %v2778_v55  ;;  %3073 = vst.msk [vmem:[#allocation2 + $0x18a] sm:$0xff] %vm673_vm2, %v2779_v63  ;;  %v3414_v33 = vld [vmem:[#allocation2 + $0x70] sm:$0xf] }
 0x1fc   : > { %v3175_v51 = vmax.f32 %v4830_v34, %v3220_v38  ;;  %v2749_v10 = vld [vmem:[#allocation3 + $0x174] sm:$0xff]  ;;  %v6627_v21 = vmax.f32 %v2716_v25, %v2748_v13  ;;  %v3178_v24 = vmax.f32 %v3220_v38, %v3316_v52  ;;  %v3366_v46 = vmax.f32 %v3270_v39, %v3318_v2  ;;  %v3559_v15 = vld [vmem:[#allocation3 + $0x20] sm:$0xff] }
 0x1fd   : > { %v3364_v50 = vmax.f32 %v3268_v62, %v3316_v52  ;;  %v6633_v35 = vld [vmem:[#allocation2 + $0x78] sm:$0xff]  ;;  %v3591_v23 = vld [vmem:[#allocation3 + $0x21] sm:$0xff]  ;;  %4660 = vmatprep.mubr.msk.bf16.mxu1 %vm673_vm2, %v2796_v49  ;;  %v2781_v57 = vmax.f32 %v2717_v56, %v2749_v10  ;;  %v6640_v29 = vld [vmem:[#allocation2 + $0x90] sm:$0xff]  ;;  %v3181_v45 = vmax.f32 %v3316_v52, %v6621_v37 }
 0x1fe   : > { %v6625_v7 = vld [vmem:[#allocation2 + $0x158] sm:$0xff]  ;;  %3074 = vst.msk [vmem:[#allocation2 + $0x19a] sm:$0xff] %vm673_vm2, %v6627_v21  ;;  %v3271_v59 = vmax.f32 %v3175_v51, %v3316_v52  ;;  %v3623_v3 = vmax.f32 %v3559_v15, %v3591_v23  ;;  %v3274_v6 = vmax.f32 %v3178_v24, %v6621_v37  ;;  %v3462_v11 = vmax.f32 %v3366_v46, %v3414_v33  ;;  %v3655_v47 = vld [vmem:[#allocation3 + $0x22] sm:$0xff]  ;;  %v3563_v19 = vld [vmem:[#allocation3 + $0x50] sm:$0xff] }
 0x1ff   : > { %v3305_v14 = vmax.f32 %v3209_v1, %v6625_v7  ;;  %v3212_v20 = vmax.f32 %v6616_v30, %v6625_v7  ;;  %v3447_v54 = vld [vmem:[#allocation2 + $0x178] sm:$0xf]  ;;  %v3460_v43 = vmax.f32 %v3364_v50, %v6621_v37  ;;  %v6643_v17 = vld [vmem:[#allocation2 + $0x170] sm:$0xff]  ;;  %v2797_v16 = vpack.c.bf16 %v2781_v57, %v6627_v21  ;;  %3075 = vst.msk [vmem:[#allocation2 + $0x1a2] sm:$0xff] %vm673_vm2, %v2781_v57  ;;  %v3719_v28 = vld [vmem:[#allocation3 + $0x23] sm:$0xff] }
 0x200   : > { %v3495_v58 = vmax.f32 %v3399_v61, %v3447_v54  ;;  %v3367_v31 = vmax.f32 %v3271_v59, %v6621_v37  ;;  %v3687_v40 = vmax.f32 %v3623_v3, %v3655_v47  ;;  %v3370_v60 = vmax.f32 %v3274_v6, %v6633_v35  ;;  %v3561_v32 = vld [vmem:[#allocation3 + $0x38] sm:$0xff]  ;;  %3510 = vst.msk [vmem:[#allocation3 + $0x10] sm:$0xf] %vm676_vm3, %v3462_v11  ;;  %v3783_v55 = vld [vmem:[#allocation3 + $0x24] sm:$0xff]  ;;  %v3363_v34 = vld [vmem:[#allocation2 + $0x1c0] sm:$0xf] }
 0x201   : > { %v3593_v5 = vld [vmem:[#allocation3 + $0x39] sm:$0xff]  ;;  %v3401_v44 = vmax.f32 %v3305_v14, %v6643_v17  ;;  %v3215_v8 = vmax.f32 %v6625_v7, %v6643_v17  ;;  %v3308_v48 = vmax.f32 %v3212_v20, %v6643_v17  ;;  %3508 = vst.msk [vmem:[#allocation3] sm:$0xff] %vm673_vm2, %v3460_v43  ;;  %v3277_v61 = vmax.f32 %v3181_v45, %v6633_v35  ;;  %v3595_v36 = vld [vmem:[#allocation3 + $0x51] sm:$0xff]  ;;  %v6666_v52 = vld [vmem:[#allocation2 + $0xa8] sm:$0xff] }
 0x202   : > { %3543 = vst.msk [vmem:[#allocation3 + $0x118] sm:$0xf] %vm676_vm3, %v3495_v58  ;;  %v3123_v0 = vld [vmem:[#allocation2 + $0x178] sm:$0xf]  ;;  %v3625_v27 = vmax.f32 %v3561_v32, %v3593_v5  ;;  %v3463_v4 = vmax.f32 %v3367_v31, %v6633_v35  ;;  %v3751_v53 = vmax.f32 %v3687_v40, %v3719_v28  ;;  %v3466_v26 = vmax.f32 %v3370_v60, %v6640_v29  ;;  %v3449_v12 = vld [vmem:[#allocation2 + $0x188] sm:$0xff]  ;;  %v3137_v21 = vld [vmem:[#allocation2 + $0x80] sm:$0xff] }
 0x203   : > { %v3657_v42 = vld [vmem:[#allocation3 + $0x3a] sm:$0xff]  ;;  %v3171_v13 = vld [vmem:[#allocation2 + $0x190] sm:$0xf]  ;;  %v3627_v41 = vmax.f32 %v3563_v19, %v3595_v36  ;;  %v3184_v25 = vmax.f32 %v6621_v37, %v6633_v35  ;;  %v3187_v38 = vmax.f32 %v6633_v35, %v6640_v29  ;;  %v3497_v18 = vmax.f32 %v3401_v44, %v3449_v12  ;;  %4661 = vmatmul.mubr.msk.bf16.gmra.mrb[12].mxu1 %vm673_vm2, %v2797_v16  ;;  %v3089_v10 = vld [vmem:[#allocation2 + $0x68] sm:$0xff] }
 0x204   : > { %v3689_v63 = vmax.f32 %v3625_v27, %v3657_v42  ;;  %v3218_v1 = vmax.f32 %v6643_v17, %v3449_v12  ;;  %v3219_v9 = vmax.f32 %v3123_v0, %v3171_v13  ;;  %v3311_v62 = vmax.f32 %v3215_v8, %v3449_v12  ;;  %3511 = vst.msk [vmem:[#allocation3 + $0x18] sm:$0xff] %vm673_vm2, %v3463_v4  ;;  %v3721_v39 = vld [vmem:[#allocation3 + $0x3b] sm:$0xff]  ;;  %v3659_v2 = vld [vmem:[#allocation3 + $0x52] sm:$0xff]  ;;  %v3557_v24 = vld [vmem:[#allocation3 + $0x8] sm:$0xff] }
 0x205   : > { %3514 = vst.msk [vmem:[#allocation3 + $0x30] sm:$0xff] %vm673_vm2, %v3466_v26  ;;  %v3404_v37 = vmax.f32 %v3308_v48, %v3449_v12  ;;  %v6669_v51 = vmax.f32 %v3751_v53, %v3783_v55  ;;  %v3373_v56 = vmax.f32 %v3277_v61, %v6640_v29  ;;  %v6672_v33 = vld [vmem:[#allocation2 + $0x98] sm:$0xff]  ;;  %3545 = vst.msk [vmem:[#allocation3 + $0x128] sm:$0xff] %vm673_vm2, %v3497_v18  ;;  %v6680_v3 = vld [vmem:[#allocation2 + $0xb0] sm:$0xff] }
 0x206   : > { %v3753_v49 = vmax.f32 %v3689_v63, %v3721_v39  ;;  %v3785_v14 = vld [vmem:[#allocation3 + $0x3c] sm:$0xff]  ;;  %v3691_v20 = vmax.f32 %v3627_v41, %v3659_v2  ;;  %v3723_v50 = vld [vmem:[#allocation3 + $0x53] sm:$0xff]  ;;  %v3185_v46 = vmax.f32 %v3089_v10, %v3137_v21  ;;  %v3280_v35 = vmax.f32 %v3184_v25, %v6640_v29  ;;  %v3267_v54 = vld [vmem:[#allocation2 + $0x1a8] sm:$0xf] }
 0x207   : > { %v3188_v15 = vmax.f32 %v3137_v21, %v6672_v33  ;;  %v3266_v23 = vld [vmem:[#allocation2 + $0x1a0] sm:$0xff]  ;;  %v3469_v59 = vmax.f32 %v3373_v56, %v6666_v52  ;;  %v6683_v6 = vmax.f32 %v3187_v38, %v6666_v52  ;;  %v3190_v58 = vmax.f32 %v6640_v29, %v6666_v52  ;;  %v3589_v40 = vld [vmem:[#allocation3 + $0x9] sm:$0xff]  ;;  %v3459_v60 = vld [vmem:[#allocation2 + $0x1d8] sm:$0xf] }
 0x208   : > { %v6677_v57 = vmax.f32 %v3753_v49, %v3785_v14  ;;  %v3314_v43 = vmax.f32 %v3218_v1, %v3266_v23  ;;  %v3315_v11 = vmax.f32 %v3219_v9, %v3267_v54  ;;  %v3407_v47 = vmax.f32 %v3311_v62, %v3266_v23  ;;  %v3556_v16 = vld [vmem:[#allocation3] sm:$0xff]  ;;  %v3787_v0 = vld [vmem:[#allocation3 + $0x54] sm:$0xff]  ;;  %v3653_v42 = vld [vmem:[#allocation3 + $0xa] sm:$0xff] }
 0x209   : > { %v3500_v45 = vmax.f32 %v3404_v37, %v3266_v23  ;;  %v3588_v31 = vld [vmem:[#allocation3 + $0x1] sm:$0xff]  ;;  %v3621_v5 = vmax.f32 %v3557_v24, %v3589_v40  ;;  %3517 = vst.msk [vmem:[#allocation3 + $0x48] sm:$0xff] %vm673_vm2, %v3469_v59  ;;  %v3755_v44 = vmax.f32 %v3691_v20, %v3723_v50  ;;  %v3281_v8 = vmax.f32 %v3185_v46, %v6672_v33  ;;  %v4831_v28 = vld [vmem:[#allocation2 + $0x1b8] sm:$0xff]  ;;  %v4832_v25 = vld [vmem:[#allocation2 + $0x1d0] sm:$0xff] }
 0x20a   : > { %v3620_v32 = vmax.f32 %v3556_v16, %v3588_v31  ;;  %v6689_v48 = vld [vmem:[#allocation2 + $0xc0] sm:$0xff]  ;;  %v3410_v27 = vmax.f32 %v3314_v43, %v4831_v28  ;;  %v3411_v4 = vmax.f32 %v3315_v11, %v3363_v34  ;;  %v3503_v53 = vmax.f32 %v3407_v47, %v4831_v28  ;;  %v6693_v19 = vld [vmem:[#allocation2 + $0xc8] sm:$0xff]  ;;  %v6702_v24 = vld [vmem:[#allocation2 + $0xd8] sm:$0xff] }
 0x20b   : > { %3548 = vst.msk [vmem:[#allocation3 + $0x140] sm:$0xff] %vm673_vm2, %v3500_v45  ;;  %v3652_v26 = vld [vmem:[#allocation3 + $0x2] sm:$0xff]  ;;  %v3376_v61 = vmax.f32 %v3280_v35, %v6666_v52  ;;  %v3685_v12 = vmax.f32 %v3621_v5, %v3653_v42  ;;  %v3558_v13 = vld [vmem:[#allocation3 + $0x18] sm:$0xff]  ;;  %v6695_v63 = vmax.f32 %v3755_v44, %v3787_v0  ;;  %v3377_v41 = vmax.f32 %v3281_v8, %v6680_v3  ;;  %v3717_v9 = vld [vmem:[#allocation3 + $0xb] sm:$0xff] }
 0x20c   : > { %v3684_v36 = vmax.f32 %v3620_v32, %v3652_v26  ;;  %v3590_v55 = vld [vmem:[#allocation3 + $0x19] sm:$0xff]  ;;  %v3506_v38 = vmax.f32 %v3410_v27, %v4832_v25  ;;  %v3507_v18 = vmax.f32 %v3411_v4, %v3459_v60  ;;  %3551 = vst.msk [vmem:[#allocation3 + $0x158] sm:$0xff] %vm673_vm2, %v3503_v53  ;;  %v3716_v1 = vld [vmem:[#allocation3 + $0x3] sm:$0xff]  ;;  %v3560_v39 = vld [vmem:[#allocation3 + $0x30] sm:$0xff]  ;;  %v3284_v21 = vmax.f32 %v3188_v15, %v6680_v3 }
 0x20d   : > { %v3622_v62 = vmax.f32 %v3558_v13, %v3590_v55  ;;  %v3472_v2 = vmax.f32 %v3376_v61, %v6689_v48  ;;  %v3749_v37 = vmax.f32 %v3685_v12, %v3717_v9  ;;  %v3654_v49 = vld [vmem:[#allocation3 + $0x1a] sm:$0xff]  ;;  %v3592_v56 = vld [vmem:[#allocation3 + $0x31] sm:$0xff]  ;;  %v3473_v10 = vmax.f32 %v3377_v41, %v6693_v19  ;;  %v3780_v14 = vld [vmem:[#allocation3 + $0x4] sm:$0xff] }
 0x20e   : > { %v3748_v34 = vmax.f32 %v3684_v36, %v3716_v1  ;;  %3555 = vst.msk [vmem:[#allocation3 + $0x178] sm:$0xf] %vm676_vm3, %v3507_v18  ;;  %v3781_v20 = vld [vmem:[#allocation3 + $0xc] sm:$0xff]  ;;  %v3624_v46 = vmax.f32 %v3560_v39, %v3592_v56  ;;  %v3379_v35 = vmax.f32 %v6683_v6, %v6689_v48  ;;  %v6709_v23 = vld [vmem:[#allocation2 + $0xe0] sm:$0xff]  ;;  %v3191_v15 = vmax.f32 %v6672_v33, %v6680_v3  ;;  %v6725_v29 = vld [vmem:[#allocation2 + $0xf8] sm:$0xff] }
 0x20f   : > { %3554 = vst.msk [vmem:[#allocation3 + $0x170] sm:$0xff] %vm673_vm2, %v3506_v38  ;;  %v3686_v50 = vmax.f32 %v3622_v62, %v3654_v49  ;;  %3520 = vst.msk [vmem:[#allocation3 + $0x60] sm:$0xff] %vm673_vm2, %v3472_v2  ;;  %v3813_v59 = vmax.f32 %v3749_v37, %v3781_v20  ;;  %v3718_v43 = vld [vmem:[#allocation3 + $0x1b] sm:$0xff]  ;;  %v3656_v11 = vld [vmem:[#allocation3 + $0x32] sm:$0xff]  ;;  %v3380_v47 = vmax.f32 %v3284_v21, %v6693_v19 }
 0x210   : > { %v3812_v54 = vmax.f32 %v3748_v34, %v3780_v14  ;;  %3521 = vst.msk [vmem:[#allocation3 + $0x68] sm:$0xff] %vm673_vm2, %v3473_v10  ;;  %v3286_v45 = vmax.f32 %v3190_v58, %v6689_v48  ;;  %v3688_v6 = vmax.f32 %v3624_v46, %v3656_v11  ;;  %v3562_v31 = vld [vmem:[#allocation3 + $0x48] sm:$0xff]  ;;  %v3475_v60 = vmax.f32 %v3379_v35, %v6702_v24  ;;  %v6721_v32 = vld [vmem:[#allocation2 + $0xf0] sm:$0xff]  ;;  %v3782_v44 = vld [vmem:[#allocation3 + $0x1c] sm:$0xff] }
 0x211   : > { %v3750_v16 = vmax.f32 %v3686_v50, %v3718_v43  ;;  %v3594_v40 = vld [vmem:[#allocation3 + $0x49] sm:$0xff]  ;;  %v3287_v33 = vmax.f32 %v3191_v15, %v6693_v19  ;;  %v3720_v0 = vld [vmem:[#allocation3 + $0x33] sm:$0xff]  ;;  %v3476_v28 = vmax.f32 %v3380_v47, %v6709_v23  ;;  %v3193_v42 = vmax.f32 %v6666_v52, %v6689_v48  ;;  %v6759_v35 = vld [vmem:[#allocation2 + $0x120] sm:$0xff] }
 0x212   : > { %v3844_v5 = vpack.c.bf16 %v3813_v59, %v3812_v54  ;;  %v3626_v8 = vmax.f32 %v3562_v31, %v3594_v40  ;;  %v3382_v27 = vmax.f32 %v3286_v45, %v6702_v24  ;;  %v3752_v4 = vmax.f32 %v3688_v6, %v3720_v0  ;;  %v3658_v53 = vld [vmem:[#allocation3 + $0x4a] sm:$0xff]  ;;  %3523 = vst.msk [vmem:[#allocation3 + $0x78] sm:$0xff] %vm673_vm2, %v3475_v60  ;;  %v3784_v61 = vld [vmem:[#allocation3 + $0x34] sm:$0xff] }
 0x213   : > { %v3814_v58 = vmax.f32 %v3750_v16, %v3782_v44  ;;  %v3383_v26 = vmax.f32 %v3287_v33, %v6709_v23  ;;  %3524 = vst.msk [vmem:[#allocation3 + $0x80] sm:$0xff] %vm673_vm2, %v3476_v28  ;;  %v3194_v13 = vmax.f32 %v6680_v3, %v6693_v19  ;;  %v3196_v55 = vmax.f32 %v6689_v48, %v6702_v24  ;;  %v3722_v38 = vld [vmem:[#allocation3 + $0x4b] sm:$0xff] }
 0x214   : > { %4666 = vmatprep.mubr.msk.bf16.mxu1 %vm673_vm2, %v3844_v5  ;;  %v3690_v36 = vmax.f32 %v3626_v8, %v3658_v53  ;;  %v3478_v12 = vmax.f32 %v3382_v27, %v6721_v32  ;;  %v3816_v25 = vmax.f32 %v3752_v4, %v3784_v61  ;;  %v3289_v18 = vmax.f32 %v3193_v42, %v6702_v24  ;;  %v6741_v1 = vld [vmem:[#allocation2 + $0x108] sm:$0xff]  ;;  %v6745_v2 = vld [vmem:[#allocation2 + $0x110] sm:$0xff] }
 0x215   : > { %v3845_v41 = vpack.c.bf16 %v6669_v51, %v3814_v58  ;;  %v3479_v52 = vmax.f32 %v3383_v26, %v6725_v29  ;;  %v3786_v62 = vld [vmem:[#allocation3 + $0x4c] sm:$0xff]  ;;  %v3290_v3 = vmax.f32 %v3194_v13, %v6709_v23  ;;  %v3197_v51 = vmax.f32 %v6693_v19, %v6709_v23 }
 0x216   : > { %v3754_v9 = vmax.f32 %v3690_v36, %v3722_v38  ;;  %v3564_v39 = vld [vmem:[#allocation3 + $0x60] sm:$0xff]  ;;  %3526 = vst.msk [vmem:[#allocation3 + $0x90] sm:$0xff] %vm673_vm2, %v3478_v12  ;;  %v3292_v48 = vmax.f32 %v3196_v55, %v6721_v32  ;;  %v3846_v34 = vpack.c.bf16 %v6677_v57, %v3816_v25  ;;  %v3385_v10 = vmax.f32 %v3289_v18, %v6721_v32 }
 0x217   : > { %4667 = vmatmul.mubr.msk.bf16.vlgmr.msra.gmra.mrb[16].mxu1 %vm673_vm2, %v3845_v41  ;;  %v3565_v37 = vld [vmem:[#allocation3 + $0x68] sm:$0xff]  ;;  %3527 = vst.msk [vmem:[#allocation3 + $0x98] sm:$0xff] %vm673_vm2, %v3479_v52  ;;  %v3199_v21 = vmax.f32 %v6702_v24, %v6721_v32  ;;  %v3200_v14 = vmax.f32 %v6709_v23, %v6725_v29  ;;  %v3386_v46 = vmax.f32 %v3290_v3, %v6725_v29  ;;  %v6766_v23 = vld [vmem:[#allocation2 + $0x138] sm:$0xff] }
 0x218   : > { %v3596_v49 = vld [vmem:[#allocation3 + $0x61] sm:$0xff]  ;;  %v3597_v56 = vld [vmem:[#allocation3 + $0x69] sm:$0xff]  ;;  %v3818_v19 = vmax.f32 %v3754_v9, %v3786_v62  ;;  %4670 = vmatprep.mubr.msk.bf16.mxu1 %vm673_vm2, %v3846_v34  ;;  %v3481_v54 = vmax.f32 %v3385_v10, %v6741_v1  ;;  %v3293_v59 = vmax.f32 %v3197_v51, %v6725_v29  ;;  %v3388_v24 = vmax.f32 %v3292_v48, %v6741_v1 }
 0x219   : > { %v3628_v20 = vmax.f32 %v3564_v39, %v3596_v49  ;;  %v3629_v50 = vmax.f32 %v3565_v37, %v3597_v56  ;;  %v3660_v57 = vld [vmem:[#allocation3 + $0x62] sm:$0xff]  ;;  %v3661_v15 = vld [vmem:[#allocation3 + $0x6a] sm:$0xff]  ;;  %v3295_v43 = vmax.f32 %v3199_v21, %v6741_v1  ;;  %v3566_v31 = vld [vmem:[#allocation3 + $0x78] sm:$0xff]  ;;  %v3482_v40 = vmax.f32 %v3386_v46, %v6745_v2 }
 0x21a   : > { %v3847_v11 = vpack.c.bf16 %v6695_v63, %v3818_v19  ;;  %v3724_v16 = vld [vmem:[#allocation3 + $0x63] sm:$0xff]  ;;  %v3725_v6 = vld [vmem:[#allocation3 + $0x6b] sm:$0xff]  ;;  %v3598_v33 = vld [vmem:[#allocation3 + $0x79] sm:$0xff]  ;;  %3529 = vst.msk [vmem:[#allocation3 + $0xa8] sm:$0xff] %vm673_vm2, %v3481_v54  ;;  %v3389_v44 = vmax.f32 %v3293_v59, %v6745_v2  ;;  %v3484_v0 = vmax.f32 %v3388_v24, %v6759_v35  ;;  %v3296_v8 = vmax.f32 %v3200_v14, %v6745_v2 }
 0x21b   : > { %v3692_v47 = vmax.f32 %v3628_v20, %v3660_v57  ;;  %v3693_v45 = vmax.f32 %v3629_v50, %v3661_v15  ;;  %v3567_v60 = vld [vmem:[#allocation3 + $0x80] sm:$0xff]  ;;  %v3391_v63 = vmax.f32 %v3295_v43, %v6759_v35  ;;  %v3630_v4 = vmax.f32 %v3566_v31, %v3598_v33  ;;  %3530 = vst.msk [vmem:[#allocation3 + $0xb0] sm:$0xff] %vm673_vm2, %v3482_v40  ;;  %v3789_v26 = vld [vmem:[#allocation3 + $0x6c] sm:$0xff] }
 0x21c   : > { %v3599_v5 = vld [vmem:[#allocation3 + $0x81] sm:$0xff]  ;;  %v3485_v36 = vmax.f32 %v3389_v44, %v6611_v22  ;;  %3532 = vst.msk [vmem:[#allocation3 + $0xc0] sm:$0xff] %vm673_vm2, %v3484_v0  ;;  %v3392_v12 = vmax.f32 %v3296_v8, %v6611_v22  ;;  %v3202_v55 = vmax.f32 %v6721_v32, %v6741_v1  ;;  %v3203_v32 = vmax.f32 %v6725_v29, %v6745_v2  ;;  %v6789_v19 = vld [vmem:[#allocation2 + $0x150] sm:$0xff] }
 0x21d   : > { %v3756_v28 = vmax.f32 %v3692_v47, %v3724_v16  ;;  %v3757_v27 = vmax.f32 %v3693_v45, %v3725_v6  ;;  %v3788_v58 = vld [vmem:[#allocation3 + $0x64] sm:$0xff]  ;;  %v3631_v53 = vmax.f32 %v3567_v60, %v3599_v5  ;;  %v3662_v42 = vld [vmem:[#allocation3 + $0x7a] sm:$0xff]  ;;  %v3487_v13 = vmax.f32 %v3391_v63, %v6766_v23  ;;  %v3568_v18 = vld [vmem:[#allocation3 + $0x90] sm:$0xff] }
 0x21e   : > { %v3663_v61 = vld [vmem:[#allocation3 + $0x82] sm:$0xff]  ;;  %v3694_v38 = vmax.f32 %v3630_v4, %v3662_v42  ;;  %v3569_v9 = vld [vmem:[#allocation3 + $0x98] sm:$0xff]  ;;  %3533 = vst.msk [vmem:[#allocation3 + $0xc8] sm:$0xff] %vm673_vm2, %v3485_v36  ;;  %v3488_v34 = vmax.f32 %v3392_v12, %v6616_v30  ;;  %v3298_v37 = vmax.f32 %v3202_v55, %v6759_v35  ;;  %v3299_v15 = vmax.f32 %v3203_v32, %v6611_v22 }
 0x21f   : > { %v3820_v41 = vmax.f32 %v3756_v28, %v3788_v58  ;;  %v3821_v25 = vmax.f32 %v3757_v27, %v3789_v26  ;;  %v3695_v52 = vmax.f32 %v3631_v53, %v3663_v61  ;;  %v3600_v62 = vld [vmem:[#allocation3 + $0x91] sm:$0xff]  ;;  %4671 = vmatmul.mubr.msk.bf16.gmra.mrb[20].mxu1 %vm673_vm2, %v3847_v11  ;;  %v3726_v39 = vld [vmem:[#allocation3 + $0x7b] sm:$0xff]  ;;  %v3727_v3 = vld [vmem:[#allocation3 + $0x83] sm:$0xff]  ;;  %3535 = vst.msk [vmem:[#allocation3 + $0xd8] sm:$0xff] %vm673_vm2, %v3487_v13 }
 0x220   : > { %v3601_v51 = vld [vmem:[#allocation3 + $0x99] sm:$0xff]  ;;  %v3632_v48 = vmax.f32 %v3568_v18, %v3600_v62  ;;  %v3758_v56 = vmax.f32 %v3694_v38, %v3726_v39  ;;  %v3791_v50 = vld [vmem:[#allocation3 + $0x84] sm:$0xff]  ;;  %3536 = vst.msk [vmem:[#allocation3 + $0xe0] sm:$0xff] %vm673_vm2, %v3488_v34  ;;  %v3394_v54 = vmax.f32 %v3298_v37, %v6766_v23  ;;  %v3205_v29 = vmax.f32 %v6741_v1, %v6759_v35  ;;  %v3114_v58 = vld [vmem:[#allocation2 + $0x130] sm:$0xf] }
 0x221   : > { %v3848_v49 = vpack.c.bf16 %v3821_v25, %v3820_v41  ;;  %v3759_v10 = vmax.f32 %v3695_v52, %v3727_v3  ;;  %v3633_v21 = vmax.f32 %v3569_v9, %v3601_v51  ;;  %v3664_v14 = vld [vmem:[#allocation3 + $0x92] sm:$0xff]  ;;  %v3790_v20 = vld [vmem:[#allocation3 + $0x7c] sm:$0xff]  ;;  %v3570_v45 = vld [vmem:[#allocation3 + $0xa8] sm:$0xff]  ;;  %v3206_v16 = vmax.f32 %v6745_v2, %v6611_v22 }
 0x222   : > { %v3665_v46 = vld [vmem:[#allocation3 + $0x9a] sm:$0xff]  ;;  %v3696_v57 = vmax.f32 %v3632_v48, %v3664_v14  ;;  %v3822_v59 = vmax.f32 %v3758_v56, %v3790_v20  ;;  %v6799_v6 = vld [vmem:[#allocation2 + $0x168] sm:$0xff]  ;;  %v3571_v40 = vld [vmem:[#allocation3 + $0xb0] sm:$0xff]  ;;  %v3395_v5 = vmax.f32 %v3299_v15, %v6616_v30  ;;  %v3490_v1 = vmax.f32 %v3394_v54, %v6789_v19 }
 0x223   : > { %4674 = vmatprep.mubr.msk.bf16.mxu1 %vm673_vm2, %v3848_v49  ;;  %v3823_v24 = vmax.f32 %v3759_v10, %v3791_v50  ;;  %v3697_v43 = vmax.f32 %v3633_v21, %v3665_v46  ;;  %v3728_v11 = vld [vmem:[#allocation3 + $0x93] sm:$0xff]  ;;  %v3729_v47 = vld [vmem:[#allocation3 + $0x9b] sm:$0xff]  ;;  %v3602_v60 = vld [vmem:[#allocation3 + $0xa9] sm:$0xff]  ;;  %v3301_v44 = vmax.f32 %v3205_v29, %v6766_v23  ;;  %v3302_v36 = vmax.f32 %v3206_v16, %v6616_v30 }
 0x224   : > { %v3760_v31 = vmax.f32 %v3696_v57, %v3728_v11  ;;  %v3603_v33 = vld [vmem:[#allocation3 + $0xb1] sm:$0xff]  ;;  %v3634_v28 = vmax.f32 %v3570_v45, %v3602_v60  ;;  %v3162_v4 = vld [vmem:[#allocation2 + $0x148] sm:$0xf]  ;;  %v3258_v22 = vld [vmem:[#allocation2 + $0x160] sm:$0xf]  ;;  %v3491_v61 = vmax.f32 %v3395_v5, %v6625_v7  ;;  %3538 = vst.msk [vmem:[#allocation3 + $0xf0] sm:$0xff] %vm673_vm2, %v3490_v1  ;;  %v3208_v18 = vmax.f32 %v6759_v35, %v6766_v23 }
 0x225   : > { %v3849_v0 = vpack.c.bf16 %v3823_v24, %v3822_v59  ;;  %v3761_v8 = vmax.f32 %v3697_v43, %v3729_v47  ;;  %v3792_v63 = vld [vmem:[#allocation3 + $0x94] sm:$0xff]  ;;  %v3635_v27 = vmax.f32 %v3571_v40, %v3603_v33  ;;  %v3793_v2 = vld [vmem:[#allocation3 + $0x9c] sm:$0xff]  ;;  %v3666_v26 = vld [vmem:[#allocation3 + $0xaa] sm:$0xff]  ;;  %v3397_v12 = vmax.f32 %v3301_v44, %v6789_v19 }
 0x226   : > { %v3824_v53 = vmax.f32 %v3760_v31, %v3792_v63  ;;  %v3667_v42 = vld [vmem:[#allocation3 + $0xb2] sm:$0xff]  ;;  %v3698_v55 = vmax.f32 %v3634_v28, %v3666_v26  ;;  %v3572_v25 = vld [vmem:[#allocation3 + $0xc0] sm:$0xff]  ;;  %v3573_v38 = vld [vmem:[#allocation3 + $0xc8] sm:$0xff]  ;;  %3539 = vst.msk [vmem:[#allocation3 + $0xf8] sm:$0xff] %vm673_vm2, %v3491_v61  ;;  %v3398_v30 = vmax.f32 %v3302_v36, %v6625_v7  ;;  %v3210_v48 = vmax.f32 %v3114_v58, %v3162_v4 }
 0x227   : > { %v3825_v13 = vmax.f32 %v3761_v8, %v3793_v2  ;;  %v3699_v41 = vmax.f32 %v3635_v27, %v3667_v42  ;;  %v3604_v52 = vld [vmem:[#allocation3 + $0xc1] sm:$0xff]  ;;  %4675 = vmatmul.mubr.msk.bf16.gmra.mrb[24].mxu1 %vm673_vm2, %v3849_v0  ;;  %v3730_v9 = vld [vmem:[#allocation3 + $0xab] sm:$0xff]  ;;  %v3731_v62 = vld [vmem:[#allocation3 + $0xb3] sm:$0xff]  ;;  %v3493_v51 = vmax.f32 %v3397_v12, %v6799_v6  ;;  %v3304_v54 = vmax.f32 %v3208_v18, %v6789_v19 }
 0x228   : > { %v3605_v39 = vld [vmem:[#allocation3 + $0xc9] sm:$0xff]  ;;  %v3636_v3 = vmax.f32 %v3572_v25, %v3604_v52  ;;  %v3354_v34 = vld [vmem:[#allocation2 + $0x178] sm:$0xf]  ;;  %v3165_v32 = vld [vmem:[#allocation2 + $0x160] sm:$0xf]  ;;  %v3762_v49 = vmax.f32 %v3698_v55, %v3730_v9  ;;  %v3494_v7 = vmax.f32 %v3398_v30, %v6643_v17  ;;  %v3306_v29 = vmax.f32 %v3210_v48, %v3258_v22 }
 0x229   : > { %v3850_v37 = vpack.c.bf16 %v3825_v13, %v3824_v53  ;;  %v3763_v56 = vmax.f32 %v3699_v41, %v3731_v62  ;;  %v3794_v10 = vld [vmem:[#allocation3 + $0xac] sm:$0xff]  ;;  %v3795_v35 = vld [vmem:[#allocation3 + $0xb4] sm:$0xff]  ;;  %v3637_v21 = vmax.f32 %v3573_v38, %v3605_v39  ;;  %v3668_v14 = vld [vmem:[#allocation3 + $0xc2] sm:$0xff]  ;;  %3541 = vst.msk [vmem:[#allocation3 + $0x108] sm:$0xff] %vm673_vm2, %v3493_v51  ;;  %v3211_v60 = vmax.f32 %v6766_v23, %v6789_v19 }
 0x22a   : > { %v6814_v20 = vld [vmem:[#allocation2 + $0x180] sm:$0xff]  ;;  %v3669_v50 = vld [vmem:[#allocation3 + $0xca] sm:$0xff]  ;;  %v3700_v46 = vmax.f32 %v3636_v3, %v3668_v14  ;;  %v3574_v57 = vld [vmem:[#allocation3 + $0xd8] sm:$0xff]  ;;  %v3826_v11 = vmax.f32 %v3762_v49, %v3794_v10  ;;  %3542 = vst.msk [vmem:[#allocation3 + $0x110] sm:$0xff] %vm673_vm2, %v3494_v7  ;;  %v3400_v0 = vmax.f32 %v3304_v54, %v6799_v6  ;;  %v3402_v22 = vmax.f32 %v3306_v29, %v3354_v34 }
 0x22b   : > { %v3575_v15 = vld [vmem:[#allocation3 + $0xe0] sm:$0xff]  ;;  %v3450_v59 = vld [vmem:[#allocation2 + $0x190] sm:$0xf]  ;;  %v3117_v24 = vld [vmem:[#allocation2 + $0x148] sm:$0xf]  ;;  %4678 = vmatprep.mubr.msk.bf16.mxu1 %vm673_vm2, %v3850_v37  ;;  %v3827_v47 = vmax.f32 %v3763_v56, %v3795_v35  ;;  %v3701_v45 = vmax.f32 %v3637_v21, %v3669_v50  ;;  %v3307_v9 = vmax.f32 %v3211_v60, %v6799_v6  ;;  %v3214_v14 = vmax.f32 %v6789_v19, %v6799_v6 }
 0x22c   : > { %v3261_v43 = vld [vmem:[#allocation2 + $0x178] sm:$0xf]  ;;  %v3732_v16 = vld [vmem:[#allocation3 + $0xc3] sm:$0xff]  ;;  %v3733_v17 = vld [vmem:[#allocation3 + $0xcb] sm:$0xff]  ;;  %v3213_v2 = vmax.f32 %v3117_v24, %v3165_v32  ;;  %v3496_v12 = vmax.f32 %v3400_v0, %v6814_v20  ;;  %v3498_v18 = vmax.f32 %v3402_v22, %v3450_v59 }
 0x22d   : > { %v3606_v31 = vld [vmem:[#allocation3 + $0xd9] sm:$0xff]  ;;  %v3607_v40 = vld [vmem:[#allocation3 + $0xe1] sm:$0xff]  ;;  %v3764_v33 = vmax.f32 %v3700_v46, %v3732_v16  ;;  %v3357_v8 = vld [vmem:[#allocation2 + $0x190] sm:$0xf]  ;;  %v3851_v63 = vpack.c.bf16 %v3827_v47, %v3826_v11  ;;  %v3765_v28 = vmax.f32 %v3701_v45, %v3733_v17  ;;  %v3403_v35 = vmax.f32 %v3307_v9, %v6814_v20 }
 0x22e   : > { %v3796_v5 = vld [vmem:[#allocation3 + $0xc4] sm:$0xff]  ;;  %v3638_v1 = vmax.f32 %v3574_v57, %v3606_v31  ;;  %v3639_v44 = vmax.f32 %v3575_v15, %v3607_v40  ;;  %v3670_v27 = vld [vmem:[#allocation3 + $0xda] sm:$0xff]  ;;  %v3576_v4 = vld [vmem:[#allocation3 + $0xf0] sm:$0xff]  ;;  %v3309_v62 = vmax.f32 %v3213_v2, %v3261_v43  ;;  %3544 = vst.msk [vmem:[#allocation3 + $0x120] sm:$0xff] %vm673_vm2, %v3496_v12  ;;  %v3310_v31 = vmax.f32 %v3214_v14, %v6814_v20 }
 0x22f   : > { %v3671_v58 = vld [vmem:[#allocation3 + $0xe2] sm:$0xff]  ;;  %v3797_v53 = vld [vmem:[#allocation3 + $0xcc] sm:$0xff]  ;;  %v3828_v26 = vmax.f32 %v3764_v33, %v3796_v5  ;;  %v6825_v13 = vld [vmem:[#allocation2 + $0x198] sm:$0xff]  ;;  %4679 = vmatmul.mubr.msk.bf16.gmra.mrb[28].mxu1 %vm673_vm2, %v3851_v63  ;;  %3546 = vst.msk [vmem:[#allocation3 + $0x130] sm:$0xf] %vm676_vm3, %v3498_v18  ;;  %v3217_v63 = vmax.f32 %v6799_v6, %v6814_v20 }
 0x230   : > { %v3702_v23 = vmax.f32 %v3638_v1, %v3670_v27  ;;  %v3703_v42 = vmax.f32 %v3639_v44, %v3671_v58  ;;  %v3734_v61 = vld [vmem:[#allocation3 + $0xdb] sm:$0xff]  ;;  %v3735_v36 = vld [vmem:[#allocation3 + $0xe3] sm:$0xff]  ;;  %v3829_v41 = vmax.f32 %v3765_v28, %v3797_v53  ;;  %v3608_v38 = vld [vmem:[#allocation3 + $0xf1] sm:$0xff]  ;;  %v3405_v21 = vmax.f32 %v3309_v62, %v3357_v8 }
 0x231   : > { %v3453_v55 = vld [vmem:[#allocation2 + $0x1a8] sm:$0xf]  ;;  %v3577_v25 = vld [vmem:[#allocation3 + $0xf8] sm:$0xff]  ;;  %v3640_v48 = vmax.f32 %v3576_v4, %v3608_v38  ;;  %v3120_v32 = vld [vmem:[#allocation2 + $0x160] sm:$0xf]  ;;  %v3499_v47 = vmax.f32 %v3403_v35, %v6825_v13  ;;  %v3406_v8 = vmax.f32 %v3310_v31, %v6825_v13 }
 0x232   : > { %v3609_v52 = vld [vmem:[#allocation3 + $0xf9] sm:$0xff]  ;;  %v3766_v39 = vmax.f32 %v3702_v23, %v3734_v61  ;;  %v3767_v3 = vmax.f32 %v3703_v42, %v3735_v36  ;;  %v3799_v51 = vld [vmem:[#allocation3 + $0xe4] sm:$0xff]  ;;  %v3852_v49 = vpack.c.bf16 %v3829_v41, %v3828_v26  ;;  %v3264_v50 = vld [vmem:[#allocation2 + $0x190] sm:$0xf]  ;;  %v3501_v45 = vmax.f32 %v3405_v21, %v3453_v55 }
 0x233   : > { %v3798_v30 = vld [vmem:[#allocation3 + $0xdc] sm:$0xff]  ;;  %v3641_v34 = vmax.f32 %v3577_v25, %v3609_v52  ;;  %v3168_v37 = vld [vmem:[#allocation2 + $0x178] sm:$0xf]  ;;  %v3578_v59 = vld [vmem:[#allocation3 + $0x108] sm:$0xff]  ;;  %3547 = vst.msk [vmem:[#allocation3 + $0x138] sm:$0xff] %vm673_vm2, %v3499_v47  ;;  %v3313_v41 = vmax.f32 %v3217_v63, %v6825_v13 }
 0x234   : > { %v3672_v56 = vld [vmem:[#allocation3 + $0xf2] sm:$0xff]  ;;  %v3673_v10 = vld [vmem:[#allocation3 + $0xfa] sm:$0xff]  ;;  %v3830_v46 = vmax.f32 %v3766_v39, %v3798_v30  ;;  %v3831_v57 = vmax.f32 %v3767_v3, %v3799_v51  ;;  %4682 = vmatprep.mubr.msk.bf16.mxu1 %vm673_vm2, %v3852_v49  ;;  %v3610_v43 = vld [vmem:[#allocation3 + $0x109] sm:$0xff]  ;;  %v3216_v16 = vmax.f32 %v3120_v32, %v3168_v37  ;;  %3549 = vst.msk [vmem:[#allocation3 + $0x148] sm:$0xf] %vm676_vm3, %v3501_v45 }
 0x235   : > { %v3704_v15 = vmax.f32 %v3640_v48, %v3672_v56  ;;  %v3705_v7 = vmax.f32 %v3641_v34, %v3673_v10  ;;  %v3736_v54 = vld [vmem:[#allocation3 + $0xf3] sm:$0xff]  ;;  %v3737_v29 = vld [vmem:[#allocation3 + $0xfb] sm:$0xff]  ;;  %v3642_v60 = vmax.f32 %v3578_v59, %v3610_v43  ;;  %v3360_v17 = vld [vmem:[#allocation2 + $0x1a8] sm:$0xf] }
 0x236   : > { %v3579_v24 = vld [vmem:[#allocation3 + $0x110] sm:$0xff]  ;;  %v3801_v5 = vld [vmem:[#allocation3 + $0xfc] sm:$0xff]  ;;  %v3312_v0 = vmax.f32 %v3216_v16, %v3264_v50  ;;  %v3853_v28 = vpack.c.bf16 %v3831_v57, %v3830_v46  ;;  %v3581_v2 = vld [vmem:[#allocation3 + $0x128] sm:$0xff] }
 0x237   : > { %v3611_v11 = vld [vmem:[#allocation3 + $0x111] sm:$0xff]  ;;  %v3768_v19 = vmax.f32 %v3704_v15, %v3736_v54  ;;  %v3769_v40 = vmax.f32 %v3705_v7, %v3737_v29  ;;  %v3456_v53 = vld [vmem:[#allocation2 + $0x1c0] sm:$0xf]  ;;  %v3613_v38 = vld [vmem:[#allocation3 + $0x129] sm:$0xff] }
 0x238   : > { %v3800_v33 = vld [vmem:[#allocation3 + $0xf4] sm:$0xff]  ;;  %v3643_v1 = vmax.f32 %v3579_v24, %v3611_v11  ;;  %v3674_v44 = vld [vmem:[#allocation3 + $0x10a] sm:$0xff]  ;;  %v3580_v42 = vld [vmem:[#allocation3 + $0x120] sm:$0xff]  ;;  %v3408_v36 = vmax.f32 %v3312_v0, %v3360_v17  ;;  %4683 = vmatmul.mubr.msk.bf16.gmra.mrb[0].mxu1 %vm673_vm2, %v3853_v28  ;;  %v3645_v62 = vmax.f32 %v3581_v2, %v3613_v38 }
 0x239   : > { %v3832_v27 = vmax.f32 %v3768_v19, %v3800_v33  ;;  %v3833_v58 = vmax.f32 %v3769_v40, %v3801_v5  ;;  %v3675_v4 = vld [vmem:[#allocation3 + $0x112] sm:$0xff]  ;;  %v3706_v22 = vmax.f32 %v3642_v60, %v3674_v44  ;;  %v3612_v61 = vld [vmem:[#allocation3 + $0x121] sm:$0xff]  ;;  %v3677_v34 = vld [vmem:[#allocation3 + $0x12a] sm:$0xff] }
 0x23a   : > { %v3707_v26 = vmax.f32 %v3643_v1, %v3675_v4  ;;  %v3738_v23 = vld [vmem:[#allocation3 + $0x10b] sm:$0xff]  ;;  %v3739_v6 = vld [vmem:[#allocation3 + $0x113] sm:$0xff]  ;;  %v3644_v52 = vmax.f32 %v3580_v42, %v3612_v61  ;;  %v3676_v39 = vld [vmem:[#allocation3 + $0x122] sm:$0xff]  ;;  %v3504_v30 = vmax.f32 %v3408_v36, %v3456_v53  ;;  %v3709_v56 = vmax.f32 %v3645_v62, %v3677_v34 }
 0x23b   : > { %v4833_v12 = vld [vmem:[#allocation2 + $0x1b0] sm:$0xff]  ;;  %v3854_v25 = vpack.c.bf16 %v3833_v58, %v3832_v27  ;;  %v3770_v20 = vmax.f32 %v3706_v22, %v3738_v23  ;;  %v3583_v3 = vld [vmem:[#allocation3 + $0x140] sm:$0xff]  ;;  %v4834_v21 = vld [vmem:[#allocation2 + $0x1c8] sm:$0xff] }
 0x23c   : > { %v3502_v55 = vmax.f32 %v3406_v8, %v4833_v12  ;;  %v3771_v18 = vmax.f32 %v3707_v26, %v3739_v6  ;;  %v3802_v9 = vld [vmem:[#allocation3 + $0x10c] sm:$0xff]  ;;  %v3409_v51 = vmax.f32 %v3313_v41, %v4833_v12  ;;  %v3803_v48 = vld [vmem:[#allocation3 + $0x114] sm:$0xff]  ;;  %v3708_v32 = vmax.f32 %v3644_v52, %v3676_v39  ;;  %v3740_v10 = vld [vmem:[#allocation3 + $0x123] sm:$0xff]  ;;  %3552 = vst.msk [vmem:[#allocation3 + $0x160] sm:$0xf] %vm676_vm3, %v3504_v30 }
 0x23d   : > { %4686 = vmatprep.mubr.msk.bf16.mxu1 %vm673_vm2, %v3854_v25  ;;  %v3834_v13 = vmax.f32 %v3770_v20, %v3802_v9  ;;  %v3587_v37 = vld [vmem:[#allocation3 + $0x170] sm:$0xff]  ;;  %v3582_v57 = vld [vmem:[#allocation3 + $0x138] sm:$0xff]  ;;  %v3615_v7 = vld [vmem:[#allocation3 + $0x141] sm:$0xff]  ;;  %vm4241_vm3 = vcmask 64512  }
 0x23e   : > { %3550 = vst.msk [vmem:[#allocation3 + $0x150] sm:$0xff] %vm673_vm2, %v3502_v55  ;;  %v3835_v49 = vmax.f32 %v3771_v18, %v3803_v48  ;;  %v3741_v35 = vld [vmem:[#allocation3 + $0x12b] sm:$0xff]  ;;  %v3505_v14 = vmax.f32 %v3409_v51, %v4834_v21  ;;  %v3772_v46 = vmax.f32 %v3708_v32, %v3740_v10  ;;  %v3614_v15 = vld [vmem:[#allocation3 + $0x139] sm:$0xff]  ;;  %v3647_v24 = vmax.f32 %v3583_v3, %v3615_v7  ;;  %v3679_v16 = vld [vmem:[#allocation3 + $0x142] sm:$0xff] }
 0x23f   : > { %v3619_v50 = vld [vmem:[#allocation3 + $0x171] sm:$0xff]  ;;  %v3773_v54 = vmax.f32 %v3709_v56, %v3741_v35  ;;  %v3804_v29 = vld [vmem:[#allocation3 + $0x124] sm:$0xff]  ;;  %v3646_v59 = vmax.f32 %v3582_v57, %v3614_v15  ;;  %v3678_v45 = vld [vmem:[#allocation3 + $0x13a] sm:$0xff] }
 0x240   : > { %3553 = vst.msk [vmem:[#allocation3 + $0x168] sm:$0xff] %vm673_vm2, %v3505_v14  ;;  %v3855_v43 = vpack.c.bf16 %v3835_v49, %v3834_v13  ;;  %v3805_v11 = vld [vmem:[#allocation3 + $0x12c] sm:$0xff]  ;;  %v3836_v47 = vmax.f32 %v3772_v46, %v3804_v29  ;;  %v3651_v31 = vmax.f32 %v3587_v37, %v3619_v50  ;;  %v3711_v60 = vmax.f32 %v3647_v24, %v3679_v16  ;;  %v3742_v17 = vld [vmem:[#allocation3 + $0x13b] sm:$0xff]  ;;  %v3743_v5 = vld [vmem:[#allocation3 + $0x143] sm:$0xff] }
 0x241   : > { %v3837_v19 = vmax.f32 %v3773_v54, %v3805_v11  ;;  %v3710_v40 = vmax.f32 %v3646_v59, %v3678_v45  ;;  %v3585_v33 = vld [vmem:[#allocation3 + $0x158] sm:$0xff]  ;;  %v3807_v4 = vld [vmem:[#allocation3 + $0x144] sm:$0xff] }
 0x242   : > { %4687 = vmatmul.mubr.msk.bf16.gmra.mrb[4].mxu1 %vm673_vm2, %v3855_v43  ;;  %v3775_v63 = vmax.f32 %v3711_v60, %v3743_v5  ;;  %v3806_v28 = vld [vmem:[#allocation3 + $0x13c] sm:$0xff]  ;;  %v3683_v58 = vld [vmem:[#allocation3 + $0x172] sm:$0xff] }
 0x243   : > { %v3856_v0 = vpack.c.bf16 %v3837_v19, %v3836_v47  ;;  %v3774_v8 = vmax.f32 %v3710_v40, %v3742_v17  ;;  %v3617_v22 = vld [vmem:[#allocation3 + $0x159] sm:$0xff]  ;;  %v3715_v53 = vmax.f32 %v3651_v31, %v3683_v58 }
 0x244   : > { %v3839_v23 = vmax.f32 %v3775_v63, %v3807_v4  ;;  %v3649_v42 = vmax.f32 %v3585_v33, %v3617_v22  ;;  %v3681_v12 = vld [vmem:[#allocation3 + $0x15a] sm:$0xff] }
 0x245   : > { %v3584_v1 = vld [vmem:[#allocation3 + $0x150] sm:$0xff]  ;;  %4690 = vmatprep.mubr.msk.bf16.mxu1 %vm673_vm2, %v3856_v0  ;;  %v3838_v26 = vmax.f32 %v3774_v8, %v3806_v28  ;;  %v3745_v18 = vld [vmem:[#allocation3 + $0x15b] sm:$0xff] }
 0x246   : > { %v3616_v44 = vld [vmem:[#allocation3 + $0x151] sm:$0xff]  ;;  %v3713_v25 = vmax.f32 %v3649_v42, %v3681_v12  ;;  %v3809_v48 = vld [vmem:[#allocation3 + $0x15c] sm:$0xff] }
 0x247   : > { %v3648_v27 = vmax.f32 %v3584_v1, %v3616_v44  ;;  %v3680_v2 = vld [vmem:[#allocation3 + $0x152] sm:$0xff]  ;;  %v3586_v55 = vld [vmem:[#allocation3 + $0x168] sm:$0xff]  ;;  %v3857_v52 = vpack.c.bf16 %v3839_v23, %v3838_v26 }
 0x248   : > { %v3744_v36 = vld [vmem:[#allocation3 + $0x153] sm:$0xff]  ;;  %v3618_v41 = vld [vmem:[#allocation3 + $0x169] sm:$0xff]  ;;  %v3777_v3 = vmax.f32 %v3713_v25, %v3745_v18  ;;  %v6853_v14 = vpop.f32.mrb[48].mxu0 }
 0x249   : > { %v3712_v61 = vmax.f32 %v3648_v27, %v3680_v2  ;;  %v3650_v20 = vmax.f32 %v3586_v55, %v3618_v41  ;;  %v3747_v38 = vld [vmem:[#allocation3 + $0x173] sm:$0xff]  ;;  %v3682_v62 = vld [vmem:[#allocation3 + $0x16a] sm:$0xff]  ;;  %v6855_v50 = vpop.f32.mrb[49].mxu0 }
 0x24a   : > { %v3808_v9 = vld [vmem:[#allocation3 + $0x154] sm:$0xff]  ;;  %v3779_v39 = vmax.f32 %v3715_v53, %v3747_v38  ;;  %4691 = vmatmul.mubr.msk.bf16.gmra.mrb[8].mxu1 %vm673_vm2, %v3857_v52  ;;  %v3746_v13 = vld [vmem:[#allocation3 + $0x16b] sm:$0xff]  ;;  %v3841_v34 = vmax.f32 %v3777_v3, %v3809_v48  ;;  %v6857_v46 = vpop.f32.mrb[50].mxu0  ;;  %v6904_v53 = vld [vmem:[%s7039_s4] ss:$0 sm:$0xff] }
 0x24b   : > { %v3776_v6 = vmax.f32 %v3712_v61, %v3744_v36  ;;  %v3714_v51 = vmax.f32 %v3650_v20, %v3682_v62  ;;  %v3811_v37 = vld [vmem:[#allocation3 + $0x174] sm:$0xff]  ;;  %v3810_v49 = vld [vmem:[#allocation3 + $0x16c] sm:$0xff]  ;;  %v6859_v57 = vpop.f32.mrb[51].mxu0 }
 0x24c   : > { %v3843_v56 = vmax.f32 %v3779_v39, %v3811_v37 }
 0x24d   : > { %v3840_v30 = vmax.f32 %v3776_v6, %v3808_v9  ;;  %v3778_v32 = vmax.f32 %v3714_v51, %v3746_v13 }
 0x24f   : > { %v3858_v10 = vpack.c.bf16 %v3841_v34, %v3840_v30  ;;  %v3842_v35 = vmax.f32 %v3778_v32, %v3810_v49 }
 0x251   : > { %4694 = vmatprep.mubr.msk.bf16.mxu1 %vm673_vm2, %v3858_v10  ;;  %v3859_v21 = vpack.c.bf16 %v3843_v56, %v3842_v35 }
 0x253   : > { %4695 = vmatmul.mubr.msk.bf16.gmra.mrb[12].mxu1 %vm673_vm2, %v3859_v21 }
 0x25b   : > { %v6861_v15 = vpop.f32.mrb[52].mxu0 }
 0x25c   : > { %v6863_v7 = vpop.f32.mrb[53].mxu0 }
 0x25d   : > { %v6865_v54 = vpop.f32.mrb[54].mxu0 }
 0x25e   : > { %v6867_v29 = vpop.f32.mrb[55].mxu0 }
 0x263   : > { %v6869_v59 = vpop.f32.mrb[56].mxu0 }
 0x264   : > { %v6871_v24 = vpop.f32.mrb[57].mxu0 }
 0x265   : > { %v6873_v43 = vpop.f32.mrb[58].mxu0 }
 0x266   : > { %v6875_v11 = vpop.f32.mrb[59].mxu0 }
 0x296   : > { %v6877_v47 = vpop.f32.mrb[60].mxu0 }
 0x297   : > { %v6879_v45 = vpop.f32.mrb[61].mxu0 }
 0x298   : > { %v6881_v16 = vpop.f32.mrb[62].mxu0 }
 0x299   : > { %v6883_v31 = vpop.f32.mrb[63].mxu0 }
 0x2a1   : > { %v4600_v19 = vpop.f32.mrb[32].mxu0 }
 0x2a2   : > { %v1855_v40 = vpop.f32.mrb[33].mxu0 }
 0x2a3   : > { %v4601_v60 = vpop.f32.mrb[34].mxu0 }
 0x2a4   : > { %v1858_v17 = vpop.f32.mrb[35].mxu0 }
 0x2ac   : > { %v4604_v33 = vpop.f32.mrb[36].mxu0 }
 0x2ad   : > { %v1871_v5 = vpop.f32.mrb[37].mxu0 }
 0x2ae   : > { %v4605_v1 = vpop.f32.mrb[38].mxu0 }
 0x2af   : > { %v1874_v44 = vpop.f32.mrb[39].mxu0 }
 0x2b6   : > { %v6885_v0 = vpop.f32.mrb[40].mxu0 }
 0x2b7   : > { %v6887_v8 = vpop.f32.mrb[41].mxu0 }
 0x2b8   : > { %v6889_v63 = vpop.f32.mrb[42].mxu0 }
 0x2b9   : > { %v6891_v28 = vpop.f32.mrb[43].mxu0 }
 0x2c0   : > { %v6893_v27 = vpop.f32.mrb[44].mxu0 }
 0x2c1   : > { %v6895_v58 = vpop.f32.mrb[45].mxu0 }
 0x2c2   : > { %v6897_v4 = vpop.f32.mrb[46].mxu0 }
 0x2c3   : > { %v6899_v22 = vpop.f32.mrb[47].mxu0 }
 0x2ea   : > { %v4668_v2 = vpop.f32.mrb[16].mxu1 }
 0x2eb   : > { %v4700_v26 = vadd.f32 %v4668_v2, %v4600_v19  ;;  %v3947_v23 = vpop.f32.mrb[17].mxu1 }
 0x2ec   : > { %v4701_v42 = vadd.f32 %v3947_v23, %v1855_v40  ;;  %v4669_v61 = vpop.f32.mrb[18].mxu1 }
 0x2ed   : > { %v4115_v36 = vadd.f32 %v4700_v26, %v6904_v53  ;;  %v4702_v12 = vadd.f32 %v4669_v61, %v4601_v60  ;;  %v3950_v55 = vpop.f32.mrb[19].mxu1 }
 0x2ee   : > { %v4113_v41 = vadd.f32 %v4701_v42, %v6904_v53  ;;  %v4703_v25 = vadd.f32 %v3950_v55, %v1858_v17 }
 0x2ef   : > { %vm4147_vm2 = vcmp.gt.f32.partialorder %v4115_v36, 0.0  ;;  %v4179_v6 = vmul.f32 0.01, %v4115_v36  ;;  %v4116_v20 = vadd.f32 %v4702_v12, %v6904_v53 }
 0x2f0   : > { %vm4145_vm4 = vcmp.gt.f32.partialorder %v4113_v41, 0.0  ;;  %v4177_v38 = vmul.f32 0.01, %v4113_v41  ;;  %v4114_v52 = vadd.f32 %v4703_v25, %v6904_v53 }
 0x2f1   : > { %v4211_v18 = vsel %vm4147_vm2, %v4115_v36, %v4179_v6  ;;  %vm4148_vm11 = vcmp.gt.f32.partialorder %v4116_v20, 0.0  ;;  %v4180_v9 = vmul.f32 0.01, %v4116_v20 }
 0x2f2   : > { %4244 = vst.msk [vmem:[%s6912_s22 + $0x10] sm:$0xff] %vm4241_vm3, %v4211_v18  ;;  %v4209_v62 = vsel %vm4145_vm4, %v4113_v41, %v4177_v38  ;;  %vm4146_vm12 = vcmp.gt.f32.partialorder %v4114_v52, 0.0  ;;  %v4178_v39 = vmul.f32 0.01, %v4114_v52  ;;  %v4672_v3 = vpop.f32.mrb[20].mxu1 }
 0x2f3   : > { %4242 = vst.msk [vmem:[%s6912_s22] sm:$0xff] %vm4241_vm3, %v4209_v62  ;;  %v4212_v30 = vsel %vm4148_vm11, %v4116_v20, %v4180_v9  ;;  %v4704_v51 = vadd.f32 %v4672_v3, %v4604_v33  ;;  %v3963_v48 = vpop.f32.mrb[21].mxu1 }
 0x2f4   : > { %4245 = vst.msk [vmem:[%s6912_s22 + $0x18] sm:$0xff] %vm4241_vm3, %v4212_v30  ;;  %v4210_v13 = vsel %vm4146_vm12, %v4114_v52, %v4178_v39  ;;  %v4705_v34 = vadd.f32 %v3963_v48, %v1871_v5  ;;  %v4673_v32 = vpop.f32.mrb[22].mxu1 }
 0x2f5   : > { %4243 = vst.msk [vmem:[%s6912_s22 + $0x8] sm:$0xff] %vm4241_vm3, %v4210_v13  ;;  %v4119_v37 = vadd.f32 %v4704_v51, %v6904_v53  ;;  %v4706_v49 = vadd.f32 %v4673_v32, %v4605_v1  ;;  %v3966_v56 = vpop.f32.mrb[23].mxu1 }
 0x2f6   : > { %v4117_v10 = vadd.f32 %v4705_v34, %v6904_v53  ;;  %v4707_v35 = vadd.f32 %v3966_v56, %v1874_v44 }
 0x2f7   : > { %vm4151_vm13 = vcmp.gt.f32.partialorder %v4119_v37, 0.0  ;;  %v4183_v21 = vmul.f32 0.01, %v4119_v37  ;;  %v4120_v19 = vadd.f32 %v4706_v49, %v6904_v53 }
 0x2f8   : > { %vm4149_vm14 = vcmp.gt.f32.partialorder %v4117_v10, 0.0  ;;  %v4181_v40 = vmul.f32 0.01, %v4117_v10  ;;  %v4118_v60 = vadd.f32 %v4707_v35, %v6904_v53 }
 0x2f9   : > { %v4215_v17 = vsel %vm4151_vm13, %v4119_v37, %v4183_v21  ;;  %vm4152_vm15 = vcmp.gt.f32.partialorder %v4120_v19, 0.0  ;;  %v4184_v33 = vmul.f32 0.01, %v4120_v19 }
 0x2fa   : > { %4248 = vst.msk [vmem:[%s6912_s22 + $0x30] sm:$0xff] %vm4241_vm3, %v4215_v17  ;;  %v4213_v5 = vsel %vm4149_vm14, %v4117_v10, %v4181_v40  ;;  %vm4150_vm0 = vcmp.gt.f32.partialorder %v4118_v60, 0.0  ;;  %v4182_v1 = vmul.f32 0.01, %v4118_v60  ;;  %v4676_v2 = vpop.f32.mrb[24].mxu1 }
 0x2fb   : > { %4246 = vst.msk [vmem:[%s6912_s22 + $0x20] sm:$0xff] %vm4241_vm3, %v4213_v5  ;;  %v4216_v44 = vsel %vm4152_vm15, %v4120_v19, %v4184_v33  ;;  %v4708_v26 = vadd.f32 %v4676_v2, %v6885_v0  ;;  %v3979_v23 = vpop.f32.mrb[25].mxu1 }
 0x2fc   : > { %4249 = vst.msk [vmem:[%s6912_s22 + $0x38] sm:$0xff] %vm4241_vm3, %v4216_v44  ;;  %v4214_v42 = vsel %vm4150_vm0, %v4118_v60, %v4182_v1  ;;  %v4709_v61 = vadd.f32 %v3979_v23, %v6887_v8  ;;  %v4677_v36 = vpop.f32.mrb[26].mxu1 }
 0x2fd   : > { %4247 = vst.msk [vmem:[%s6912_s22 + $0x28] sm:$0xff] %vm4241_vm3, %v4214_v42  ;;  %v4123_v12 = vadd.f32 %v4708_v26, %v6904_v53  ;;  %v4710_v55 = vadd.f32 %v4677_v36, %v6889_v63  ;;  %v3982_v41 = vpop.f32.mrb[27].mxu1 }
 0x2fe   : > { %v4121_v25 = vadd.f32 %v4709_v61, %v6904_v53  ;;  %v4711_v0 = vadd.f32 %v3982_v41, %v6891_v28 }
 0x2ff   : > { %vm4155_vm1 = vcmp.gt.f32.partialorder %v4123_v12, 0.0  ;;  %v4187_v6 = vmul.f32 0.01, %v4123_v12  ;;  %v4124_v20 = vadd.f32 %v4710_v55, %v6904_v53 }
 0x300   : > { %vm4153_vm5 = vcmp.gt.f32.partialorder %v4121_v25, 0.0  ;;  %v4185_v8 = vmul.f32 0.01, %v4121_v25  ;;  %v4122_v38 = vadd.f32 %v4711_v0, %v6904_v53 }
 0x301   : > { %v4219_v52 = vsel %vm4155_vm1, %v4123_v12, %v4187_v6  ;;  %vm4156_vm6 = vcmp.gt.f32.partialorder %v4124_v20, 0.0  ;;  %v4188_v18 = vmul.f32 0.01, %v4124_v20 }
 0x302   : > { %4252 = vst.msk [vmem:[%s6912_s22 + $0x50] sm:$0xff] %vm4241_vm3, %v4219_v52  ;;  %v4217_v63 = vsel %vm4153_vm5, %v4121_v25, %v4185_v8  ;;  %vm4154_vm7 = vcmp.gt.f32.partialorder %v4122_v38, 0.0  ;;  %v4186_v9 = vmul.f32 0.01, %v4122_v38  ;;  %v4680_v62 = vpop.f32.mrb[28].mxu1 }
 0x303   : > { %4250 = vst.msk [vmem:[%s6912_s22 + $0x40] sm:$0xff] %vm4241_vm3, %v4217_v63  ;;  %v4220_v28 = vsel %vm4156_vm6, %v4124_v20, %v4188_v18  ;;  %v4712_v39 = vadd.f32 %v4680_v62, %v6893_v27  ;;  %v3995_v3 = vpop.f32.mrb[29].mxu1 }
 0x304   : > { %4253 = vst.msk [vmem:[%s6912_s22 + $0x58] sm:$0xff] %vm4241_vm3, %v4220_v28  ;;  %v4218_v30 = vsel %vm4154_vm7, %v4122_v38, %v4186_v9  ;;  %v4713_v51 = vadd.f32 %v3995_v3, %v6895_v58  ;;  %v4681_v48 = vpop.f32.mrb[30].mxu1 }
 0x305   : > { %4251 = vst.msk [vmem:[%s6912_s22 + $0x48] sm:$0xff] %vm4241_vm3, %v4218_v30  ;;  %v4127_v13 = vadd.f32 %v4712_v39, %v6904_v53  ;;  %v4714_v34 = vadd.f32 %v4681_v48, %v6897_v4  ;;  %v3998_v32 = vpop.f32.mrb[31].mxu1 }
 0x306   : > { %v4125_v37 = vadd.f32 %v4713_v51, %v6904_v53  ;;  %v4715_v27 = vadd.f32 %v3998_v32, %v6899_v22 }
 0x307   : > { %vm4159_vm8 = vcmp.gt.f32.partialorder %v4127_v13, 0.0  ;;  %v4191_v49 = vmul.f32 0.01, %v4127_v13  ;;  %v4128_v56 = vadd.f32 %v4714_v34, %v6904_v53 }
 0x308   : > { %vm4157_vm9 = vcmp.gt.f32.partialorder %v4125_v37, 0.0  ;;  %v4189_v58 = vmul.f32 0.01, %v4125_v37  ;;  %v4126_v10 = vadd.f32 %v4715_v27, %v6904_v53 }
 0x309   : > { %v4223_v35 = vsel %vm4159_vm8, %v4127_v13, %v4191_v49  ;;  %vm4160_vm10 = vcmp.gt.f32.partialorder %v4128_v56, 0.0  ;;  %v4192_v21 = vmul.f32 0.01, %v4128_v56 }
 0x30a   : > { %4256 = vst.msk [vmem:[%s6912_s22 + $0x70] sm:$0xff] %vm4241_vm3, %v4223_v35  ;;  %v4221_v4 = vsel %vm4157_vm9, %v4125_v37, %v4189_v58  ;;  %vm4158_vm2 = vcmp.gt.f32.partialorder %v4126_v10, 0.0  ;;  %v4190_v19 = vmul.f32 0.01, %v4126_v10 }
 0x30b   : > { %v4684_v40 = vpop.f32.mrb[0].mxu1  ;;  %4254 = vst.msk [vmem:[%s6912_s22 + $0x60] sm:$0xff] %vm4241_vm3, %v4221_v4  ;;  %v4224_v22 = vsel %vm4160_vm10, %v4128_v56, %v4192_v21 }
 0x30c   : > { %v4716_v60 = vadd.f32 %v4684_v40, %v6853_v14  ;;  %v4011_v17 = vpop.f32.mrb[1].mxu1  ;;  %4257 = vst.msk [vmem:[%s6912_s22 + $0x78] sm:$0xff] %vm4241_vm3, %v4224_v22  ;;  %v4222_v33 = vsel %vm4158_vm2, %v4126_v10, %v4190_v19 }
 0x30d   : > { %v4717_v5 = vadd.f32 %v4011_v17, %v6855_v50  ;;  %v4685_v1 = vpop.f32.mrb[2].mxu1  ;;  %4255 = vst.msk [vmem:[%s6912_s22 + $0x68] sm:$0xff] %vm4241_vm3, %v4222_v33 }
 0x30e   : > { %v4131_v2 = vadd.f32 %v4716_v60, %v6904_v53  ;;  %v4718_v44 = vadd.f32 %v4685_v1, %v6857_v46  ;;  %v4014_v26 = vpop.f32.mrb[3].mxu1 }
 0x30f   : > { %v4129_v23 = vadd.f32 %v4717_v5, %v6904_v53  ;;  %v4719_v14 = vadd.f32 %v4014_v26, %v6859_v57 }
 0x310   : > { %vm4163_vm4 = vcmp.gt.f32.partialorder %v4131_v2, 0.0  ;;  %v4195_v42 = vmul.f32 0.01, %v4131_v2  ;;  %v4132_v61 = vadd.f32 %v4718_v44, %v6904_v53 }
 0x311   : > { %vm4161_vm11 = vcmp.gt.f32.partialorder %v4129_v23, 0.0  ;;  %v4193_v50 = vmul.f32 0.01, %v4129_v23  ;;  %v4130_v36 = vadd.f32 %v4719_v14, %v6904_v53 }
 0x312   : > { %v4227_v12 = vsel %vm4163_vm4, %v4131_v2, %v4195_v42  ;;  %vm4164_vm12 = vcmp.gt.f32.partialorder %v4132_v61, 0.0  ;;  %v4196_v55 = vmul.f32 0.01, %v4132_v61 }
 0x313   : > { %4260 = vst.msk [vmem:[%s6912_s22 + $0x90] sm:$0xff] %vm4241_vm3, %v4227_v12  ;;  %v4225_v46 = vsel %vm4161_vm11, %v4129_v23, %v4193_v50  ;;  %vm4162_vm13 = vcmp.gt.f32.partialorder %v4130_v36, 0.0  ;;  %v4194_v41 = vmul.f32 0.01, %v4130_v36 }
 0x314   : > { %4258 = vst.msk [vmem:[%s6912_s22 + $0x80] sm:$0xff] %vm4241_vm3, %v4225_v46  ;;  %v4228_v57 = vsel %vm4164_vm12, %v4132_v61, %v4196_v55 }
 0x315   : > { %v4688_v25 = vpop.f32.mrb[4].mxu1  ;;  %4261 = vst.msk [vmem:[%s6912_s22 + $0x98] sm:$0xff] %vm4241_vm3, %v4228_v57  ;;  %v4226_v20 = vsel %vm4162_vm13, %v4130_v36, %v4194_v41 }
 0x316   : > { %v4720_v0 = vadd.f32 %v4688_v25, %v6861_v15  ;;  %v4027_v6 = vpop.f32.mrb[5].mxu1  ;;  %4259 = vst.msk [vmem:[%s6912_s22 + $0x88] sm:$0xff] %vm4241_vm3, %v4226_v20 }
 0x317   : > { %v4721_v8 = vadd.f32 %v4027_v6, %v6863_v7  ;;  %v4689_v38 = vpop.f32.mrb[6].mxu1 }
 0x318   : > { %v4135_v52 = vadd.f32 %v4720_v0, %v6904_v53  ;;  %v4722_v18 = vadd.f32 %v4689_v38, %v6865_v54  ;;  %v4030_v63 = vpop.f32.mrb[7].mxu1 }
 0x319   : > { %v4133_v9 = vadd.f32 %v4721_v8, %v6904_v53  ;;  %v4723_v15 = vadd.f32 %v4030_v63, %v6867_v29 }
 0x31a   : > { %vm4167_vm14 = vcmp.gt.f32.partialorder %v4135_v52, 0.0  ;;  %v4199_v62 = vmul.f32 0.01, %v4135_v52  ;;  %v4136_v28 = vadd.f32 %v4722_v18, %v6904_v53 }
 0x31b   : > { %vm4165_vm15 = vcmp.gt.f32.partialorder %v4133_v9, 0.0  ;;  %v4197_v7 = vmul.f32 0.01, %v4133_v9  ;;  %v4134_v39 = vadd.f32 %v4723_v15, %v6904_v53 }
 0x31c   : > { %v4231_v3 = vsel %vm4167_vm14, %v4135_v52, %v4199_v62  ;;  %vm4168_vm0 = vcmp.gt.f32.partialorder %v4136_v28, 0.0  ;;  %v4200_v30 = vmul.f32 0.01, %v4136_v28 }
 0x31d   : > { %4264 = vst.msk [vmem:[%s6912_s22 + $0xb0] sm:$0xff] %vm4241_vm3, %v4231_v3  ;;  %v4229_v54 = vsel %vm4165_vm15, %v4133_v9, %v4197_v7  ;;  %vm4166_vm1 = vcmp.gt.f32.partialorder %v4134_v39, 0.0  ;;  %v4198_v51 = vmul.f32 0.01, %v4134_v39  ;;  %v4692_v48 = vpop.f32.mrb[8].mxu1 }
 0x31e   : > { %4262 = vst.msk [vmem:[%s6912_s22 + $0xa0] sm:$0xff] %vm4241_vm3, %v4229_v54  ;;  %v4232_v29 = vsel %vm4168_vm0, %v4136_v28, %v4200_v30  ;;  %v4724_v13 = vadd.f32 %v4692_v48, %v6869_v59  ;;  %v4043_v34 = vpop.f32.mrb[9].mxu1 }
 0x31f   : > { %4265 = vst.msk [vmem:[%s6912_s22 + $0xb8] sm:$0xff] %vm4241_vm3, %v4232_v29  ;;  %v4230_v32 = vsel %vm4166_vm1, %v4134_v39, %v4198_v51  ;;  %v4725_v37 = vadd.f32 %v4043_v34, %v6871_v24  ;;  %v4693_v27 = vpop.f32.mrb[10].mxu1 }
 0x320   : > { %4263 = vst.msk [vmem:[%s6912_s22 + $0xa8] sm:$0xff] %vm4241_vm3, %v4230_v32  ;;  %v4139_v49 = vadd.f32 %v4724_v13, %v6904_v53  ;;  %v4726_v56 = vadd.f32 %v4693_v27, %v6873_v43  ;;  %v4046_v58 = vpop.f32.mrb[11].mxu1 }
 0x321   : > { %v4137_v10 = vadd.f32 %v4725_v37, %v6904_v53  ;;  %v4727_v59 = vadd.f32 %v4046_v58, %v6875_v11 }
 0x322   : > { %vm4171_vm5 = vcmp.gt.f32.partialorder %v4139_v49, 0.0  ;;  %v4203_v35 = vmul.f32 0.01, %v4139_v49  ;;  %v4140_v21 = vadd.f32 %v4726_v56, %v6904_v53 }
 0x323   : > { %vm4169_vm6 = vcmp.gt.f32.partialorder %v4137_v10, 0.0  ;;  %v4201_v24 = vmul.f32 0.01, %v4137_v10  ;;  %v4138_v4 = vadd.f32 %v4727_v59, %v6904_v53 }
 0x324   : > { %v4235_v19 = vsel %vm4171_vm5, %v4139_v49, %v4203_v35  ;;  %vm4172_vm7 = vcmp.gt.f32.partialorder %v4140_v21, 0.0  ;;  %v4204_v40 = vmul.f32 0.01, %v4140_v21 }
 0x325   : > { %4268 = vst.msk [vmem:[%s6912_s22 + $0xd0] sm:$0xff] %vm4241_vm3, %v4235_v19  ;;  %v4233_v43 = vsel %vm4169_vm6, %v4137_v10, %v4201_v24  ;;  %vm4170_vm8 = vcmp.gt.f32.partialorder %v4138_v4, 0.0  ;;  %v4202_v22 = vmul.f32 0.01, %v4138_v4 }
 0x326   : > { %v4696_v60 = vpop.f32.mrb[12].mxu1  ;;  %4266 = vst.msk [vmem:[%s6912_s22 + $0xc0] sm:$0xff] %vm4241_vm3, %v4233_v43  ;;  %v4236_v11 = vsel %vm4172_vm7, %v4140_v21, %v4204_v40 }
 0x327   : > { %v4728_v17 = vadd.f32 %v4696_v60, %v6877_v47  ;;  %v4059_v33 = vpop.f32.mrb[13].mxu1  ;;  %4269 = vst.msk [vmem:[%s6912_s22 + $0xd8] sm:$0xff] %vm4241_vm3, %v4236_v11  ;;  %v4234_v5 = vsel %vm4170_vm8, %v4138_v4, %v4202_v22 }
 0x328   : > { %v4729_v1 = vadd.f32 %v4059_v33, %v6879_v45  ;;  %v4697_v2 = vpop.f32.mrb[14].mxu1  ;;  %4267 = vst.msk [vmem:[%s6912_s22 + $0xc8] sm:$0xff] %vm4241_vm3, %v4234_v5 }
 0x329   : > { %v4143_v44 = vadd.f32 %v4728_v17, %v6904_v53  ;;  %v4730_v26 = vadd.f32 %v4697_v2, %v6881_v16  ;;  %v4062_v23 = vpop.f32.mrb[15].mxu1 }
 0x32a   : > { %v4141_v14 = vadd.f32 %v4729_v1, %v6904_v53  ;;  %v4731_v47 = vadd.f32 %v4062_v23, %v6883_v31 }
 0x32b   : > { %vm4175_vm9 = vcmp.gt.f32.partialorder %v4143_v44, 0.0  ;;  %v4207_v42 = vmul.f32 0.01, %v4143_v44  ;;  %v4144_v45 = vadd.f32 %v4730_v26, %v6904_v53 }
 0x32c   : > { %vm4173_vm10 = vcmp.gt.f32.partialorder %v4141_v14, 0.0  ;;  %v4205_v61 = vmul.f32 0.01, %v4141_v14  ;;  %v4142_v50 = vadd.f32 %v4731_v47, %v6904_v53 }
 0x32d   : > { %v4239_v36 = vsel %vm4175_vm9, %v4143_v44, %v4207_v42  ;;  %vm4176_vm2 = vcmp.gt.f32.partialorder %v4144_v45, 0.0  ;;  %v4208_v12 = vmul.f32 0.01, %v4144_v45 }
 0x32e   : > { %4272 = vst.msk [vmem:[%s6912_s22 + $0xf0] sm:$0xff] %vm4241_vm3, %v4239_v36  ;;  %v4237_v16 = vsel %vm4173_vm10, %v4141_v14, %v4205_v61  ;;  %vm4174_vm4 = vcmp.gt.f32.partialorder %v4142_v50, 0.0  ;;  %v4206_v55 = vmul.f32 0.01, %v4142_v50 }
 0x32f   : > { %4270 = vst.msk [vmem:[%s6912_s22 + $0xe0] sm:$0xff] %vm4241_vm3, %v4237_v16  ;;  %v4240_v31 = vsel %vm4176_vm2, %v4144_v45, %v4208_v12 }
 0x330   : > { %4273 = vst.msk [vmem:[%s6912_s22 + $0xf8] sm:$0xff] %vm4241_vm3, %v4240_v31  ;;  %v4238_v46 = vsel %vm4174_vm4, %v4142_v50, %v4206_v55 }
 0x331   : > { %4271 = vst.msk [vmem:[%s6912_s22 + $0xe8] sm:$0xff] %vm4241_vm3, %v4238_v46 }
 0x332 PF: > { %s15_s18 = sadd.s32 1, %s4841_s18  }
 0x333   : > { %p12_p4 = scmp.ge.s32.totalorder %s15_s18, 4  }
 0x335   :  { %14 = sbr.rel (!%p12_p4) target bundleno = 1 (0x1), region = 77 }

</bundles_post_ra>
